<compile_context>
chip_gen: v7x
topology: tpu7x:2x2x1
jax: 0.10.0
libtpu: 0.0.40
codegen_flags: <defaults>
</compile_context>

<pallas_src>
import jax
import jax.numpy as jnp
from jax.experimental import pallas as pl
from jax.experimental.pallas import tpu as pltpu

EPS = 1e-5  # nn.InstanceNorm2d default eps (affine=False, track_running_stats=False)


def _instance_norm(acc, n_px):
    """acc: (H*W, C) f32. Per-channel stats over H*W, biased variance, no affine."""
    inv_n = 1.0 / n_px
    m = jnp.sum(acc, axis=0, keepdims=True) * inv_n
    ex2 = jnp.sum(acc * acc, axis=0, keepdims=True) * inv_n
    inv_std = jax.lax.rsqrt(ex2 - m * m + EPS)
    return acc * inv_std - m * inv_std                  # fused normalize


def _reflect_pad_h(pad_ref, img, H):
    """Write img (H, W, C) plus its 1-row reflected H-halo into pad_ref (H+2, W, C)."""
    pad_ref[1:H + 1, :, :] = img
    pad_ref[0:1, :, :] = img[1:2, :, :]                  # padded row -1  == row 1
    pad_ref[H + 1:H + 2, :, :] = img[H - 2:H - 1, :, :]  # padded row  H  == row H-2


def _conv3x3_reflect_w(pad_ref, w_ref, H, W, C):
    """3x3 conv over an H-halo'd buffer, reflect handling of the W border.

    pad_ref: (H+2, W, C) VMEM scratch (rows 0 / H+1 hold the reflected rows).
    w_ref:   (9, Cin, Cout) weight ref, tap-major (ky*3 + kx).
    Returns f32 (H*W, Cout) accumulator.  No bias: InstanceNorm cancels it exactly.
    """
    Hp = H + 2
    p = pad_ref[...].astype(w_ref.dtype)                 # cast once for the MXU

    # W-shifted operands with the reflected border column folded into the concat:
    #   left[:,  w] = p[:, w-1]  (w=0   -> col 1)
    #   right[:, w] = p[:, w+1]  (w=W-1 -> col W-2)
    left = jnp.concatenate([p[:, 1:2, :], p[:, 0:W - 1, :]], axis=1)
    right = jnp.concatenate([p[:, 1:W, :], p[:, W - 2:W - 1, :]], axis=1)

    acc = jnp.zeros((H * W, C), jnp.float32)
    for kx, s in enumerate((left, p, right)):
        # (Hp, W, C) -> (Hp*W, C): layout-preserving when W % 8 == 0 (lanes untouched).
        s2d = s.reshape(Hp * W, C)
        for ky in range(3):
            # Row offset ky*W is a multiple of 8 => aligned slice, no relayout copy.
            lhs = s2d[ky * W:ky * W + H * W, :]
            acc = acc + jnp.dot(lhs, w_ref[ky * 3 + kx],
                                preferred_element_type=jnp.float32)
    return acc


def resnet_block_kernel(x_ref, w1_ref, w2_ref, o_ref, pad_ref):
    """Fused ResnetBlock forward for one image (grid iterates over the batch)."""
    _, H, W, C = o_ref.shape
    n_px = H * W
    x = x_ref[0]                                          # (H, W, C) f32, stays resident

    # --- conv1 -> InstanceNorm -> ReLU (intermediate never leaves VMEM) ------------
    _reflect_pad_h(pad_ref, x, H)
    acc = _conv3x3_reflect_w(pad_ref, w1_ref, H, W, C)
    y = jnp.maximum(_instance_norm(acc, n_px), 0.0).reshape(H, W, C)

    # --- conv2 -> InstanceNorm -> residual add --------------------------------------
    _reflect_pad_h(pad_ref, y, H)
    acc = _conv3x3_reflect_w(pad_ref, w2_ref, H, W, C)
    z = _instance_norm(acc, n_px).reshape(H, W, C)

    o_ref[0] = (x + z).astype(o_ref.dtype)


def resnet_block_nhwc(x, w1, w2, *, compute_dtype=jnp.float32):
    """x: (N,H,W,C) f32; w1,w2: (3,3,Cin,Cout) HWIO.  padding_type='reflect'.

    Conv biases are intentionally not taken: InstanceNorm2d(affine=False) cancels any
    per-channel constant exactly.  compute_dtype=jnp.bfloat16 feeds the MXU in bf16
    (stats / normalize / residual stay f32).
    """
    N, H, W, C = x.shape
    assert H >= 2 and W >= 2, "reflection padding of 1 needs H, W >= 2"
    assert W % 8 == 0, "W must be a multiple of 8 (sublane-aligned (Hp*W, C) views)"
    w1f = w1.reshape(9, C, C).astype(compute_dtype)
    w2f = w2.reshape(9, C, C).astype(compute_dtype)

    return pl.pallas_call(
        resnet_block_kernel,
        out_shape=jax.ShapeDtypeStruct((N, H, W, C), x.dtype),
        grid=(N,),
        in_specs=[
            pl.BlockSpec((1, H, W, C), lambda n: (n, 0, 0, 0)),
            pl.BlockSpec((9, C, C), lambda n: (0, 0, 0)),
            pl.BlockSpec((9, C, C), lambda n: (0, 0, 0)),
        ],
        out_specs=pl.BlockSpec((1, H, W, C), lambda n: (n, 0, 0, 0)),
        scratch_shapes=[pltpu.VMEM((H + 2, W, C), jnp.float32)],
        compiler_params=pltpu.CompilerParams(
            dimension_semantics=("parallel",),        # batch axis -> megacore
            vmem_limit_bytes=48 * 1024 * 1024,        # explicit; safe on v5e/v6e/v7x
        ),
    )(x, w1f, w2f)


def resnet_block_nchw(x_nchw, w1, b1, w2, b2, *, compute_dtype=jnp.float32):
    """PyTorch-convention entry: NCHW activations, HWIO weights.

    b1/b2 are accepted for API parity with nn.Conv2d but ignored: they are
    mathematically cancelled by the affine-free InstanceNorm that follows each conv.
    """
    del b1, b2
    x = jnp.transpose(x_nchw, (0, 2, 3, 1))
    out = resnet_block_nhwc(x, w1, w2, compute_dtype=compute_dtype)
    return jnp.transpose(out, (0, 3, 1, 2))


# ---- pure-JAX reference (with biases, as in the PyTorch module) ----------------------
def _reference_nhwc(x, w1, b1, w2, b2):
    def conv(xp, w, b):
        return jax.lax.conv_general_dilated(
            xp, w, (1, 1), "VALID",
            dimension_numbers=("NHWC", "HWIO", "NHWC")) + b.reshape(1, 1, 1, -1)

    def inorm(y):
        m = jnp.mean(y, axis=(1, 2), keepdims=True)
        v = jnp.mean((y - m) ** 2, axis=(1, 2), keepdims=True)
        return (y - m) / jnp.sqrt(v + EPS)

    xp = jnp.pad(x, ((0, 0), (1, 1), (1, 1), (0, 0)), mode="reflect")
    y = jnp.maximum(inorm(conv(xp, w1, b1)), 0.0)
    yp = jnp.pad(y, ((0, 0), (1, 1), (1, 1), (0, 0)), mode="reflect")
    return x + inorm(conv(yp, w2, b2))


if __name__ == "__main__":
    N, C, H, W = 2, 4, 16, 16   # ResnetBlock(dim=4, 'reflect', use_dropout=False)
    key = jax.random.PRNGKey(0)
    kx, kw1, kb1, kw2, kb2 = jax.random.split(key, 5)

    x_nchw = jax.random.normal(kx, (N, C, H, W), jnp.float32)
    w1 = jax.random.normal(kw1, (3, 3, C, C), jnp.float32) * 0.1
    b1 = jax.random.normal(kb1, (C,), jnp.float32) * 0.1
    w2 = jax.random.normal(kw2, (3, 3, C, C), jnp.float32) * 0.1
    b2 = jax.random.normal(kb2, (C,), jnp.float32) * 0.1

    out = jax.block_until_ready(resnet_block_nchw(x_nchw, w1, b1, w2, b2))

    # sanity check vs. pure-JAX reference (reference keeps the conv biases, which the
    # kernel drops -- they must agree because InstanceNorm cancels the bias exactly)
    x_nhwc = jnp.transpose(x_nchw, (0, 2, 3, 1))
    ref = jnp.transpose(_reference_nhwc(x_nhwc, w1, b1, w2, b2), (0, 3, 1, 2))
    assert out.shape == (N, C, H, W)
    err = float(jnp.max(jnp.abs(out - ref)))
    assert err < 2e-4, err

    print("KERNEL_OK")
</pallas_src>

<mosaic_0001>
module attributes {stable_mosaic.version = 11 : i64} {
  func.func @resnet_block_kernel(%arg0: i32, %arg1: memref<1x16x16x4xf32, #tpu.memory_space<vmem>>, %arg2: memref<9x4x4xf32, #tpu.memory_space<vmem>>, %arg3: memref<9x4x4xf32, #tpu.memory_space<vmem>>, %arg4: memref<1x16x16x4xf32, #tpu.memory_space<vmem>>, %arg5: memref<18x16x4xf32, #tpu.memory_space<vmem>>) attributes {dimension_semantics = [#tpu.dimension_semantics<parallel>], iteration_bounds = array<i64: 2>, scalar_prefetch = 0 : i64, scratch_operands = 1 : i64, tpu.core_type = #tpu.core_type<tc>, window_params = [{transform_indices = @transform_0, window_bounds = array<i64: 1, 16, 16, 4>}, {pipeline_mode = #tpu.pipeline_mode<synchronous>, transform_indices = @transform_1, window_bounds = array<i64: 9, 4, 4>}, {pipeline_mode = #tpu.pipeline_mode<synchronous>, transform_indices = @transform_2, window_bounds = array<i64: 9, 4, 4>}, {transform_indices = @transform_3, window_bounds = array<i64: 1, 16, 16, 4>}]} {
    %c0 = arith.constant 0 : index
    %c0_0 = arith.constant 0 : index
    %c0_1 = arith.constant 0 : index
    %c0_2 = arith.constant 0 : index
    %0 = vector.load %arg1[%c0, %c0_0, %c0_1, %c0_2] : memref<1x16x16x4xf32, #tpu.memory_space<vmem>>, vector<1x16x16x4xf32>
    %1 = vector.shape_cast %0 : vector<1x16x16x4xf32> to vector<16x16x4xf32>
    %c1 = arith.constant 1 : index
    %c0_3 = arith.constant 0 : index
    %c0_4 = arith.constant 0 : index
    %2 = vector.load %arg5[%c1, %c0_3, %c0_4] : memref<18x16x4xf32, #tpu.memory_space<vmem>>, vector<16x16x4xf32>
    tpu.vector_store %arg5[%c1, %c0_3, %c0_4], %1 {strides = array<i32>} : memref<18x16x4xf32, #tpu.memory_space<vmem>>, vector<16x16x4xf32>,
    %3 = vector.extract_strided_slice %1 {offsets = [1, 0, 0], sizes = [1, 16, 4], strides = [1, 1, 1]} : vector<16x16x4xf32> to vector<1x16x4xf32>
    %c0_5 = arith.constant 0 : index
    %c0_6 = arith.constant 0 : index
    %c0_7 = arith.constant 0 : index
    %4 = vector.load %arg5[%c0_5, %c0_6, %c0_7] : memref<18x16x4xf32, #tpu.memory_space<vmem>>, vector<1x16x4xf32>
    tpu.vector_store %arg5[%c0_5, %c0_6, %c0_7], %3 {strides = array<i32>} : memref<18x16x4xf32, #tpu.memory_space<vmem>>, vector<1x16x4xf32>,
    %5 = vector.extract_strided_slice %1 {offsets = [14, 0, 0], sizes = [1, 16, 4], strides = [1, 1, 1]} : vector<16x16x4xf32> to vector<1x16x4xf32>
    %c17 = arith.constant 17 : index
    %c0_8 = arith.constant 0 : index
    %c0_9 = arith.constant 0 : index
    %6 = vector.load %arg5[%c17, %c0_8, %c0_9] : memref<18x16x4xf32, #tpu.memory_space<vmem>>, vector<1x16x4xf32>
    tpu.vector_store %arg5[%c17, %c0_8, %c0_9], %5 {strides = array<i32>} : memref<18x16x4xf32, #tpu.memory_space<vmem>>, vector<1x16x4xf32>,
    %c0_10 = arith.constant 0 : index
    %c0_11 = arith.constant 0 : index
    %c0_12 = arith.constant 0 : index
    %7 = vector.load %arg5[%c0_10, %c0_11, %c0_12] : memref<18x16x4xf32, #tpu.memory_space<vmem>>, vector<18x16x4xf32>
    %8 = vector.extract_strided_slice %7 {offsets = [0, 1, 0], sizes = [18, 1, 4], strides = [1, 1, 1]} : vector<18x16x4xf32> to vector<18x1x4xf32>
    %9 = vector.extract_strided_slice %7 {offsets = [0, 0, 0], sizes = [18, 15, 4], strides = [1, 1, 1]} : vector<18x16x4xf32> to vector<18x15x4xf32>
    %10 = tpu.concatenate %8, %9 in 1 : vector<18x1x4xf32>, vector<18x15x4xf32> -> vector<18x16x4xf32>
    %11 = vector.extract_strided_slice %7 {offsets = [0, 1, 0], sizes = [18, 15, 4], strides = [1, 1, 1]} : vector<18x16x4xf32> to vector<18x15x4xf32>
    %12 = vector.extract_strided_slice %7 {offsets = [0, 14, 0], sizes = [18, 1, 4], strides = [1, 1, 1]} : vector<18x16x4xf32> to vector<18x1x4xf32>
    %13 = tpu.concatenate %11, %12 in 1 : vector<18x15x4xf32>, vector<18x1x4xf32> -> vector<18x16x4xf32>
    %cst = arith.constant 0.000000e+00 : f32
    %14 = vector.broadcast %cst : f32 to vector<256x4xf32>
    %15 = vector.shape_cast %10 : vector<18x16x4xf32> to vector<288x4xf32>
    %16 = vector.extract_strided_slice %15 {offsets = [0, 0], sizes = [256, 4], strides = [1, 1]} : vector<288x4xf32> to vector<256x4xf32>
    %c0_13 = arith.constant 0 : index
    %c0_14 = arith.constant 0 : index
    %c0_15 = arith.constant 0 : index
    %17 = vector.load %arg2[%c0_13, %c0_14, %c0_15] : memref<9x4x4xf32, #tpu.memory_space<vmem>>, vector<1x4x4xf32>
    %18 = vector.shape_cast %17 : vector<1x4x4xf32> to vector<4x4xf32>
    %cst_16 = arith.constant dense<0.000000e+00> : vector<256x4xf32>
    %19 = tpu.matmul %16, %18, %cst_16 {dimension_numbers = #tpu.dot_dimension_numbers<[1], [0], [0], [1], [0, 0, 1, 1], [], []>} : vector<256x4xf32>, vector<4x4xf32>, vector<256x4xf32> -> vector<256x4xf32>
    %20 = arith.addf %14, %19 : vector<256x4xf32>
    %21 = vector.extract_strided_slice %15 {offsets = [16, 0], sizes = [256, 4], strides = [1, 1]} : vector<288x4xf32> to vector<256x4xf32>
    %c3 = arith.constant 3 : index
    %c0_17 = arith.constant 0 : index
    %c0_18 = arith.constant 0 : index
    %22 = vector.load %arg2[%c3, %c0_17, %c0_18] : memref<9x4x4xf32, #tpu.memory_space<vmem>>, vector<1x4x4xf32>
    %23 = vector.shape_cast %22 : vector<1x4x4xf32> to vector<4x4xf32>
    %cst_19 = arith.constant dense<0.000000e+00> : vector<256x4xf32>
    %24 = tpu.matmul %21, %23, %cst_19 {dimension_numbers = #tpu.dot_dimension_numbers<[1], [0], [0], [1], [0, 0, 1, 1], [], []>} : vector<256x4xf32>, vector<4x4xf32>, vector<256x4xf32> -> vector<256x4xf32>
    %25 = arith.addf %20, %24 : vector<256x4xf32>
    %26 = vector.extract_strided_slice %15 {offsets = [32, 0], sizes = [256, 4], strides = [1, 1]} : vector<288x4xf32> to vector<256x4xf32>
    %c6 = arith.constant 6 : index
    %c0_20 = arith.constant 0 : index
    %c0_21 = arith.constant 0 : index
    %27 = vector.load %arg2[%c6, %c0_20, %c0_21] : memref<9x4x4xf32, #tpu.memory_space<vmem>>, vector<1x4x4xf32>
    %28 = vector.shape_cast %27 : vector<1x4x4xf32> to vector<4x4xf32>
    %cst_22 = arith.constant dense<0.000000e+00> : vector<256x4xf32>
    %29 = tpu.matmul %26, %28, %cst_22 {dimension_numbers = #tpu.dot_dimension_numbers<[1], [0], [0], [1], [0, 0, 1, 1], [], []>} : vector<256x4xf32>, vector<4x4xf32>, vector<256x4xf32> -> vector<256x4xf32>
    %30 = arith.addf %25, %29 : vector<256x4xf32>
    %31 = vector.shape_cast %7 : vector<18x16x4xf32> to vector<288x4xf32>
    %32 = vector.extract_strided_slice %31 {offsets = [0, 0], sizes = [256, 4], strides = [1, 1]} : vector<288x4xf32> to vector<256x4xf32>
    %c1_23 = arith.constant 1 : index
    %c0_24 = arith.constant 0 : index
    %c0_25 = arith.constant 0 : index
    %33 = vector.load %arg2[%c1_23, %c0_24, %c0_25] : memref<9x4x4xf32, #tpu.memory_space<vmem>>, vector<1x4x4xf32>
    %34 = vector.shape_cast %33 : vector<1x4x4xf32> to vector<4x4xf32>
    %cst_26 = arith.constant dense<0.000000e+00> : vector<256x4xf32>
    %35 = tpu.matmul %32, %34, %cst_26 {dimension_numbers = #tpu.dot_dimension_numbers<[1], [0], [0], [1], [0, 0, 1, 1], [], []>} : vector<256x4xf32>, vector<4x4xf32>, vector<256x4xf32> -> vector<256x4xf32>
    %36 = arith.addf %30, %35 : vector<256x4xf32>
    %37 = vector.extract_strided_slice %31 {offsets = [16, 0], sizes = [256, 4], strides = [1, 1]} : vector<288x4xf32> to vector<256x4xf32>
    %c4 = arith.constant 4 : index
    %c0_27 = arith.constant 0 : index
    %c0_28 = arith.constant 0 : index
    %38 = vector.load %arg2[%c4, %c0_27, %c0_28] : memref<9x4x4xf32, #tpu.memory_space<vmem>>, vector<1x4x4xf32>
    %39 = vector.shape_cast %38 : vector<1x4x4xf32> to vector<4x4xf32>
    %cst_29 = arith.constant dense<0.000000e+00> : vector<256x4xf32>
    %40 = tpu.matmul %37, %39, %cst_29 {dimension_numbers = #tpu.dot_dimension_numbers<[1], [0], [0], [1], [0, 0, 1, 1], [], []>} : vector<256x4xf32>, vector<4x4xf32>, vector<256x4xf32> -> vector<256x4xf32>
    %41 = arith.addf %36, %40 : vector<256x4xf32>
    %42 = vector.extract_strided_slice %31 {offsets = [32, 0], sizes = [256, 4], strides = [1, 1]} : vector<288x4xf32> to vector<256x4xf32>
    %c7 = arith.constant 7 : index
    %c0_30 = arith.constant 0 : index
    %c0_31 = arith.constant 0 : index
    %43 = vector.load %arg2[%c7, %c0_30, %c0_31] : memref<9x4x4xf32, #tpu.memory_space<vmem>>, vector<1x4x4xf32>
    %44 = vector.shape_cast %43 : vector<1x4x4xf32> to vector<4x4xf32>
    %cst_32 = arith.constant dense<0.000000e+00> : vector<256x4xf32>
    %45 = tpu.matmul %42, %44, %cst_32 {dimension_numbers = #tpu.dot_dimension_numbers<[1], [0], [0], [1], [0, 0, 1, 1], [], []>} : vector<256x4xf32>, vector<4x4xf32>, vector<256x4xf32> -> vector<256x4xf32>
    %46 = arith.addf %41, %45 : vector<256x4xf32>
    %47 = vector.shape_cast %13 : vector<18x16x4xf32> to vector<288x4xf32>
    %48 = vector.extract_strided_slice %47 {offsets = [0, 0], sizes = [256, 4], strides = [1, 1]} : vector<288x4xf32> to vector<256x4xf32>
    %c2 = arith.constant 2 : index
    %c0_33 = arith.constant 0 : index
    %c0_34 = arith.constant 0 : index
    %49 = vector.load %arg2[%c2, %c0_33, %c0_34] : memref<9x4x4xf32, #tpu.memory_space<vmem>>, vector<1x4x4xf32>
    %50 = vector.shape_cast %49 : vector<1x4x4xf32> to vector<4x4xf32>
    %cst_35 = arith.constant dense<0.000000e+00> : vector<256x4xf32>
    %51 = tpu.matmul %48, %50, %cst_35 {dimension_numbers = #tpu.dot_dimension_numbers<[1], [0], [0], [1], [0, 0, 1, 1], [], []>} : vector<256x4xf32>, vector<4x4xf32>, vector<256x4xf32> -> vector<256x4xf32>
    %52 = arith.addf %46, %51 : vector<256x4xf32>
    %53 = vector.extract_strided_slice %47 {offsets = [16, 0], sizes = [256, 4], strides = [1, 1]} : vector<288x4xf32> to vector<256x4xf32>
    %c5 = arith.constant 5 : index
    %c0_36 = arith.constant 0 : index
    %c0_37 = arith.constant 0 : index
    %54 = vector.load %arg2[%c5, %c0_36, %c0_37] : memref<9x4x4xf32, #tpu.memory_space<vmem>>, vector<1x4x4xf32>
    %55 = vector.shape_cast %54 : vector<1x4x4xf32> to vector<4x4xf32>
    %cst_38 = arith.constant dense<0.000000e+00> : vector<256x4xf32>
    %56 = tpu.matmul %53, %55, %cst_38 {dimension_numbers = #tpu.dot_dimension_numbers<[1], [0], [0], [1], [0, 0, 1, 1], [], []>} : vector<256x4xf32>, vector<4x4xf32>, vector<256x4xf32> -> vector<256x4xf32>
    %57 = arith.addf %52, %56 : vector<256x4xf32>
    %58 = vector.extract_strided_slice %47 {offsets = [32, 0], sizes = [256, 4], strides = [1, 1]} : vector<288x4xf32> to vector<256x4xf32>
    %c8 = arith.constant 8 : index
    %c0_39 = arith.constant 0 : index
    %c0_40 = arith.constant 0 : index
    %59 = vector.load %arg2[%c8, %c0_39, %c0_40] : memref<9x4x4xf32, #tpu.memory_space<vmem>>, vector<1x4x4xf32>
    %60 = vector.shape_cast %59 : vector<1x4x4xf32> to vector<4x4xf32>
    %cst_41 = arith.constant dense<0.000000e+00> : vector<256x4xf32>
    %61 = tpu.matmul %58, %60, %cst_41 {dimension_numbers = #tpu.dot_dimension_numbers<[1], [0], [0], [1], [0, 0, 1, 1], [], []>} : vector<256x4xf32>, vector<4x4xf32>, vector<256x4xf32> -> vector<256x4xf32>
    %62 = arith.addf %57, %61 : vector<256x4xf32>
    %cst_42 = arith.constant dense<0.000000e+00> : vector<4xf32>
    %63 = vector.multi_reduction <add>, %62, %cst_42 [0] : vector<256x4xf32> to vector<4xf32>
    %64 = vector.shape_cast %63 : vector<4xf32> to vector<1x4xf32>
    %cst_43 = arith.constant 3.906250e-03 : f32
    %65 = vector.broadcast %cst_43 : f32 to vector<1x4xf32>
    %66 = arith.mulf %64, %65 : vector<1x4xf32>
    %67 = arith.mulf %62, %62 : vector<256x4xf32>
    %cst_44 = arith.constant dense<0.000000e+00> : vector<4xf32>
    %68 = vector.multi_reduction <add>, %67, %cst_44 [0] : vector<256x4xf32> to vector<4xf32>
    %69 = vector.shape_cast %68 : vector<4xf32> to vector<1x4xf32>
    %cst_45 = arith.constant 3.906250e-03 : f32
    %70 = vector.broadcast %cst_45 : f32 to vector<1x4xf32>
    %71 = arith.mulf %69, %70 : vector<1x4xf32>
    %72 = arith.mulf %66, %66 : vector<1x4xf32>
    %73 = arith.subf %71, %72 : vector<1x4xf32>
    %cst_46 = arith.constant 9.99999974E-6 : f32
    %74 = vector.broadcast %cst_46 : f32 to vector<1x4xf32>
    %75 = arith.addf %73, %74 : vector<1x4xf32>
    %76 = math.rsqrt %75 : vector<1x4xf32>
    %77 = vector.broadcast %76 : vector<1x4xf32> to vector<256x4xf32>
    %78 = arith.mulf %62, %77 : vector<256x4xf32>
    %79 = arith.mulf %66, %76 : vector<1x4xf32>
    %80 = vector.broadcast %79 : vector<1x4xf32> to vector<256x4xf32>
    %81 = arith.subf %78, %80 : vector<256x4xf32>
    %cst_47 = arith.constant 0.000000e+00 : f32
    %82 = vector.broadcast %cst_47 : f32 to vector<256x4xf32>
    %83 = arith.maximumf %81, %82 : vector<256x4xf32>
    %84 = vector.shape_cast %83 : vector<256x4xf32> to vector<16x16x4xf32>
    %c1_48 = arith.constant 1 : index
    %c0_49 = arith.constant 0 : index
    %c0_50 = arith.constant 0 : index
    %85 = vector.load %arg5[%c1_48, %c0_49, %c0_50] : memref<18x16x4xf32, #tpu.memory_space<vmem>>, vector<16x16x4xf32>
    tpu.vector_store %arg5[%c1_48, %c0_49, %c0_50], %84 {strides = array<i32>} : memref<18x16x4xf32, #tpu.memory_space<vmem>>, vector<16x16x4xf32>,
    %86 = vector.extract_strided_slice %84 {offsets = [1, 0, 0], sizes = [1, 16, 4], strides = [1, 1, 1]} : vector<16x16x4xf32> to vector<1x16x4xf32>
    %c0_51 = arith.constant 0 : index
    %c0_52 = arith.constant 0 : index
    %c0_53 = arith.constant 0 : index
    %87 = vector.load %arg5[%c0_51, %c0_52, %c0_53] : memref<18x16x4xf32, #tpu.memory_space<vmem>>, vector<1x16x4xf32>
    tpu.vector_store %arg5[%c0_51, %c0_52, %c0_53], %86 {strides = array<i32>} : memref<18x16x4xf32, #tpu.memory_space<vmem>>, vector<1x16x4xf32>,
    %88 = vector.extract_strided_slice %84 {offsets = [14, 0, 0], sizes = [1, 16, 4], strides = [1, 1, 1]} : vector<16x16x4xf32> to vector<1x16x4xf32>
    %c17_54 = arith.constant 17 : index
    %c0_55 = arith.constant 0 : index
    %c0_56 = arith.constant 0 : index
    %89 = vector.load %arg5[%c17_54, %c0_55, %c0_56] : memref<18x16x4xf32, #tpu.memory_space<vmem>>, vector<1x16x4xf32>
    tpu.vector_store %arg5[%c17_54, %c0_55, %c0_56], %88 {strides = array<i32>} : memref<18x16x4xf32, #tpu.memory_space<vmem>>, vector<1x16x4xf32>,
    %c0_57 = arith.constant 0 : index
    %c0_58 = arith.constant 0 : index
    %c0_59 = arith.constant 0 : index
    %90 = vector.load %arg5[%c0_57, %c0_58, %c0_59] : memref<18x16x4xf32, #tpu.memory_space<vmem>>, vector<18x16x4xf32>
    %91 = vector.extract_strided_slice %90 {offsets = [0, 1, 0], sizes = [18, 1, 4], strides = [1, 1, 1]} : vector<18x16x4xf32> to vector<18x1x4xf32>
    %92 = vector.extract_strided_slice %90 {offsets = [0, 0, 0], sizes = [18, 15, 4], strides = [1, 1, 1]} : vector<18x16x4xf32> to vector<18x15x4xf32>
    %93 = tpu.concatenate %91, %92 in 1 : vector<18x1x4xf32>, vector<18x15x4xf32> -> vector<18x16x4xf32>
    %94 = vector.extract_strided_slice %90 {offsets = [0, 1, 0], sizes = [18, 15, 4], strides = [1, 1, 1]} : vector<18x16x4xf32> to vector<18x15x4xf32>
    %95 = vector.extract_strided_slice %90 {offsets = [0, 14, 0], sizes = [18, 1, 4], strides = [1, 1, 1]} : vector<18x16x4xf32> to vector<18x1x4xf32>
    %96 = tpu.concatenate %94, %95 in 1 : vector<18x15x4xf32>, vector<18x1x4xf32> -> vector<18x16x4xf32>
    %cst_60 = arith.constant 0.000000e+00 : f32
    %97 = vector.broadcast %cst_60 : f32 to vector<256x4xf32>
    %98 = vector.shape_cast %93 : vector<18x16x4xf32> to vector<288x4xf32>
    %99 = vector.extract_strided_slice %98 {offsets = [0, 0], sizes = [256, 4], strides = [1, 1]} : vector<288x4xf32> to vector<256x4xf32>
    %c0_61 = arith.constant 0 : index
    %c0_62 = arith.constant 0 : index
    %c0_63 = arith.constant 0 : index
    %100 = vector.load %arg3[%c0_61, %c0_62, %c0_63] : memref<9x4x4xf32, #tpu.memory_space<vmem>>, vector<1x4x4xf32>
    %101 = vector.shape_cast %100 : vector<1x4x4xf32> to vector<4x4xf32>
    %cst_64 = arith.constant dense<0.000000e+00> : vector<256x4xf32>
    %102 = tpu.matmul %99, %101, %cst_64 {dimension_numbers = #tpu.dot_dimension_numbers<[1], [0], [0], [1], [0, 0, 1, 1], [], []>} : vector<256x4xf32>, vector<4x4xf32>, vector<256x4xf32> -> vector<256x4xf32>
    %103 = arith.addf %97, %102 : vector<256x4xf32>
    %104 = vector.extract_strided_slice %98 {offsets = [16, 0], sizes = [256, 4], strides = [1, 1]} : vector<288x4xf32> to vector<256x4xf32>
    %c3_65 = arith.constant 3 : index
    %c0_66 = arith.constant 0 : index
    %c0_67 = arith.constant 0 : index
    %105 = vector.load %arg3[%c3_65, %c0_66, %c0_67] : memref<9x4x4xf32, #tpu.memory_space<vmem>>, vector<1x4x4xf32>
    %106 = vector.shape_cast %105 : vector<1x4x4xf32> to vector<4x4xf32>
    %cst_68 = arith.constant dense<0.000000e+00> : vector<256x4xf32>
    %107 = tpu.matmul %104, %106, %cst_68 {dimension_numbers = #tpu.dot_dimension_numbers<[1], [0], [0], [1], [0, 0, 1, 1], [], []>} : vector<256x4xf32>, vector<4x4xf32>, vector<256x4xf32> -> vector<256x4xf32>
    %108 = arith.addf %103, %107 : vector<256x4xf32>
    %109 = vector.extract_strided_slice %98 {offsets = [32, 0], sizes = [256, 4], strides = [1, 1]} : vector<288x4xf32> to vector<256x4xf32>
    %c6_69 = arith.constant 6 : index
    %c0_70 = arith.constant 0 : index
    %c0_71 = arith.constant 0 : index
    %110 = vector.load %arg3[%c6_69, %c0_70, %c0_71] : memref<9x4x4xf32, #tpu.memory_space<vmem>>, vector<1x4x4xf32>
    %111 = vector.shape_cast %110 : vector<1x4x4xf32> to vector<4x4xf32>
    %cst_72 = arith.constant dense<0.000000e+00> : vector<256x4xf32>
    %112 = tpu.matmul %109, %111, %cst_72 {dimension_numbers = #tpu.dot_dimension_numbers<[1], [0], [0], [1], [0, 0, 1, 1], [], []>} : vector<256x4xf32>, vector<4x4xf32>, vector<256x4xf32> -> vector<256x4xf32>
    %113 = arith.addf %108, %112 : vector<256x4xf32>
    %114 = vector.shape_cast %90 : vector<18x16x4xf32> to vector<288x4xf32>
    %115 = vector.extract_strided_slice %114 {offsets = [0, 0], sizes = [256, 4], strides = [1, 1]} : vector<288x4xf32> to vector<256x4xf32>
    %c1_73 = arith.constant 1 : index
    %c0_74 = arith.constant 0 : index
    %c0_75 = arith.constant 0 : index
    %116 = vector.load %arg3[%c1_73, %c0_74, %c0_75] : memref<9x4x4xf32, #tpu.memory_space<vmem>>, vector<1x4x4xf32>
    %117 = vector.shape_cast %116 : vector<1x4x4xf32> to vector<4x4xf32>
    %cst_76 = arith.constant dense<0.000000e+00> : vector<256x4xf32>
    %118 = tpu.matmul %115, %117, %cst_76 {dimension_numbers = #tpu.dot_dimension_numbers<[1], [0], [0], [1], [0, 0, 1, 1], [], []>} : vector<256x4xf32>, vector<4x4xf32>, vector<256x4xf32> -> vector<256x4xf32>
    %119 = arith.addf %113, %118 : vector<256x4xf32>
    %120 = vector.extract_strided_slice %114 {offsets = [16, 0], sizes = [256, 4], strides = [1, 1]} : vector<288x4xf32> to vector<256x4xf32>
    %c4_77 = arith.constant 4 : index
    %c0_78 = arith.constant 0 : index
    %c0_79 = arith.constant 0 : index
    %121 = vector.load %arg3[%c4_77, %c0_78, %c0_79] : memref<9x4x4xf32, #tpu.memory_space<vmem>>, vector<1x4x4xf32>
    %122 = vector.shape_cast %121 : vector<1x4x4xf32> to vector<4x4xf32>
    %cst_80 = arith.constant dense<0.000000e+00> : vector<256x4xf32>
    %123 = tpu.matmul %120, %122, %cst_80 {dimension_numbers = #tpu.dot_dimension_numbers<[1], [0], [0], [1], [0, 0, 1, 1], [], []>} : vector<256x4xf32>, vector<4x4xf32>, vector<256x4xf32> -> vector<256x4xf32>
    %124 = arith.addf %119, %123 : vector<256x4xf32>
    %125 = vector.extract_strided_slice %114 {offsets = [32, 0], sizes = [256, 4], strides = [1, 1]} : vector<288x4xf32> to vector<256x4xf32>
    %c7_81 = arith.constant 7 : index
    %c0_82 = arith.constant 0 : index
    %c0_83 = arith.constant 0 : index
    %126 = vector.load %arg3[%c7_81, %c0_82, %c0_83] : memref<9x4x4xf32, #tpu.memory_space<vmem>>, vector<1x4x4xf32>
    %127 = vector.shape_cast %126 : vector<1x4x4xf32> to vector<4x4xf32>
    %cst_84 = arith.constant dense<0.000000e+00> : vector<256x4xf32>
    %128 = tpu.matmul %125, %127, %cst_84 {dimension_numbers = #tpu.dot_dimension_numbers<[1], [0], [0], [1], [0, 0, 1, 1], [], []>} : vector<256x4xf32>, vector<4x4xf32>, vector<256x4xf32> -> vector<256x4xf32>
    %129 = arith.addf %124, %128 : vector<256x4xf32>
    %130 = vector.shape_cast %96 : vector<18x16x4xf32> to vector<288x4xf32>
    %131 = vector.extract_strided_slice %130 {offsets = [0, 0], sizes = [256, 4], strides = [1, 1]} : vector<288x4xf32> to vector<256x4xf32>
    %c2_85 = arith.constant 2 : index
    %c0_86 = arith.constant 0 : index
    %c0_87 = arith.constant 0 : index
    %132 = vector.load %arg3[%c2_85, %c0_86, %c0_87] : memref<9x4x4xf32, #tpu.memory_space<vmem>>, vector<1x4x4xf32>
    %133 = vector.shape_cast %132 : vector<1x4x4xf32> to vector<4x4xf32>
    %cst_88 = arith.constant dense<0.000000e+00> : vector<256x4xf32>
    %134 = tpu.matmul %131, %133, %cst_88 {dimension_numbers = #tpu.dot_dimension_numbers<[1], [0], [0], [1], [0, 0, 1, 1], [], []>} : vector<256x4xf32>, vector<4x4xf32>, vector<256x4xf32> -> vector<256x4xf32>
    %135 = arith.addf %129, %134 : vector<256x4xf32>
    %136 = vector.extract_strided_slice %130 {offsets = [16, 0], sizes = [256, 4], strides = [1, 1]} : vector<288x4xf32> to vector<256x4xf32>
    %c5_89 = arith.constant 5 : index
    %c0_90 = arith.constant 0 : index
    %c0_91 = arith.constant 0 : index
    %137 = vector.load %arg3[%c5_89, %c0_90, %c0_91] : memref<9x4x4xf32, #tpu.memory_space<vmem>>, vector<1x4x4xf32>
    %138 = vector.shape_cast %137 : vector<1x4x4xf32> to vector<4x4xf32>
    %cst_92 = arith.constant dense<0.000000e+00> : vector<256x4xf32>
    %139 = tpu.matmul %136, %138, %cst_92 {dimension_numbers = #tpu.dot_dimension_numbers<[1], [0], [0], [1], [0, 0, 1, 1], [], []>} : vector<256x4xf32>, vector<4x4xf32>, vector<256x4xf32> -> vector<256x4xf32>
    %140 = arith.addf %135, %139 : vector<256x4xf32>
    %141 = vector.extract_strided_slice %130 {offsets = [32, 0], sizes = [256, 4], strides = [1, 1]} : vector<288x4xf32> to vector<256x4xf32>
    %c8_93 = arith.constant 8 : index
    %c0_94 = arith.constant 0 : index
    %c0_95 = arith.constant 0 : index
    %142 = vector.load %arg3[%c8_93, %c0_94, %c0_95] : memref<9x4x4xf32, #tpu.memory_space<vmem>>, vector<1x4x4xf32>
    %143 = vector.shape_cast %142 : vector<1x4x4xf32> to vector<4x4xf32>
    %cst_96 = arith.constant dense<0.000000e+00> : vector<256x4xf32>
    %144 = tpu.matmul %141, %143, %cst_96 {dimension_numbers = #tpu.dot_dimension_numbers<[1], [0], [0], [1], [0, 0, 1, 1], [], []>} : vector<256x4xf32>, vector<4x4xf32>, vector<256x4xf32> -> vector<256x4xf32>
    %145 = arith.addf %140, %144 : vector<256x4xf32>
    %cst_97 = arith.constant dense<0.000000e+00> : vector<4xf32>
    %146 = vector.multi_reduction <add>, %145, %cst_97 [0] : vector<256x4xf32> to vector<4xf32>
    %147 = vector.shape_cast %146 : vector<4xf32> to vector<1x4xf32>
    %cst_98 = arith.constant 3.906250e-03 : f32
    %148 = vector.broadcast %cst_98 : f32 to vector<1x4xf32>
    %149 = arith.mulf %147, %148 : vector<1x4xf32>
    %150 = arith.mulf %145, %145 : vector<256x4xf32>
    %cst_99 = arith.constant dense<0.000000e+00> : vector<4xf32>
    %151 = vector.multi_reduction <add>, %150, %cst_99 [0] : vector<256x4xf32> to vector<4xf32>
    %152 = vector.shape_cast %151 : vector<4xf32> to vector<1x4xf32>
    %cst_100 = arith.constant 3.906250e-03 : f32
    %153 = vector.broadcast %cst_100 : f32 to vector<1x4xf32>
    %154 = arith.mulf %152, %153 : vector<1x4xf32>
    %155 = arith.mulf %149, %149 : vector<1x4xf32>
    %156 = arith.subf %154, %155 : vector<1x4xf32>
    %cst_101 = arith.constant 9.99999974E-6 : f32
    %157 = vector.broadcast %cst_101 : f32 to vector<1x4xf32>
    %158 = arith.addf %156, %157 : vector<1x4xf32>
    %159 = math.rsqrt %158 : vector<1x4xf32>
    %160 = vector.broadcast %159 : vector<1x4xf32> to vector<256x4xf32>
    %161 = arith.mulf %145, %160 : vector<256x4xf32>
    %162 = arith.mulf %149, %159 : vector<1x4xf32>
    %163 = vector.broadcast %162 : vector<1x4xf32> to vector<256x4xf32>
    %164 = arith.subf %161, %163 : vector<256x4xf32>
    %165 = vector.shape_cast %164 : vector<256x4xf32> to vector<16x16x4xf32>
    %166 = arith.addf %1, %165 : vector<16x16x4xf32>
    %c0_102 = arith.constant 0 : index
    %c0_103 = arith.constant 0 : index
    %c0_104 = arith.constant 0 : index
    %c0_105 = arith.constant 0 : index
    %167 = vector.load %arg4[%c0_102, %c0_103, %c0_104, %c0_105] : memref<1x16x16x4xf32, #tpu.memory_space<vmem>>, vector<1x16x16x4xf32>
    %168 = vector.shape_cast %167 : vector<1x16x16x4xf32> to vector<16x16x4xf32>
    %169 = vector.shape_cast %166 : vector<16x16x4xf32> to vector<1x16x16x4xf32>
    tpu.vector_store %arg4[%c0_102, %c0_103, %c0_104, %c0_105], %169 {strides = array<i32>} : memref<1x16x16x4xf32, #tpu.memory_space<vmem>>, vector<1x16x16x4xf32>,
    return
  }
  func.func @transform_0(%arg0: i32) -> (i32, i32, i32, i32) {
    %c0_i32 = arith.constant 0 : i32
    %c0_i32_0 = arith.constant 0 : i32
    %c0_i32_1 = arith.constant 0 : i32
    %c0_i32_2 = arith.constant 0 : i32
    return %arg0, %c0_i32, %c0_i32_0, %c0_i32_1 : i32, i32, i32, i32
  }
  func.func @transform_1(%arg0: i32) -> (i32, i32, i32) {
    %c0_i32 = arith.constant 0 : i32
    %c0_i32_0 = arith.constant 0 : i32
    %c0_i32_1 = arith.constant 0 : i32
    %c0_i32_2 = arith.constant 0 : i32
    return %c0_i32, %c0_i32_0, %c0_i32_1 : i32, i32, i32
  }
  func.func @transform_2(%arg0: i32) -> (i32, i32, i32) {
    %c0_i32 = arith.constant 0 : i32
    %c0_i32_0 = arith.constant 0 : i32
    %c0_i32_1 = arith.constant 0 : i32
    %c0_i32_2 = arith.constant 0 : i32
    return %c0_i32, %c0_i32_0, %c0_i32_1 : i32, i32, i32
  }
  func.func @transform_3(%arg0: i32) -> (i32, i32, i32, i32) {
    %c0_i32 = arith.constant 0 : i32
    %c0_i32_0 = arith.constant 0 : i32
    %c0_i32_1 = arith.constant 0 : i32
    %c0_i32_2 = arith.constant 0 : i32
    return %arg0, %c0_i32, %c0_i32_0, %c0_i32_1 : i32, i32, i32, i32
  }
}

</mosaic_0001>

<bundles_post_ra>
// kernel: tpu_custom_call.1
= control target key start
LH: loop header
LB: loop body
LE: loop exit
PB: predicated region body
PF: predicated region fallthrough
CT: control target
= control target key end

     0   :  { %s9249_s12 = smov 0   ;;  %s12550_s0 = inlined_call_operand.vmem [shape: f32[2,16,16,4], index: 0, kind: input, shape index: {}]   ;;  %s12551_s1 = inlined_call_operand.vmem [shape: f32[9,4,4], index: 1, kind: input, shape index: {}]   ;;  %s12552_s2 = inlined_call_operand.vmem [shape: f32[9,4,4], index: 2, kind: input, shape index: {}]   ;;  %s12553_s3 = inlined_call_operand.vmem [shape: f32[2,16,16,4], index: 3, kind: output, shape index: {}]  }
   0x1 LB: > { %s6580_s13 = sadd.s32 4294967295, %s9227_s12   ;;  %p6584_p0 = scmp.ge.s32.totalorder %s9227_s12, 1  ;;  %s9227_s12 = sphi %s9249_s12, %s13_s12  }
   0x2   : > { %p137_p1 = scmp.lt.s32.totalorder %s9227_s12, 3 }
   0x4   : > { %p138_p2 = pnand %p6584_p0, %p137_p1 }
   0x6   : > { %141 = sbr.rel (%p138_p2) target bundleno = 1743 (0x6cf), region = 32 }
   0xd   : > { %v6589_v0 = vld [vmem:[%s12551_s1 + $0xc] sm:$0xf]  ;;  %vm615_vm0 = vcmask 1043456   ;;  %p161_p3 = scmp.lt.s32.totalorder %s6580_s13, 1  ;;  %v9264_v1 = vld [vmem:[%s12551_s1] sm:$0xf] }
   0xe   : > { %7797 = vmatprep.subr.msk.mxu0 %vm615_vm0, %v6589_v0  ;;  %vm204_vm1 = vcmask 31744   ;;  %vm350_vm2 = vcmask 1040384   ;;  %v9445_v44 = vld [vmem:[%s12551_s1 + $0x18] sm:$0xf]  ;;  %vm441_vm3 = vcmask 1046528  }
   0xf   : > { %7798 = vmatpush3.msk.msra.mxu0 %vm615_vm0, %v6589_v0  ;;  %s12855_s13 = smov (!%p161_p3, %s6580_s13), 1 }
  0x10   : > { %7847 = vmatprep.subr.msk.mxu0 %vm615_vm0, %v9264_v1  ;;  %s7201_s18 = sshll.u32 %s12855_s13, 8 }
  0x11   : > { %s9277_s21 = scalar_lea.vmem %s12550_s0, %s7201_s18  ;;  %s12441_s5 = scalar_lea.vmem %s12553_s3, %s7201_s18 }
  0x12   : > { %v9280_v2 = vld [vmem:[%s9277_s21] sm:$0xff]  ;;  %v9283_v3 = vld [vmem:[%s9277_s21 + $0x8] sm:$0xff]  ;;  %v9286_v4 = vld [vmem:[%s9277_s21 + $0x10] sm:$0xff] }
  0x13   : > { %12688 = vst [vmem:[#allocation3_spill] sm:$0xff] %v9280_v2  ;;  %12689 = vst [vmem:[#allocation4_spill] sm:$0xff] %v9283_v3  ;;  %v9297_v5 = vld [vmem:[%s9277_s21 + $0x18] sm:$0xff]  ;;  %v9300_v6 = vld [vmem:[%s9277_s21 + $0x20] sm:$0xff] }
  0x14   : > { %12690 = vst [vmem:[#allocation5_spill] sm:$0xff] %v9286_v4  ;;  %205 = vst.msk [vmem:[#allocation2 + $0x10] sm:$0xff] %vm204_vm1, %v9280_v2  ;;  %v9303_v7 = vld [vmem:[%s9277_s21 + $0x28] sm:$0xff]  ;;  %v9314_v8 = vld [vmem:[%s9277_s21 + $0x30] sm:$0xff] }
  0x15   : > { %206 = vst.msk [vmem:[#allocation2 + $0x18] sm:$0xff] %vm204_vm1, %v9283_v3  ;;  %207 = vst.msk [vmem:[#allocation2 + $0x20] sm:$0xff] %vm204_vm1, %v9286_v4  ;;  %v9317_v9 = vld [vmem:[%s9277_s21 + $0x38] sm:$0xff]  ;;  %v9320_v10 = vld [vmem:[%s9277_s21 + $0x40] sm:$0xff] }
  0x16   : > { %237 = vst.msk [vmem:[#allocation2] sm:$0xff] %vm204_vm1, %v9286_v4  ;;  %12691 = vst [vmem:[#allocation6_spill] sm:$0xff] %v9297_v5  ;;  %v9329_v11 = vld [vmem:[%s9277_s21 + $0x48] sm:$0xff]  ;;  %v9332_v12 = vld [vmem:[%s9277_s21 + $0x50] sm:$0xff] }
  0x17   : > { %12692 = vst [vmem:[#allocation7_spill] sm:$0xff] %v9300_v6  ;;  %12693 = vst [vmem:[#allocation8_spill] sm:$0xff] %v9303_v7  ;;  %v9335_v13 = vld [vmem:[%s9277_s21 + $0x58] sm:$0xff]  ;;  %v9344_v14 = vld [vmem:[%s9277_s21 + $0x60] sm:$0xff] }
  0x18   : > { %208 = vst.msk [vmem:[#allocation2 + $0x28] sm:$0xff] %vm204_vm1, %v9297_v5  ;;  %238 = vst.msk [vmem:[#allocation2 + $0x8] sm:$0xff] %vm204_vm1, %v9297_v5  ;;  %v9347_v15 = vld [vmem:[%s9277_s21 + $0x68] sm:$0xff]  ;;  %v9350_v16 = vld [vmem:[%s9277_s21 + $0x70] sm:$0xff] }
  0x19   : > { %209 = vst.msk [vmem:[#allocation2 + $0x30] sm:$0xff] %vm204_vm1, %v9300_v6  ;;  %210 = vst.msk [vmem:[#allocation2 + $0x38] sm:$0xff] %vm204_vm1, %v9303_v7  ;;  %v9359_v17 = vld [vmem:[%s9277_s21 + $0x78] sm:$0xff]  ;;  %v9362_v18 = vld [vmem:[%s9277_s21 + $0x80] sm:$0xff] }
  0x1a   : > { %12694 = vst [vmem:[#allocation9_spill] sm:$0xff] %v9314_v8  ;;  %12695 = vst [vmem:[#allocation10_spill] sm:$0xff] %v9317_v9  ;;  %v9365_v19 = vld [vmem:[%s9277_s21 + $0x88] sm:$0xff]  ;;  %v9374_v20 = vld [vmem:[%s9277_s21 + $0x90] sm:$0xff] }
  0x1b   : > { %12696 = vst [vmem:[#allocation11_spill] sm:$0xff] %v9320_v10  ;;  %211 = vst.msk [vmem:[#allocation2 + $0x40] sm:$0xff] %vm204_vm1, %v9314_v8  ;;  %v9377_v21 = vld [vmem:[%s9277_s21 + $0x98] sm:$0xff]  ;;  %v9380_v22 = vld [vmem:[%s9277_s21 + $0xa0] sm:$0xff] }
  0x1c   : > { %212 = vst.msk [vmem:[#allocation2 + $0x48] sm:$0xff] %vm204_vm1, %v9317_v9  ;;  %213 = vst.msk [vmem:[#allocation2 + $0x50] sm:$0xff] %vm204_vm1, %v9320_v10  ;;  %v9389_v23 = vld [vmem:[%s9277_s21 + $0xa8] sm:$0xff]  ;;  %v9392_v24 = vld [vmem:[%s9277_s21 + $0xb0] sm:$0xff] }
  0x1d   : > { %12697 = vst [vmem:[#allocation12_spill] sm:$0xff] %v9329_v11  ;;  %12698 = vst [vmem:[#allocation13_spill] sm:$0xff] %v9332_v12  ;;  %v9395_v25 = vld [vmem:[%s9277_s21 + $0xb8] sm:$0xff]  ;;  %v9397_v26 = vld [vmem:[#allocation2 + $0x10] sm:$0xff] }
  0x1e   : > { %12699 = vst [vmem:[#allocation14_spill] sm:$0xff] %v9335_v13  ;;  %214 = vst.msk [vmem:[#allocation2 + $0x58] sm:$0xff] %vm204_vm1, %v9329_v11  ;;  %v9399_v27 = vld [vmem:[#allocation2 + $0x18] sm:$0xff]  ;;  %v9401_v28 = vld [vmem:[#allocation2 + $0x20] sm:$0xff]  ;;  %v12562_v29 = vrot.slane %v9397_v26, 1  ;;  %v354_v30 = vrot.slane %v9397_v26, 7 }
  0x1f   : > { %215 = vst.msk [vmem:[#allocation2 + $0x60] sm:$0xff] %vm204_vm1, %v9332_v12  ;;  %216 = vst.msk [vmem:[#allocation2 + $0x68] sm:$0xff] %vm204_vm1, %v9335_v13  ;;  %v12561_v31 = vrot.slane %v9399_v27, 7  ;;  %v12558_v32 = vrot.slane %v9401_v28, 1  ;;  %v9413_v33 = vld [vmem:[#allocation2 + $0x28] sm:$0xff]  ;;  %v357_v35 = vrot.slane %v9401_v28, 7 }
  0x20   : > { %12700 = vst [vmem:[#allocation15_spill] sm:$0xff] %v9344_v14  ;;  %12701 = vst [vmem:[#allocation16_spill] sm:$0xff] %v9347_v15  ;;  %v9415_v34 = vld [vmem:[#allocation2 + $0x30] sm:$0xff]  ;;  %v12557_v36 = vrot.slane %v9413_v33, 7  ;;  %v9422_v37 = vsel %vm350_vm2, %v12562_v29, %v354_v30  ;;  %v9431_v41 = vld [vmem:[#allocation2 + $0x38] sm:$0xff] }
  0x21   : > { %12702 = vst [vmem:[#allocation17_spill] sm:$0xff] %v9350_v16  ;;  %217 = vst.msk [vmem:[#allocation2 + $0x70] sm:$0xff] %vm204_vm1, %v9344_v14  ;;  %v9427_v38 = vsel %vm350_vm2, %v354_v30, %v12561_v31  ;;  %v12556_v39 = vrot.slane %v9415_v34, 1  ;;  %v360_v40 = vrot.slane %v9415_v34, 7  ;;  %7799 = vmatprep.mubr.msk.f32.mxu0 %vm204_vm1, %v9422_v37  ;;  %v9438_v42 = vsel %vm350_vm2, %v12558_v32, %v357_v35  ;;  %v9473_v52 = vld [vmem:[%s9277_s21 + $0xc0] sm:$0xff]  ;;  %v9480_v53 = vld [vmem:[%s9277_s21 + $0xc8] sm:$0xff] }
  0x22   : > { %218 = vst.msk [vmem:[#allocation2 + $0x78] sm:$0xff] %vm204_vm1, %v9347_v15  ;;  %219 = vst.msk [vmem:[#allocation2 + $0x80] sm:$0xff] %vm204_vm1, %v9350_v16  ;;  %v9440_v43 = vld [vmem:[#allocation2 + $0x40] sm:$0xff]  ;;  %7800 = vmatmul.mubr.msk.f32.vlgmr.msra.gmra.mrb[0].mxu0 %vm204_vm1, %v9427_v38  ;;  %v9456_v45 = vsel %vm350_vm2, %v357_v35, %v12557_v36  ;;  %v12555_v46 = vrot.slane %v9431_v41, 7  ;;  %v9483_v54 = vld [vmem:[%s9277_s21 + $0xd0] sm:$0xff] }
  0x23   : > { %12703 = vst [vmem:[#allocation18_spill] sm:$0xff] %v9359_v17  ;;  %12704 = vst [vmem:[#allocation19_spill] sm:$0xff] %v9362_v18  ;;  %7848 = vmatpush3.msk.msra.mxu0 %vm615_vm0, %v9264_v1  ;;  %7802 = vmatprep.mubr.msk.f32.mxu0 %vm204_vm1, %v9438_v42  ;;  %v9462_v47 = vsel %vm350_vm2, %v12556_v39, %v360_v40  ;;  %v12554_v48 = vrot.slane %v9440_v43, 1  ;;  %v363_v49 = vrot.slane %v9440_v43, 7  ;;  %v9466_v50 = vld [vmem:[#allocation2 + $0x48] sm:$0xff]  ;;  %v9470_v51 = vld [vmem:[#allocation2 + $0x50] sm:$0xff] }
  0x24   : > { %12705 = vst [vmem:[#allocation20_spill] sm:$0xff] %v9365_v19  ;;  %220 = vst.msk [vmem:[#allocation2 + $0x88] sm:$0xff] %vm204_vm1, %v9359_v17  ;;  %7897 = vmatprep.subr.msk.mxu0 %vm615_vm0, %v9445_v44  ;;  %v9486_v55 = vld [vmem:[%s9277_s21 + $0xd8] sm:$0xff]  ;;  %v9493_v56 = vsel %vm350_vm2, %v360_v40, %v12555_v46  ;;  %v12560_v57 = vrot.slane %v9466_v50, 7  ;;  %v9503_v58 = vld [vmem:[%s9277_s21 + $0xe0] sm:$0xff]  ;;  %v12559_v62 = vrot.slane %v9470_v51, 1 }
  0x25   : > { %221 = vst.msk [vmem:[#allocation2 + $0x90] sm:$0xff] %vm204_vm1, %v9362_v18  ;;  %222 = vst.msk [vmem:[#allocation2 + $0x98] sm:$0xff] %vm204_vm1, %v9365_v19  ;;  %v9506_v59 = vld [vmem:[%s9277_s21 + $0xe8] sm:$0xff]  ;;  %v9509_v60 = vld [vmem:[%s9277_s21 + $0xf0] sm:$0xff]  ;;  %v9514_v61 = vsel %vm350_vm2, %v12554_v48, %v363_v49  ;;  %v366_v63 = vrot.slane %v9470_v51, 7 }
  0x26   : > { %12706 = vst [vmem:[#allocation21_spill] sm:$0xff] %v9374_v20  ;;  %12707 = vst [vmem:[#allocation22_spill] sm:$0xff] %v9377_v21  ;;  %7803 = vmatmul.mubr.msk.f32.gmra.mrb[2].mxu0 %vm204_vm1, %v9456_v45  ;;  %v9518_v0 = vld [vmem:[#allocation2 + $0x58] sm:$0xff]  ;;  %v9533_v30 = vld [vmem:[#allocation2 + $0x60] sm:$0xff]  ;;  %v9544_v35 = vsel %vm350_vm2, %v363_v49, %v12560_v57 }
  0x27   : > { %12708 = vst [vmem:[#allocation23_spill] sm:$0xff] %v9380_v22  ;;  %223 = vst.msk [vmem:[#allocation2 + $0xa0] sm:$0xff] %vm204_vm1, %v9374_v20  ;;  %7805 = vmatprep.mubr.msk.f32.mxu0 %vm204_vm1, %v9462_v47  ;;  %v9531_v1 = vld [vmem:[%s9277_s21 + $0xf8] sm:$0xff]  ;;  %v12566_v40 = vrot.slane %v9518_v0, 7  ;;  %v9550_v48 = vsel %vm350_vm2, %v12559_v62, %v366_v63  ;;  %v12565_v46 = vrot.slane %v9533_v30, 1  ;;  %v369_v39 = vrot.slane %v9533_v30, 7 }
  0x28   : > { %224 = vst.msk [vmem:[#allocation2 + $0xa8] sm:$0xff] %vm204_vm1, %v9377_v21  ;;  %225 = vst.msk [vmem:[#allocation2 + $0xb0] sm:$0xff] %vm204_vm1, %v9380_v22  ;;  %v9554_v36 = vld [vmem:[#allocation2 + $0x68] sm:$0xff]  ;;  %v9556_v32 = vld [vmem:[#allocation2 + $0x70] sm:$0xff] }
  0x29   : > { %12709 = vst [vmem:[#allocation24_spill] sm:$0xff] %v9389_v23  ;;  %12710 = vst [vmem:[#allocation25_spill] sm:$0xff] %v9392_v24  ;;  %v9565_v49 = vsel %vm350_vm2, %v366_v63, %v12566_v40  ;;  %v12572_v62 = vrot.slane %v9554_v36, 7  ;;  %v9571_v57 = vsel %vm350_vm2, %v12565_v46, %v369_v39  ;;  %v12571_v31 = vrot.slane %v9556_v32, 1 }
  0x2a   : > { %12711 = vst [vmem:[#allocation26_spill] sm:$0xff] %v9395_v25  ;;  %226 = vst.msk [vmem:[#allocation2 + $0xb8] sm:$0xff] %vm204_vm1, %v9389_v23  ;;  %7806 = vmatmul.mubr.msk.f32.gmra.mrb[4].mxu0 %vm204_vm1, %v9493_v56  ;;  %v372_v29 = vrot.slane %v9556_v32, 7 }
  0x2b   : > { %227 = vst.msk [vmem:[#allocation2 + $0xc0] sm:$0xff] %vm204_vm1, %v9392_v24  ;;  %228 = vst.msk [vmem:[#allocation2 + $0xc8] sm:$0xff] %vm204_vm1, %v9395_v25  ;;  %7808 = vmatprep.mubr.msk.f32.mxu0 %vm204_vm1, %v9514_v61  ;;  %v9586_v63 = vsel %vm350_vm2, %v369_v39, %v12572_v62 }
  0x2c   : > { %12712 = vst [vmem:[#allocation27_spill] sm:$0xff] %v9473_v52  ;;  %229 = vst.msk [vmem:[#allocation2 + $0xd0] sm:$0xff] %vm204_vm1, %v9473_v52  ;;  %v9592_v40 = vsel %vm350_vm2, %v12571_v31, %v372_v29  ;;  %v9617_v25 = vld [vmem:[#allocation2 + $0x98] sm:$0xff] }
  0x2d   : > { %12713 = vst [vmem:[#allocation28_spill] sm:$0xff] %v9480_v53  ;;  %12714 = vst [vmem:[#allocation29_spill] sm:$0xff] %v9483_v54 }
  0x2e   : > { %12715 = vst [vmem:[#allocation30_spill] sm:$0xff] %v9486_v55  ;;  %230 = vst.msk [vmem:[#allocation2 + $0xd8] sm:$0xff] %vm204_vm1, %v9480_v53  ;;  %7809 = vmatmul.mubr.msk.f32.gmra.mrb[6].mxu0 %vm204_vm1, %v9544_v35  ;;  %v9619_v24 = vld [vmem:[#allocation2 + $0xa0] sm:$0xff] }
  0x2f   : > { %231 = vst.msk [vmem:[#allocation2 + $0xe0] sm:$0xff] %vm204_vm1, %v9483_v54  ;;  %232 = vst.msk [vmem:[#allocation2 + $0xe8] sm:$0xff] %vm204_vm1, %v9486_v55  ;;  %7811 = vmatprep.mubr.msk.f32.mxu0 %vm204_vm1, %v9550_v48  ;;  %v9596_v55 = vld [vmem:[#allocation2 + $0x88] sm:$0xff]  ;;  %v9598_v54 = vld [vmem:[#allocation2 + $0x90] sm:$0xff]  ;;  %v12589_v23 = vrot.slane %v9619_v24, 1  ;;  %v381_v22 = vrot.slane %v9619_v24, 7 }
  0x30   : > { %12716 = vst [vmem:[#allocation31_spill] sm:$0xff] %v9503_v58  ;;  %12717 = vst [vmem:[#allocation32_spill] sm:$0xff] %v9506_v59  ;;  %v12584_v31 = vrot.slane %v9596_v55, 7  ;;  %v12583_v53 = vrot.slane %v9598_v54, 1  ;;  %v378_v52 = vrot.slane %v9598_v54, 7  ;;  %v9638_v21 = vld [vmem:[#allocation2 + $0xa8] sm:$0xff] }
  0x31   : > { %12718 = vst [vmem:[#allocation33_spill] sm:$0xff] %v9509_v60  ;;  %233 = vst.msk [vmem:[#allocation2 + $0xf0] sm:$0xff] %vm204_vm1, %v9503_v58  ;;  %v9640_v20 = vld [vmem:[#allocation2 + $0xb0] sm:$0xff]  ;;  %v9659_v17 = vld [vmem:[#allocation2 + $0xb8] sm:$0xff] }
  0x32   : > { %240 = vst.msk [vmem:[#allocation2 + $0x110] sm:$0xff] %vm204_vm1, %v9503_v58  ;;  %234 = vst.msk [vmem:[#allocation2 + $0xf8] sm:$0xff] %vm204_vm1, %v9506_v59  ;;  %7812 = vmatmul.mubr.msk.f32.gmra.mrb[8].mxu0 %vm204_vm1, %v9565_v49  ;;  %v12595_v19 = vrot.slane %v9640_v20, 1  ;;  %v384_v18 = vrot.slane %v9640_v20, 7  ;;  %v9661_v16 = vld [vmem:[#allocation2 + $0xc0] sm:$0xff]  ;;  %v9680_v13 = vld [vmem:[#allocation2 + $0xc8] sm:$0xff] }
  0x33   : > { %241 = vst.msk [vmem:[#allocation2 + $0x118] sm:$0xff] %vm204_vm1, %v9506_v59  ;;  %235 = vst.msk [vmem:[#allocation2 + $0x100] sm:$0xff] %vm204_vm1, %v9509_v60  ;;  %v9577_v60 = vld [vmem:[#allocation2 + $0x80] sm:$0xff]  ;;  %7814 = vmatprep.mubr.msk.f32.mxu0 %vm204_vm1, %v9571_v57  ;;  %v12601_v15 = vrot.slane %v9661_v16, 1  ;;  %v387_v14 = vrot.slane %v9661_v16, 7  ;;  %v9682_v12 = vld [vmem:[#allocation2 + $0xd0] sm:$0xff] }
  0x34   : > { %12719 = vst [vmem:[#allocation34_spill] sm:$0xff] %v9531_v1  ;;  %236 = vst.msk [vmem:[#allocation2 + $0x108] sm:$0xff] %vm204_vm1, %v9531_v1  ;;  %v9575_v1 = vld [vmem:[#allocation2 + $0x78] sm:$0xff]  ;;  %v12577_v59 = vrot.slane %v9577_v60, 1  ;;  %v375_v58 = vrot.slane %v9577_v60, 7  ;;  %v12607_v11 = vrot.slane %v9682_v12, 1 }
  0x35   : > { %v12578_v46 = vrot.slane %v9575_v1, 7  ;;  %12720 = vst [vmem:[#allocation35_spill] sm:$0xff] %v9640_v20  ;;  %12721 = vst [vmem:[#allocation36_spill] sm:$0xff] %v9659_v17  ;;  %v390_v10 = vrot.slane %v9682_v12, 7  ;;  %v9701_v9 = vld [vmem:[#allocation2 + $0xd8] sm:$0xff]  ;;  %v9785_v20 = vld [vmem:[#allocation2 + $0x8] sm:$0xff] }
  0x36   : > { %7815 = vmatmul.mubr.msk.f32.gmra.mrb[10].mxu0 %vm204_vm1, %v9586_v63  ;;  %v9613_v62 = vsel %vm350_vm2, %v12577_v59, %v375_v58  ;;  %v12590_v59 = vrot.slane %v9617_v25, 7  ;;  %12722 = vst [vmem:[#allocation37_spill] sm:$0xff] %v9661_v16  ;;  %12723 = vst [vmem:[#allocation38_spill] sm:$0xff] %v9680_v13  ;;  %v9703_v8 = vld [vmem:[#allocation2 + $0xe0] sm:$0xff]  ;;  %v9722_v5 = vld [vmem:[#allocation2 + $0xe8] sm:$0xff] }
  0x37   : > { %7817 = vmatprep.mubr.msk.f32.mxu0 %vm204_vm1, %v9592_v40  ;;  %v9607_v39 = vsel %vm350_vm2, %v372_v29, %v12578_v46  ;;  %v9628_v29 = vsel %vm350_vm2, %v375_v58, %v12584_v31  ;;  %v9634_v46 = vsel %vm350_vm2, %v12583_v53, %v378_v52  ;;  %v12596_v53 = vrot.slane %v9638_v21, 7  ;;  %12724 = vst [vmem:[#allocation39_spill] sm:$0xff] %v9682_v12 }
  0x38   : > { %v9649_v58 = vsel %vm350_vm2, %v378_v52, %v12590_v59  ;;  %v9655_v31 = vsel %vm350_vm2, %v12589_v23, %v381_v22  ;;  %v12602_v23 = vrot.slane %v9659_v17, 7  ;;  %v9676_v59 = vsel %vm350_vm2, %v12595_v19, %v384_v18  ;;  %12725 = vst [vmem:[#allocation40_spill] sm:$0xff] %v9701_v9  ;;  %12726 = vst [vmem:[#allocation41_spill] sm:$0xff] %v9703_v8  ;;  %v9724_v4 = vld [vmem:[#allocation2 + $0xf0] sm:$0xff]  ;;  %v9766_v17 = vld [vmem:[#allocation2] sm:$0xff] }
  0x39   : > { %v9670_v52 = vsel %vm350_vm2, %v381_v22, %v12596_v53  ;;  %v12608_v19 = vrot.slane %v9680_v13, 7  ;;  %v9697_v53 = vsel %vm350_vm2, %v12601_v15, %v387_v14  ;;  %v12616_v15 = vrot.slane %v9701_v9, 7  ;;  %12727 = vst [vmem:[#allocation42_spill] sm:$0xff] %v9722_v5  ;;  %12728 = vst [vmem:[#allocation43_spill] sm:$0xff] %v9724_v4  ;;  %v9743_v12 = vld [vmem:[#allocation2 + $0xf8] sm:$0xff] }
  0x3a   : > { %7818 = vmatmul.mubr.msk.f32.gmra.mrb[12].mxu0 %vm204_vm1, %v9607_v39  ;;  %v9691_v22 = vsel %vm350_vm2, %v384_v18, %v12602_v23  ;;  %v9718_v23 = vsel %vm350_vm2, %v12607_v11, %v390_v10  ;;  %v12615_v7 = vrot.slane %v9703_v8, 1  ;;  %v393_v6 = vrot.slane %v9703_v8, 7  ;;  %v9745_v13 = vld [vmem:[#allocation2 + $0x100] sm:$0xff] }
  0x3b   : > { %7820 = vmatprep.mubr.msk.f32.mxu0 %vm204_vm1, %v9613_v62  ;;  %v9712_v18 = vsel %vm350_vm2, %v387_v14, %v12608_v19  ;;  %v9733_v14 = vsel %vm350_vm2, %v390_v10, %v12616_v15  ;;  %v12626_v11 = vrot.slane %v9722_v5, 7  ;;  %v12625_v3 = vrot.slane %v9724_v4, 1  ;;  %12729 = vst [vmem:[#allocation44_spill] sm:$0xff] %v9745_v13  ;;  %v9764_v16 = vld [vmem:[#allocation2 + $0x108] sm:$0xff] }
  0x3c   : > { %v9739_v19 = vsel %vm350_vm2, %v12615_v7, %v393_v6  ;;  %v396_v2 = vrot.slane %v9724_v4, 7  ;;  %v12634_v7 = vrot.slane %v9743_v12, 7  ;;  %v12633_v8 = vrot.slane %v9745_v13, 1 }
  0x3d   : > { %v9754_v10 = vsel %vm350_vm2, %v393_v6, %v12626_v11  ;;  %v399_v9 = vrot.slane %v9745_v13, 7  ;;  %v296_v4 = vrot.slane %v9766_v17, 1  ;;  %v351_v5 = vrot.slane %v9766_v17, 7 }
  0x3e   : > { %7821 = vmatmul.mubr.msk.f32.gmra.mrb[14].mxu0 %vm204_vm1, %v9628_v29  ;;  %v9760_v15 = vsel %vm350_vm2, %v12625_v3, %v396_v2  ;;  %v9775_v6 = vsel %vm350_vm2, %v396_v2, %v12634_v7  ;;  %v400_v3 = vrot.slane %v9764_v16, 7 }
  0x3f   : > { %7823 = vmatprep.mubr.msk.f32.mxu0 %vm204_vm1, %v9634_v46  ;;  %v9781_v11 = vsel %vm350_vm2, %v12633_v8, %v399_v9  ;;  %v352_v8 = vrot.slane %v9785_v20, 7  ;;  %v423_v7 = vsel %vm350_vm2, %v296_v4, %v351_v5 }
  0x40   : > { %v9794_v2 = vsel %vm350_vm2, %v399_v9, %v400_v3  ;;  %v6690_v9 = vld [vmem:[%s12551_s1 + $0x4] sm:$0xf] }
  0x41   : > { %v353_v13 = vsel %vm350_vm2, %v351_v5, %v352_v8  ;;  %v6724_v5 = vld [vmem:[%s12551_s1 + $0x10] sm:$0xf] }
  0x42   : > { %7824 = vmatmul.mubr.msk.f32.gmra.mrb[16].mxu0 %vm204_vm1, %v9649_v58 }
  0x43   : > { %7826 = vmatprep.mubr.msk.f32.mxu0 %vm204_vm1, %v9655_v31 }
  0x46   : > { %7827 = vmatmul.mubr.msk.f32.gmra.mrb[18].mxu0 %vm204_vm1, %v9670_v52 }
  0x47   : > { %7829 = vmatprep.mubr.msk.f32.mxu0 %vm204_vm1, %v9676_v59 }
  0x4a   : > { %7830 = vmatmul.mubr.msk.f32.gmra.mrb[20].mxu0 %vm204_vm1, %v9691_v22 }
  0x4b   : > { %7832 = vmatprep.mubr.msk.f32.mxu0 %vm204_vm1, %v9697_v53 }
  0x4e   : > { %7833 = vmatmul.mubr.msk.f32.gmra.mrb[22].mxu0 %vm204_vm1, %v9712_v18 }
  0x4f   : > { %7835 = vmatprep.mubr.msk.f32.mxu0 %vm204_vm1, %v9718_v23 }
  0x52   : > { %7836 = vmatmul.mubr.msk.f32.gmra.mrb[24].mxu0 %vm204_vm1, %v9733_v14 }
  0x53   : > { %7838 = vmatprep.mubr.msk.f32.mxu0 %vm204_vm1, %v9739_v19 }
  0x56   : > { %7839 = vmatmul.mubr.msk.f32.gmra.mrb[26].mxu0 %vm204_vm1, %v9754_v10 }
  0x57   : > { %7841 = vmatprep.mubr.msk.f32.mxu0 %vm204_vm1, %v9760_v15 }
  0x5a   : > { %7842 = vmatmul.mubr.msk.f32.gmra.mrb[28].mxu0 %vm204_vm1, %v9775_v6 }
  0x5b   : > { %7844 = vmatprep.mubr.msk.f32.mxu0 %vm204_vm1, %v9781_v11 }
  0x5e   : > { %7845 = vmatmul.mubr.msk.f32.gmra.mrb[30].mxu0 %vm204_vm1, %v9794_v2 }
  0x5f   : > { %7849 = vmatprep.mubr.msk.f32.mxu0 %vm204_vm1, %v423_v7  ;;  %v9928_v7 = vld [vmem:[#allocation2 + $0x110] sm:$0xff] }
  0x62   : > { %7850 = vmatmul.mubr.msk.f32.vlgmr.msra.gmra.mrb[0].mxu0 %vm204_vm1, %v353_v13  ;;  %v313_v13 = vrot.slane %v9928_v7, 1 }
  0x63   : > { %7898 = vmatpush3.msk.msra.mxu0 %vm615_vm0, %v9445_v44  ;;  %7852 = vmatprep.mubr.msk.f32.mxu0 %vm204_vm1, %v9422_v37  ;;  %v9936_v37 = vld [vmem:[#allocation2 + $0x118] sm:$0xff]  ;;  %v12732_v44 = vld [vmem:[#allocation37_spill] sm:$0xff] }
  0x64   : > { %7947 = vmatprep.subr.msk.mxu0 %vm615_vm0, %v6690_v9 }
  0x66   : > { %7853 = vmatmul.mubr.msk.f32.gmra.mrb[2].mxu0 %vm204_vm1, %v9427_v38  ;;  %v12730_v38 = vld [vmem:[#allocation35_spill] sm:$0xff] }
  0x67   : > { %7855 = vmatprep.mubr.msk.f32.mxu0 %vm204_vm1, %v9438_v42 }
  0x6a   : > { %7856 = vmatmul.mubr.msk.f32.gmra.mrb[4].mxu0 %vm204_vm1, %v9456_v45 }
  0x6b   : > { %7858 = vmatprep.mubr.msk.f32.mxu0 %vm204_vm1, %v9462_v47 }
  0x6e   : > { %7859 = vmatmul.mubr.msk.f32.gmra.mrb[6].mxu0 %vm204_vm1, %v9493_v56 }
  0x6f   : > { %7861 = vmatprep.mubr.msk.f32.mxu0 %vm204_vm1, %v9514_v61 }
  0x72   : > { %7862 = vmatmul.mubr.msk.f32.gmra.mrb[8].mxu0 %vm204_vm1, %v9544_v35 }
  0x73   : > { %7864 = vmatprep.mubr.msk.f32.mxu0 %vm204_vm1, %v9550_v48 }
  0x76   : > { %7865 = vmatmul.mubr.msk.f32.gmra.mrb[10].mxu0 %vm204_vm1, %v9565_v49 }
  0x77   : > { %7867 = vmatprep.mubr.msk.f32.mxu0 %vm204_vm1, %v9571_v57 }
  0x7a   : > { %7868 = vmatmul.mubr.msk.f32.gmra.mrb[12].mxu0 %vm204_vm1, %v9586_v63 }
  0x7b   : > { %7870 = vmatprep.mubr.msk.f32.mxu0 %vm204_vm1, %v9592_v40 }
  0x7e   : > { %7871 = vmatmul.mubr.msk.f32.gmra.mrb[14].mxu0 %vm204_vm1, %v9607_v39 }
  0x7f   : > { %7873 = vmatprep.mubr.msk.f32.mxu0 %vm204_vm1, %v9613_v62 }
  0x82   : > { %7874 = vmatmul.mubr.msk.f32.gmra.mrb[16].mxu0 %vm204_vm1, %v9628_v29 }
  0x83   : > { %7876 = vmatprep.mubr.msk.f32.mxu0 %vm204_vm1, %v9634_v46 }
  0x86   : > { %7877 = vmatmul.mubr.msk.f32.gmra.mrb[18].mxu0 %vm204_vm1, %v9649_v58 }
  0x87   : > { %7879 = vmatprep.mubr.msk.f32.mxu0 %vm204_vm1, %v9655_v31 }
  0x8a   : > { %7880 = vmatmul.mubr.msk.f32.gmra.mrb[20].mxu0 %vm204_vm1, %v9670_v52 }
  0x8b   : > { %7882 = vmatprep.mubr.msk.f32.mxu0 %vm204_vm1, %v9676_v59 }
  0x8e   : > { %7883 = vmatmul.mubr.msk.f32.gmra.mrb[22].mxu0 %vm204_vm1, %v9691_v22 }
  0x8f   : > { %7885 = vmatprep.mubr.msk.f32.mxu0 %vm204_vm1, %v9697_v53 }
  0x92   : > { %7886 = vmatmul.mubr.msk.f32.gmra.mrb[24].mxu0 %vm204_vm1, %v9712_v18 }
  0x93   : > { %7888 = vmatprep.mubr.msk.f32.mxu0 %vm204_vm1, %v9718_v23 }
  0x96   : > { %7889 = vmatmul.mubr.msk.f32.gmra.mrb[26].mxu0 %vm204_vm1, %v9733_v14 }
  0x97   : > { %7891 = vmatprep.mubr.msk.f32.mxu0 %vm204_vm1, %v9739_v19 }
  0x9a   : > { %7892 = vmatmul.mubr.msk.f32.gmra.mrb[28].mxu0 %vm204_vm1, %v9754_v10 }
  0x9b   : > { %7894 = vmatprep.mubr.msk.f32.mxu0 %vm204_vm1, %v9760_v15 }
  0x9e   : > { %7895 = vmatmul.mubr.msk.f32.gmra.mrb[30].mxu0 %vm204_vm1, %v9775_v6 }
  0x9f   : > { %7899 = vmatprep.mubr.msk.f32.mxu0 %vm204_vm1, %v9438_v42  ;;  %v12731_v42 = vld [vmem:[#allocation36_spill] sm:$0xff] }
  0xa2   : > { %7900 = vmatmul.mubr.msk.f32.vlgmr.msra.gmra.mrb[0].mxu0 %vm204_vm1, %v9456_v45  ;;  %v12733_v45 = vld [vmem:[#allocation38_spill] sm:$0xff] }
  0xa3   : > { %7948 = vmatpush3.msk.msra.mxu0 %vm615_vm0, %v6690_v9  ;;  %7902 = vmatprep.mubr.msk.f32.mxu0 %vm204_vm1, %v9462_v47  ;;  %v12735_v47 = vld [vmem:[#allocation40_spill] sm:$0xff]  ;;  %v12748_v9 = vrot.slane %v9470_v51, 1 }
  0xa4   : > { %7997 = vmatprep.subr.msk.mxu0 %vm615_vm0, %v6724_v5 }
  0xa6   : > { %7903 = vmatmul.mubr.msk.f32.gmra.mrb[2].mxu0 %vm204_vm1, %v9493_v56  ;;  %v12738_v56 = vld [vmem:[#allocation43_spill] sm:$0xff] }
  0xa7   : > { %7905 = vmatprep.mubr.msk.f32.mxu0 %vm204_vm1, %v9514_v61  ;;  %v6826_v61 = vld [vmem:[%s12551_s1 + $0x14] sm:$0xf] }
  0xaa   : > { %7906 = vmatmul.mubr.msk.f32.gmra.mrb[4].mxu0 %vm204_vm1, %v9544_v35 }
  0xab   : > { %7908 = vmatprep.mubr.msk.f32.mxu0 %vm204_vm1, %v9550_v48  ;;  %v12736_v48 = vld [vmem:[#allocation41_spill] sm:$0xff] }
  0xae   : > { %7909 = vmatmul.mubr.msk.f32.gmra.mrb[6].mxu0 %vm204_vm1, %v9565_v49 }
  0xaf   : > { %7911 = vmatprep.mubr.msk.f32.mxu0 %vm204_vm1, %v9571_v57  ;;  %v6792_v57 = vld [vmem:[%s12551_s1 + $0x8] sm:$0xf] }
  0xb2   : > { %7912 = vmatmul.mubr.msk.f32.gmra.mrb[8].mxu0 %vm204_vm1, %v9586_v63  ;;  %v12740_v63 = vrot.slane %v9397_v26, 1 }
  0xb3   : > { %7914 = vmatprep.mubr.msk.f32.mxu0 %vm204_vm1, %v9592_v40  ;;  %v444_v40 = vrot.slane %v9399_v27, 1 }
  0xb6   : > { %7915 = vmatmul.mubr.msk.f32.gmra.mrb[10].mxu0 %vm204_vm1, %v9607_v39  ;;  %v10172_v39 = vsel %vm441_vm3, %v12740_v63, %v444_v40  ;;  %v12756_v63 = vrot.slane %v9598_v54, 1 }
  0xb7   : > { %7917 = vmatprep.mubr.msk.f32.mxu0 %vm204_vm1, %v9613_v62  ;;  %v442_v62 = vrot.slane %v9785_v20, 1 }
  0xb9   : > { %v443_v35 = vsel %vm441_vm3, %v296_v4, %v442_v62  ;;  %v514_v49 = vsel %vm441_vm3, %v442_v62, %v352_v8  ;;  %v10178_v4 = vld [vmem:[%s12551_s1 + $0x20] sm:$0xf]  ;;  %v12741_v8 = vrot.slane %v9399_v27, 7  ;;  %v12753_v62 = vrot.slane %v9575_v1, 7 }
  0xba   : > { %7918 = vmatmul.mubr.msk.f32.gmra.mrb[12].mxu0 %vm204_vm1, %v9628_v29 }
  0xbb   : > { %7920 = vmatprep.mubr.msk.f32.mxu0 %vm204_vm1, %v9634_v46  ;;  %v12734_v46 = vld [vmem:[#allocation39_spill] sm:$0xff] }
  0xbe   : > { %7921 = vmatmul.mubr.msk.f32.gmra.mrb[14].mxu0 %vm204_vm1, %v9649_v58  ;;  %v448_v58 = vrot.slane %v9431_v41, 1 }
  0xbf   : > { %7923 = vmatprep.mubr.msk.f32.mxu0 %vm204_vm1, %v9655_v31  ;;  %v402_v31 = vrot.slane %v9928_v7, 7 }
  0xc2   : > { %7924 = vmatmul.mubr.msk.f32.gmra.mrb[16].mxu0 %vm204_vm1, %v9670_v52 }
  0xc3   : > { %7926 = vmatprep.mubr.msk.f32.mxu0 %vm204_vm1, %v9676_v59  ;;  %v12739_v59 = vld [vmem:[#allocation44_spill] sm:$0xff] }
  0xc6   : > { %7927 = vmatmul.mubr.msk.f32.gmra.mrb[18].mxu0 %vm204_vm1, %v9691_v22 }
  0xc7   : > { %7929 = vmatprep.mubr.msk.f32.mxu0 %vm204_vm1, %v9697_v53  ;;  %v12737_v53 = vld [vmem:[#allocation42_spill] sm:$0xff] }
  0xca   : > { %7930 = vmatmul.mubr.msk.f32.gmra.mrb[20].mxu0 %vm204_vm1, %v9712_v18  ;;  %v450_v18 = vrot.slane %v9466_v50, 1 }
  0xcb   : > { %7932 = vmatprep.mubr.msk.f32.mxu0 %vm204_vm1, %v9718_v23  ;;  %v440_v23 = vsel %vm350_vm2, %v313_v13, %v402_v31 }
  0xce   : > { %7933 = vmatmul.mubr.msk.f32.gmra.mrb[22].mxu0 %vm204_vm1, %v9733_v14  ;;  %v12745_v14 = vrot.slane %v9431_v41, 7 }
  0xcf   : > { %7935 = vmatprep.mubr.msk.f32.mxu0 %vm204_vm1, %v9739_v19  ;;  %v403_v19 = vrot.slane %v9936_v37, 7 }
  0xd2   : > { %7936 = vmatmul.mubr.msk.f32.gmra.mrb[24].mxu0 %vm204_vm1, %v9754_v10  ;;  %v12746_v10 = vrot.slane %v9440_v43, 1 }
  0xd3   : > { %7938 = vmatprep.mubr.msk.f32.mxu0 %vm204_vm1, %v9760_v15  ;;  %v404_v15 = vsel %vm350_vm2, %v402_v31, %v403_v19  ;;  %v12749_v31 = vrot.slane %v9518_v0, 7 }
  0xd6   : > { %7939 = vmatmul.mubr.msk.f32.gmra.mrb[26].mxu0 %vm204_vm1, %v9775_v6  ;;  %v452_v6 = vrot.slane %v9518_v0, 1 }
  0xd7   : > { %7941 = vmatprep.mubr.msk.f32.mxu0 %vm204_vm1, %v9781_v11  ;;  %v6758_v11 = vld [vmem:[%s12551_s1 + $0x1c] sm:$0xf] }
  0xda   : > { %7942 = vmatmul.mubr.msk.f32.gmra.mrb[28].mxu0 %vm204_vm1, %v9794_v2  ;;  %v12747_v2 = vrot.slane %v9466_v50, 7 }
  0xdb   : > { %7944 = vmatprep.mubr.msk.f32.mxu0 %vm204_vm1, %v440_v23  ;;  %v12750_v23 = vrot.slane %v9533_v30, 1 }
  0xde   : > { %7945 = vmatmul.mubr.msk.f32.gmra.mrb[30].mxu0 %vm204_vm1, %v404_v15  ;;  %v456_v15 = vrot.slane %v9575_v1, 1 }
  0xdf   : > { %7949 = vmatprep.mubr.msk.f32.mxu0 %vm204_vm1, %v9766_v17  ;;  %v446_v17 = vrot.slane %v9413_v33, 1 }
  0xe2   : > { %7950 = vmatmul.mubr.msk.f32.vlgmr.msra.gmra.mrb[0].mxu0 %vm204_vm1, %v9785_v20  ;;  %v10187_v20 = vsel %vm441_vm3, %v444_v40, %v12741_v8  ;;  %v460_v40 = vrot.slane %v9617_v25, 1  ;;  %v12757_v8 = vrot.slane %v9617_v25, 7 }
  0xe3   : > { %7998 = vmatpush3.msk.msra.mxu0 %vm615_vm0, %v6724_v5  ;;  %7952 = vmatprep.mubr.msk.f32.mxu0 %vm204_vm1, %v9397_v26  ;;  %v454_v5 = vrot.slane %v9554_v36, 1 }
  0xe4   : > { %8047 = vmatprep.subr.msk.mxu0 %vm615_vm0, %v6758_v11 }
  0xe6   : > { %7953 = vmatmul.mubr.msk.f32.gmra.mrb[2].mxu0 %vm204_vm1, %v9399_v27 }
  0xe7   : > { %7955 = vmatprep.mubr.msk.f32.mxu0 %vm204_vm1, %v9401_v28 }
  0xea   : > { %7956 = vmatmul.mubr.msk.f32.gmra.mrb[4].mxu0 %vm204_vm1, %v9413_v33 }
  0xeb   : > { %7958 = vmatprep.mubr.msk.f32.mxu0 %vm204_vm1, %v9415_v34 }
  0xee   : > { %7959 = vmatmul.mubr.msk.f32.gmra.mrb[6].mxu0 %vm204_vm1, %v9431_v41 }
  0xef   : > { %7961 = vmatprep.mubr.msk.f32.mxu0 %vm204_vm1, %v9440_v43 }
  0xf2   : > { %7962 = vmatmul.mubr.msk.f32.gmra.mrb[8].mxu0 %vm204_vm1, %v9466_v50 }
  0xf3   : > { %7964 = vmatprep.mubr.msk.f32.mxu0 %vm204_vm1, %v9470_v51 }
  0xf6   : > { %7965 = vmatmul.mubr.msk.f32.gmra.mrb[10].mxu0 %vm204_vm1, %v9518_v0 }
  0xf7   : > { %7967 = vmatprep.mubr.msk.f32.mxu0 %vm204_vm1, %v9533_v30 }
  0xfa   : > { %7968 = vmatmul.mubr.msk.f32.gmra.mrb[12].mxu0 %vm204_vm1, %v9554_v36 }
  0xfb   : > { %7970 = vmatprep.mubr.msk.f32.mxu0 %vm204_vm1, %v9556_v32 }
  0xfe   : > { %7971 = vmatmul.mubr.msk.f32.gmra.mrb[14].mxu0 %vm204_vm1, %v9575_v1 }
  0xff   : > { %7973 = vmatprep.mubr.msk.f32.mxu0 %vm204_vm1, %v9577_v60 }
 0x102   : > { %7974 = vmatmul.mubr.msk.f32.gmra.mrb[16].mxu0 %vm204_vm1, %v9596_v55 }
 0x103   : > { %7976 = vmatprep.mubr.msk.f32.mxu0 %vm204_vm1, %v9598_v54 }
 0x106   : > { %7977 = vmatmul.mubr.msk.f32.gmra.mrb[18].mxu0 %vm204_vm1, %v9617_v25 }
 0x107   : > { %7979 = vmatprep.mubr.msk.f32.mxu0 %vm204_vm1, %v9619_v24 }
 0x10a   : > { %7980 = vmatmul.mubr.msk.f32.gmra.mrb[20].mxu0 %vm204_vm1, %v9638_v21 }
 0x10b   : > { %7982 = vmatprep.mubr.msk.f32.mxu0 %vm204_vm1, %v12730_v38 }
 0x10e   : > { %7983 = vmatmul.mubr.msk.f32.gmra.mrb[22].mxu0 %vm204_vm1, %v12731_v42 }
 0x10f   : > { %7985 = vmatprep.mubr.msk.f32.mxu0 %vm204_vm1, %v12732_v44 }
 0x112   : > { %7986 = vmatmul.mubr.msk.f32.gmra.mrb[24].mxu0 %vm204_vm1, %v12733_v45 }
 0x113   : > { %7988 = vmatprep.mubr.msk.f32.mxu0 %vm204_vm1, %v12734_v46 }
 0x116   : > { %7989 = vmatmul.mubr.msk.f32.gmra.mrb[26].mxu0 %vm204_vm1, %v12735_v47 }
 0x117   : > { %7991 = vmatprep.mubr.msk.f32.mxu0 %vm204_vm1, %v12736_v48 }
 0x11a   : > { %7992 = vmatmul.mubr.msk.f32.gmra.mrb[28].mxu0 %vm204_vm1, %v12737_v53 }
 0x11b   : > { %7994 = vmatprep.mubr.msk.f32.mxu0 %vm204_vm1, %v12738_v56 }
 0x11e   : > { %7995 = vmatmul.mubr.msk.f32.gmra.mrb[30].mxu0 %vm204_vm1, %v9743_v12 }
 0x11f   : > { %7999 = vmatprep.mubr.msk.f32.mxu0 %vm204_vm1, %v9397_v26  ;;  %v12742_v26 = vrot.slane %v9401_v28, 1 }
 0x121   : > { %v10192_v29 = vsel %vm441_vm3, %v12742_v26, %v446_v17  ;;  %v12758_v26 = vrot.slane %v9619_v24, 1 }
 0x122   : > { %8000 = vmatmul.mubr.msk.f32.vlgmr.msra.gmra.mrb[0].mxu0 %vm204_vm1, %v9399_v27  ;;  %v12743_v27 = vrot.slane %v9413_v33, 7 }
 0x123   : > { %8048 = vmatpush3.msk.msra.mxu0 %vm615_vm0, %v6758_v11  ;;  %8002 = vmatprep.mubr.msk.f32.mxu0 %vm204_vm1, %v9401_v28  ;;  %v12751_v11 = vrot.slane %v9554_v36, 7 }
 0x124   : > { %8097 = vmatprep.subr.msk.mxu0 %vm615_vm0, %v6792_v57  ;;  %v10204_v52 = vsel %vm441_vm3, %v446_v17, %v12743_v27  ;;  %v462_v17 = vrot.slane %v9638_v21, 1  ;;  %v12759_v27 = vrot.slane %v9638_v21, 7 }
 0x126   : > { %8003 = vmatmul.mubr.msk.f32.gmra.mrb[2].mxu0 %vm204_vm1, %v9413_v33 }
 0x127   : > { %8005 = vmatprep.mubr.msk.f32.mxu0 %vm204_vm1, %v9415_v34 }
 0x12a   : > { %8006 = vmatmul.mubr.msk.f32.gmra.mrb[4].mxu0 %vm204_vm1, %v9431_v41 }
 0x12b   : > { %8008 = vmatprep.mubr.msk.f32.mxu0 %vm204_vm1, %v9440_v43 }
 0x12e   : > { %8009 = vmatmul.mubr.msk.f32.gmra.mrb[6].mxu0 %vm204_vm1, %v9466_v50 }
 0x12f   : > { %8011 = vmatprep.mubr.msk.f32.mxu0 %vm204_vm1, %v9470_v51 }
 0x132   : > { %8012 = vmatmul.mubr.msk.f32.gmra.mrb[8].mxu0 %vm204_vm1, %v9518_v0 }
 0x133   : > { %8014 = vmatprep.mubr.msk.f32.mxu0 %vm204_vm1, %v9533_v30 }
 0x136   : > { %8015 = vmatmul.mubr.msk.f32.gmra.mrb[10].mxu0 %vm204_vm1, %v9554_v36 }
 0x137   : > { %8017 = vmatprep.mubr.msk.f32.mxu0 %vm204_vm1, %v9556_v32 }
 0x13a   : > { %8018 = vmatmul.mubr.msk.f32.gmra.mrb[12].mxu0 %vm204_vm1, %v9575_v1 }
 0x13b   : > { %8020 = vmatprep.mubr.msk.f32.mxu0 %vm204_vm1, %v9577_v60 }
 0x13e   : > { %8021 = vmatmul.mubr.msk.f32.gmra.mrb[14].mxu0 %vm204_vm1, %v9596_v55 }
 0x13f   : > { %8023 = vmatprep.mubr.msk.f32.mxu0 %vm204_vm1, %v9598_v54 }
 0x142   : > { %8024 = vmatmul.mubr.msk.f32.gmra.mrb[16].mxu0 %vm204_vm1, %v9617_v25 }
 0x143   : > { %8026 = vmatprep.mubr.msk.f32.mxu0 %vm204_vm1, %v9619_v24 }
 0x146   : > { %8027 = vmatmul.mubr.msk.f32.gmra.mrb[18].mxu0 %vm204_vm1, %v9638_v21 }
 0x147   : > { %8029 = vmatprep.mubr.msk.f32.mxu0 %vm204_vm1, %v12730_v38 }
 0x14a   : > { %8030 = vmatmul.mubr.msk.f32.gmra.mrb[20].mxu0 %vm204_vm1, %v12731_v42 }
 0x14b   : > { %8032 = vmatprep.mubr.msk.f32.mxu0 %vm204_vm1, %v12732_v44 }
 0x14e   : > { %8033 = vmatmul.mubr.msk.f32.gmra.mrb[22].mxu0 %vm204_vm1, %v12733_v45 }
 0x14f   : > { %8035 = vmatprep.mubr.msk.f32.mxu0 %vm204_vm1, %v12734_v46 }
 0x152   : > { %8036 = vmatmul.mubr.msk.f32.gmra.mrb[24].mxu0 %vm204_vm1, %v12735_v47 }
 0x153   : > { %8038 = vmatprep.mubr.msk.f32.mxu0 %vm204_vm1, %v12736_v48 }
 0x156   : > { %8039 = vmatmul.mubr.msk.f32.gmra.mrb[26].mxu0 %vm204_vm1, %v12737_v53 }
 0x157   : > { %8041 = vmatprep.mubr.msk.f32.mxu0 %vm204_vm1, %v12738_v56 }
 0x15a   : > { %8042 = vmatmul.mubr.msk.f32.gmra.mrb[28].mxu0 %vm204_vm1, %v9743_v12 }
 0x15b   : > { %8044 = vmatprep.mubr.msk.f32.mxu0 %vm204_vm1, %v12739_v59 }
 0x15e   : > { %8045 = vmatmul.mubr.msk.f32.gmra.mrb[30].mxu0 %vm204_vm1, %v9764_v16 }
 0x15f   : > { %8049 = vmatprep.mubr.msk.f32.mxu0 %vm204_vm1, %v9401_v28  ;;  %v12744_v28 = vrot.slane %v9415_v34, 1 }
 0x161   : > { %v10209_v22 = vsel %vm441_vm3, %v12744_v28, %v448_v58  ;;  %v12760_v28 = vrot.slane %v12730_v38, 1 }
 0x162   : > { %8050 = vmatmul.mubr.msk.f32.vlgmr.msra.gmra.mrb[0].mxu0 %vm204_vm1, %v9413_v33  ;;  %v10219_v33 = vsel %vm441_vm3, %v448_v58, %v12745_v14  ;;  %v464_v58 = vrot.slane %v12731_v42, 1  ;;  %v12761_v14 = vrot.slane %v12731_v42, 7 }
 0x163   : > { %8098 = vmatpush3.msk.msra.mxu0 %vm615_vm0, %v6792_v57  ;;  %8052 = vmatprep.mubr.msk.f32.mxu0 %vm204_vm1, %v9415_v34  ;;  %v10224_v34 = vsel %vm441_vm3, %v12746_v10, %v450_v18  ;;  %v12752_v57 = vrot.slane %v9556_v32, 1  ;;  %v12762_v10 = vrot.slane %v12732_v44, 1 }
 0x164   : > { %8147 = vmatprep.subr.msk.mxu0 %vm615_vm0, %v6826_v61 }
 0x166   : > { %8053 = vmatmul.mubr.msk.f32.gmra.mrb[2].mxu0 %vm204_vm1, %v9431_v41  ;;  %v10234_v41 = vsel %vm441_vm3, %v450_v18, %v12747_v2  ;;  %v466_v18 = vrot.slane %v12733_v45, 1  ;;  %v12763_v2 = vrot.slane %v12733_v45, 7 }
 0x167   : > { %8055 = vmatprep.mubr.msk.f32.mxu0 %vm204_vm1, %v9440_v43  ;;  %v10239_v43 = vsel %vm441_vm3, %v12748_v9, %v452_v6  ;;  %v12764_v9 = vrot.slane %v12734_v46, 1 }
 0x16a   : > { %8056 = vmatmul.mubr.msk.f32.gmra.mrb[4].mxu0 %vm204_vm1, %v9466_v50  ;;  %v10249_v50 = vsel %vm441_vm3, %v452_v6, %v12749_v31  ;;  %v468_v6 = vrot.slane %v12735_v47, 1  ;;  %v12765_v31 = vrot.slane %v12735_v47, 7 }
 0x16b   : > { %8058 = vmatprep.mubr.msk.f32.mxu0 %vm204_vm1, %v9470_v51  ;;  %v10254_v51 = vsel %vm441_vm3, %v12750_v23, %v454_v5  ;;  %v12766_v23 = vrot.slane %v12736_v48, 1 }
 0x16e   : > { %8059 = vmatmul.mubr.msk.f32.gmra.mrb[6].mxu0 %vm204_vm1, %v9518_v0  ;;  %v10264_v0 = vsel %vm441_vm3, %v454_v5, %v12751_v11  ;;  %v470_v5 = vrot.slane %v12737_v53, 1  ;;  %v12767_v11 = vrot.slane %v12737_v53, 7 }
 0x16f   : > { %8061 = vmatprep.mubr.msk.f32.mxu0 %vm204_vm1, %v9533_v30  ;;  %v10269_v30 = vsel %vm441_vm3, %v12752_v57, %v456_v15  ;;  %v12768_v57 = vrot.slane %v12738_v56, 1 }
 0x172   : > { %8062 = vmatmul.mubr.msk.f32.gmra.mrb[8].mxu0 %vm204_vm1, %v9554_v36  ;;  %v10279_v36 = vsel %vm441_vm3, %v456_v15, %v12753_v62  ;;  %v472_v15 = vrot.slane %v9743_v12, 1 }
 0x173   : > { %8064 = vmatprep.mubr.msk.f32.mxu0 %vm204_vm1, %v9556_v32 }
 0x176   : > { %8065 = vmatmul.mubr.msk.f32.gmra.mrb[10].mxu0 %vm204_vm1, %v9575_v1 }
 0x177   : > { %8067 = vmatprep.mubr.msk.f32.mxu0 %vm204_vm1, %v9577_v60 }
 0x17a   : > { %8068 = vmatmul.mubr.msk.f32.gmra.mrb[12].mxu0 %vm204_vm1, %v9596_v55 }
 0x17b   : > { %8070 = vmatprep.mubr.msk.f32.mxu0 %vm204_vm1, %v9598_v54  ;;  %v10314_v54 = vsel %vm441_vm3, %v12758_v26, %v462_v17 }
 0x17e   : > { %8071 = vmatmul.mubr.msk.f32.gmra.mrb[14].mxu0 %vm204_vm1, %v9617_v25  ;;  %v10324_v25 = vsel %vm441_vm3, %v462_v17, %v12759_v27 }
 0x17f   : > { %8073 = vmatprep.mubr.msk.f32.mxu0 %vm204_vm1, %v9619_v24  ;;  %v10329_v24 = vsel %vm441_vm3, %v12760_v28, %v464_v58 }
 0x182   : > { %8074 = vmatmul.mubr.msk.f32.gmra.mrb[16].mxu0 %vm204_vm1, %v9638_v21  ;;  %v10339_v21 = vsel %vm441_vm3, %v464_v58, %v12761_v14 }
 0x183   : > { %8076 = vmatprep.mubr.msk.f32.mxu0 %vm204_vm1, %v12730_v38  ;;  %v10344_v38 = vsel %vm441_vm3, %v12762_v10, %v466_v18 }
 0x186   : > { %8077 = vmatmul.mubr.msk.f32.gmra.mrb[18].mxu0 %vm204_vm1, %v12731_v42  ;;  %v10354_v42 = vsel %vm441_vm3, %v466_v18, %v12763_v2 }
 0x187   : > { %8079 = vmatprep.mubr.msk.f32.mxu0 %vm204_vm1, %v12732_v44  ;;  %v10359_v44 = vsel %vm441_vm3, %v12764_v9, %v468_v6 }
 0x18a   : > { %8080 = vmatmul.mubr.msk.f32.gmra.mrb[20].mxu0 %vm204_vm1, %v12733_v45  ;;  %v10369_v45 = vsel %vm441_vm3, %v468_v6, %v12765_v31 }
 0x18b   : > { %8082 = vmatprep.mubr.msk.f32.mxu0 %vm204_vm1, %v12734_v46  ;;  %v10374_v46 = vsel %vm441_vm3, %v12766_v23, %v470_v5 }
 0x18e   : > { %8083 = vmatmul.mubr.msk.f32.gmra.mrb[22].mxu0 %vm204_vm1, %v12735_v47  ;;  %v10384_v47 = vsel %vm441_vm3, %v470_v5, %v12767_v11 }
 0x18f   : > { %8085 = vmatprep.mubr.msk.f32.mxu0 %vm204_vm1, %v12736_v48  ;;  %v10389_v48 = vsel %vm441_vm3, %v12768_v57, %v472_v15 }
 0x192   : > { %8086 = vmatmul.mubr.msk.f32.gmra.mrb[24].mxu0 %vm204_vm1, %v12737_v53  ;;  %v12770_v53 = vrot.slane %v12739_v59, 1 }
 0x193   : > { %8088 = vmatprep.mubr.msk.f32.mxu0 %vm204_vm1, %v12738_v56 }
 0x196   : > { %8089 = vmatmul.mubr.msk.f32.gmra.mrb[26].mxu0 %vm204_vm1, %v9743_v12 }
 0x197   : > { %8091 = vmatprep.mubr.msk.f32.mxu0 %vm204_vm1, %v12739_v59 }
 0x19a   : > { %8092 = vmatmul.mubr.msk.f32.gmra.mrb[28].mxu0 %vm204_vm1, %v9764_v16 }
 0x19b   : > { %8094 = vmatprep.mubr.msk.f32.mxu0 %vm204_vm1, %v9928_v7  ;;  %v10548_v7 = vld [vmem:[%s12552_s2] sm:$0xf] }
 0x19e   : > { %8095 = vmatmul.mubr.msk.f32.gmra.mrb[30].mxu0 %vm204_vm1, %v9936_v37 }
 0x19f   : > { %8099 = vmatprep.mubr.msk.f32.mxu0 %vm204_vm1, %v443_v35  ;;  %v12754_v35 = vrot.slane %v9577_v60, 1  ;;  %v10299_v60 = vsel %vm441_vm3, %v12756_v63, %v460_v40 }
 0x1a2   : > { %8100 = vmatmul.mubr.msk.f32.vlgmr.msra.gmra.mrb[0].mxu0 %vm204_vm1, %v514_v49  ;;  %v12755_v49 = vrot.slane %v9596_v55, 7 }
 0x1a3   : > { %8148 = vmatpush3.msk.msra.mxu0 %vm615_vm0, %v6826_v61  ;;  %8102 = vmatprep.mubr.msk.f32.mxu0 %vm204_vm1, %v10172_v39  ;;  %v458_v61 = vrot.slane %v9596_v55, 1  ;;  %v10309_v55 = vsel %vm441_vm3, %v460_v40, %v12757_v8 }
 0x1a4   : > { %8197 = vmatprep.subr.msk.mxu0 %vm615_vm0, %v10178_v4 }
 0x1a5   : > { %v10284_v32 = vsel %vm441_vm3, %v12754_v35, %v458_v61  ;;  %v10294_v1 = vsel %vm441_vm3, %v458_v61, %v12755_v49  ;;  %v12769_v61 = vrot.slane %v9743_v12, 7  ;;  %v474_v12 = vrot.slane %v9764_v16, 1 }
 0x1a6   : > { %8103 = vmatmul.mubr.msk.f32.gmra.mrb[2].mxu0 %vm204_vm1, %v10187_v20 }
 0x1a7   : > { %8105 = vmatprep.mubr.msk.f32.mxu0 %vm204_vm1, %v10192_v29  ;;  %v10398_v62 = vsel %vm441_vm3, %v472_v15, %v12769_v61  ;;  %v475_v56 = vsel %vm441_vm3, %v12770_v53, %v474_v12 }
 0x1aa   : > { %8106 = vmatmul.mubr.msk.f32.gmra.mrb[4].mxu0 %vm204_vm1, %v10204_v52 }
 0x1ab   : > { %8108 = vmatprep.mubr.msk.f32.mxu0 %vm204_vm1, %v10209_v22 }
 0x1ae   : > { %8109 = vmatmul.mubr.msk.f32.gmra.mrb[6].mxu0 %vm204_vm1, %v10219_v33 }
 0x1af   : > { %8111 = vmatprep.mubr.msk.f32.mxu0 %vm204_vm1, %v10224_v34 }
 0x1b2   : > { %8112 = vmatmul.mubr.msk.f32.gmra.mrb[8].mxu0 %vm204_vm1, %v10234_v41 }
 0x1b3   : > { %8114 = vmatprep.mubr.msk.f32.mxu0 %vm204_vm1, %v10239_v43 }
 0x1b6   : > { %8115 = vmatmul.mubr.msk.f32.gmra.mrb[10].mxu0 %vm204_vm1, %v10249_v50 }
 0x1b7   : > { %8117 = vmatprep.mubr.msk.f32.mxu0 %vm204_vm1, %v10254_v51 }
 0x1ba   : > { %8118 = vmatmul.mubr.msk.f32.gmra.mrb[12].mxu0 %vm204_vm1, %v10264_v0 }
 0x1bb   : > { %8120 = vmatprep.mubr.msk.f32.mxu0 %vm204_vm1, %v10269_v30 }
 0x1be   : > { %8121 = vmatmul.mubr.msk.f32.gmra.mrb[14].mxu0 %vm204_vm1, %v10279_v36 }
 0x1bf   : > { %8123 = vmatprep.mubr.msk.f32.mxu0 %vm204_vm1, %v10284_v32 }
 0x1c2   : > { %8124 = vmatmul.mubr.msk.f32.gmra.mrb[16].mxu0 %vm204_vm1, %v10294_v1 }
 0x1c3   : > { %8126 = vmatprep.mubr.msk.f32.mxu0 %vm204_vm1, %v10299_v60 }
 0x1c6   : > { %8127 = vmatmul.mubr.msk.f32.gmra.mrb[18].mxu0 %vm204_vm1, %v10309_v55 }
 0x1c7   : > { %8129 = vmatprep.mubr.msk.f32.mxu0 %vm204_vm1, %v10314_v54 }
 0x1ca   : > { %8130 = vmatmul.mubr.msk.f32.gmra.mrb[20].mxu0 %vm204_vm1, %v10324_v25 }
 0x1cb   : > { %8132 = vmatprep.mubr.msk.f32.mxu0 %vm204_vm1, %v10329_v24 }
 0x1ce   : > { %8133 = vmatmul.mubr.msk.f32.gmra.mrb[22].mxu0 %vm204_vm1, %v10339_v21 }
 0x1cf   : > { %8135 = vmatprep.mubr.msk.f32.mxu0 %vm204_vm1, %v10344_v38 }
 0x1d2   : > { %8136 = vmatmul.mubr.msk.f32.gmra.mrb[24].mxu0 %vm204_vm1, %v10354_v42 }
 0x1d3   : > { %8138 = vmatprep.mubr.msk.f32.mxu0 %vm204_vm1, %v10359_v44 }
 0x1d6   : > { %8139 = vmatmul.mubr.msk.f32.gmra.mrb[26].mxu0 %vm204_vm1, %v10369_v45 }
 0x1d7   : > { %8141 = vmatprep.mubr.msk.f32.mxu0 %vm204_vm1, %v10374_v46 }
 0x1da   : > { %8142 = vmatmul.mubr.msk.f32.gmra.mrb[28].mxu0 %vm204_vm1, %v10384_v47 }
 0x1db   : > { %8144 = vmatprep.mubr.msk.f32.mxu0 %vm204_vm1, %v10389_v48 }
 0x1de   : > { %8145 = vmatmul.mubr.msk.f32.gmra.mrb[30].mxu0 %vm204_vm1, %v10398_v62 }
 0x1df   : > { %8149 = vmatprep.mubr.msk.f32.mxu0 %vm204_vm1, %v10172_v39  ;;  %v530_v39 = vsel %vm441_vm3, %v474_v12, %v400_v3  ;;  %v476_v3 = vrot.slane %v9936_v37, 1 }
 0x1e1   : > { %v477_v16 = vsel %vm441_vm3, %v313_v13, %v476_v3  ;;  %v531_v59 = vsel %vm441_vm3, %v476_v3, %v403_v19 }
 0x1e2   : > { %8150 = vmatmul.mubr.msk.f32.vlgmr.msra.gmra.mrb[0].mxu0 %vm204_vm1, %v10187_v20 }
 0x1e3   : > { %8198 = vmatpush3.msk.msra.mxu0 %vm615_vm0, %v10178_v4  ;;  %8152 = vmatprep.mubr.msk.f32.mxu0 %vm204_vm1, %v10192_v29  ;;  %v6894_v4 = vld [vmem:[%s12552_s2 + $0xc] sm:$0xf] }
 0x1e4   : > { %8247 = vmatprep.subr.msk.mxu1 %vm615_vm0, %v6894_v4 }
 0x1e5   : > { %8248 = vmatpush3.msk.msra.mxu1 %vm615_vm0, %v6894_v4 }
 0x1e6   : > { %8153 = vmatmul.mubr.msk.f32.gmra.mrb[2].mxu0 %vm204_vm1, %v10204_v52  ;;  %8297 = vmatprep.subr.msk.mxu1 %vm615_vm0, %v10548_v7 }
 0x1e7   : > { %8155 = vmatprep.mubr.msk.f32.mxu0 %vm204_vm1, %v10209_v22 }
 0x1ea   : > { %8156 = vmatmul.mubr.msk.f32.gmra.mrb[4].mxu0 %vm204_vm1, %v10219_v33 }
 0x1eb   : > { %8158 = vmatprep.mubr.msk.f32.mxu0 %vm204_vm1, %v10224_v34 }
 0x1ee   : > { %8159 = vmatmul.mubr.msk.f32.gmra.mrb[6].mxu0 %vm204_vm1, %v10234_v41 }
 0x1ef   : > { %8161 = vmatprep.mubr.msk.f32.mxu0 %vm204_vm1, %v10239_v43 }
 0x1f2   : > { %8162 = vmatmul.mubr.msk.f32.gmra.mrb[8].mxu0 %vm204_vm1, %v10249_v50 }
 0x1f3   : > { %8164 = vmatprep.mubr.msk.f32.mxu0 %vm204_vm1, %v10254_v51 }
 0x1f6   : > { %8165 = vmatmul.mubr.msk.f32.gmra.mrb[10].mxu0 %vm204_vm1, %v10264_v0 }
 0x1f7   : > { %8167 = vmatprep.mubr.msk.f32.mxu0 %vm204_vm1, %v10269_v30 }
 0x1fa   : > { %8168 = vmatmul.mubr.msk.f32.gmra.mrb[12].mxu0 %vm204_vm1, %v10279_v36 }
 0x1fb   : > { %8170 = vmatprep.mubr.msk.f32.mxu0 %vm204_vm1, %v10284_v32 }
 0x1fe   : > { %8171 = vmatmul.mubr.msk.f32.gmra.mrb[14].mxu0 %vm204_vm1, %v10294_v1 }
 0x1ff   : > { %8173 = vmatprep.mubr.msk.f32.mxu0 %vm204_vm1, %v10299_v60 }
 0x202   : > { %8174 = vmatmul.mubr.msk.f32.gmra.mrb[16].mxu0 %vm204_vm1, %v10309_v55 }
 0x203   : > { %8176 = vmatprep.mubr.msk.f32.mxu0 %vm204_vm1, %v10314_v54 }
 0x206   : > { %8177 = vmatmul.mubr.msk.f32.gmra.mrb[18].mxu0 %vm204_vm1, %v10324_v25 }
 0x207   : > { %8179 = vmatprep.mubr.msk.f32.mxu0 %vm204_vm1, %v10329_v24 }
 0x20a   : > { %8180 = vmatmul.mubr.msk.f32.gmra.mrb[20].mxu0 %vm204_vm1, %v10339_v21 }
 0x20b   : > { %8182 = vmatprep.mubr.msk.f32.mxu0 %vm204_vm1, %v10344_v38 }
 0x20e   : > { %8183 = vmatmul.mubr.msk.f32.gmra.mrb[22].mxu0 %vm204_vm1, %v10354_v42 }
 0x20f   : > { %8185 = vmatprep.mubr.msk.f32.mxu0 %vm204_vm1, %v10359_v44 }
 0x212   : > { %8186 = vmatmul.mubr.msk.f32.gmra.mrb[24].mxu0 %vm204_vm1, %v10369_v45 }
 0x213   : > { %8188 = vmatprep.mubr.msk.f32.mxu0 %vm204_vm1, %v10374_v46 }
 0x216   : > { %8189 = vmatmul.mubr.msk.f32.gmra.mrb[26].mxu0 %vm204_vm1, %v10384_v47 }
 0x217   : > { %8191 = vmatprep.mubr.msk.f32.mxu0 %vm204_vm1, %v10389_v48 }
 0x21a   : > { %8192 = vmatmul.mubr.msk.f32.gmra.mrb[28].mxu0 %vm204_vm1, %v10398_v62 }
 0x21b   : > { %8194 = vmatprep.mubr.msk.f32.mxu0 %vm204_vm1, %v475_v56 }
 0x21e   : > { %8195 = vmatmul.mubr.msk.f32.gmra.mrb[30].mxu0 %vm204_vm1, %v530_v39 }
 0x21f   : > { %8199 = vmatprep.mubr.msk.f32.mxu0 %vm204_vm1, %v10192_v29 }
 0x222   : > { %8200 = vmatmul.mubr.msk.f32.vlgmr.msra.gmra.mrb[0].mxu0 %vm204_vm1, %v10204_v52 }
 0x223   : > { %8202 = vmatprep.mubr.msk.f32.mxu0 %vm204_vm1, %v10209_v22 }
 0x226   : > { %8203 = vmatmul.mubr.msk.f32.gmra.mrb[2].mxu0 %vm204_vm1, %v10219_v33 }
 0x227   : > { %8205 = vmatprep.mubr.msk.f32.mxu0 %vm204_vm1, %v10224_v34 }
 0x22a   : > { %8206 = vmatmul.mubr.msk.f32.gmra.mrb[4].mxu0 %vm204_vm1, %v10234_v41 }
 0x22b   : > { %8208 = vmatprep.mubr.msk.f32.mxu0 %vm204_vm1, %v10239_v43 }
 0x22e   : > { %8209 = vmatmul.mubr.msk.f32.gmra.mrb[6].mxu0 %vm204_vm1, %v10249_v50 }
 0x22f   : > { %8211 = vmatprep.mubr.msk.f32.mxu0 %vm204_vm1, %v10254_v51 }
 0x232   : > { %8212 = vmatmul.mubr.msk.f32.gmra.mrb[8].mxu0 %vm204_vm1, %v10264_v0 }
 0x233   : > { %8214 = vmatprep.mubr.msk.f32.mxu0 %vm204_vm1, %v10269_v30 }
 0x236   : > { %8215 = vmatmul.mubr.msk.f32.gmra.mrb[10].mxu0 %vm204_vm1, %v10279_v36 }
 0x237   : > { %8217 = vmatprep.mubr.msk.f32.mxu0 %vm204_vm1, %v10284_v32 }
 0x23a   : > { %8218 = vmatmul.mubr.msk.f32.gmra.mrb[12].mxu0 %vm204_vm1, %v10294_v1 }
 0x23b   : > { %8220 = vmatprep.mubr.msk.f32.mxu0 %vm204_vm1, %v10299_v60 }
 0x23e   : > { %8221 = vmatmul.mubr.msk.f32.gmra.mrb[14].mxu0 %vm204_vm1, %v10309_v55 }
 0x23f   : > { %8223 = vmatprep.mubr.msk.f32.mxu0 %vm204_vm1, %v10314_v54 }
 0x242   : > { %8224 = vmatmul.mubr.msk.f32.gmra.mrb[16].mxu0 %vm204_vm1, %v10324_v25 }
 0x243   : > { %8226 = vmatprep.mubr.msk.f32.mxu0 %vm204_vm1, %v10329_v24 }
 0x246   : > { %8227 = vmatmul.mubr.msk.f32.gmra.mrb[18].mxu0 %vm204_vm1, %v10339_v21 }
 0x247   : > { %8229 = vmatprep.mubr.msk.f32.mxu0 %vm204_vm1, %v10344_v38 }
 0x24a   : > { %8230 = vmatmul.mubr.msk.f32.gmra.mrb[20].mxu0 %vm204_vm1, %v10354_v42 }
 0x24b   : > { %8232 = vmatprep.mubr.msk.f32.mxu0 %vm204_vm1, %v10359_v44 }
 0x24e   : > { %8233 = vmatmul.mubr.msk.f32.gmra.mrb[22].mxu0 %vm204_vm1, %v10369_v45 }
 0x24f   : > { %8235 = vmatprep.mubr.msk.f32.mxu0 %vm204_vm1, %v10374_v46 }
 0x252   : > { %8236 = vmatmul.mubr.msk.f32.gmra.mrb[24].mxu0 %vm204_vm1, %v10384_v47 }
 0x253   : > { %8238 = vmatprep.mubr.msk.f32.mxu0 %vm204_vm1, %v10389_v48 }
 0x256   : > { %8239 = vmatmul.mubr.msk.f32.gmra.mrb[26].mxu0 %vm204_vm1, %v10398_v62 }
 0x257   : > { %8241 = vmatprep.mubr.msk.f32.mxu0 %vm204_vm1, %v475_v56 }
 0x25a   : > { %8242 = vmatmul.mubr.msk.f32.gmra.mrb[28].mxu0 %vm204_vm1, %v530_v39 }
 0x25b   : > { %8244 = vmatprep.mubr.msk.f32.mxu0 %vm204_vm1, %v477_v16 }
 0x25e   : > { %8245 = vmatmul.mubr.msk.f32.gmra.mrb[30].mxu0 %vm204_vm1, %v531_v59 }
 0x2f5   : > { %v10550_v13 = vpop.f32.mrb[0].mxu0 }
 0x2f6   : > { %v3079_v37 = vsel %vm204_vm1, %v10550_v13, 0.0  ;;  %v3149_v19 = vmul.f32 %v10550_v13, %v10550_v13  ;;  %v10558_v20 = vpop.f32.mrb[1].mxu0 }
 0x2f7   : > { %v3078_v29 = vsel %vm204_vm1, %v10558_v20, 0.0  ;;  %v3148_v52 = vmul.f32 %v10558_v20, %v10558_v20 }
 0x2f8   : > { %v3181_v22 = vsel %vm204_vm1, %v3149_v19, 0.0  ;;  %v3080_v33 = vadd.f32 %v3079_v37, %v3078_v29 }
 0x2f9   : > { %v3180_v34 = vsel %vm204_vm1, %v3148_v52, 0.0  ;;  %v10566_v41 = vpop.f32.mrb[2].mxu0 }
 0x2fa   : > { %v3182_v43 = vadd.f32 %v3181_v22, %v3180_v34  ;;  %v10568_v50 = vpop.f32.mrb[3].mxu0  ;;  %v3151_v51 = vmul.f32 %v10566_v41, %v10566_v41  ;;  %v3083_v35 = vsel %vm204_vm1, %v10566_v41, 0.0 }
 0x2fb   : > { %v3081_v0 = vsel %vm204_vm1, %v10568_v50, 0.0  ;;  %v3150_v30 = vmul.f32 %v10568_v50, %v10568_v50 }
 0x2fc   : > { %v3082_v36 = vadd.f32 %v3081_v0, %v3080_v33  ;;  %v3185_v60 = vsel %vm204_vm1, %v3151_v51, 0.0 }
 0x2fd   : > { %v3183_v32 = vsel %vm204_vm1, %v3150_v30, 0.0  ;;  %v10579_v40 = vpop.f32.mrb[4].mxu0 }
 0x2fe   : > { %v3184_v49 = vadd.f32 %v3183_v32, %v3182_v43  ;;  %v10581_v1 = vpop.f32.mrb[5].mxu0  ;;  %v3084_v63 = vadd.f32 %v3083_v35, %v3082_v36  ;;  %v3153_v17 = vmul.f32 %v10579_v40, %v10579_v40  ;;  %v3087_v58 = vsel %vm204_vm1, %v10579_v40, 0.0 }
 0x2ff   : > { %v3085_v8 = vsel %vm204_vm1, %v10581_v1, 0.0  ;;  %v3152_v55 = vmul.f32 %v10581_v1, %v10581_v1 }
 0x300   : > { %v3086_v26 = vadd.f32 %v3085_v8, %v3084_v63  ;;  %v3186_v54 = vadd.f32 %v3185_v60, %v3184_v49  ;;  %v3189_v14 = vsel %vm204_vm1, %v3153_v17, 0.0 }
 0x301   : > { %v3187_v27 = vsel %vm204_vm1, %v3152_v55, 0.0  ;;  %v10593_v25 = vpop.f32.mrb[6].mxu0 }
 0x302   : > { %v3188_v28 = vadd.f32 %v3187_v27, %v3186_v54  ;;  %v10595_v24 = vpop.f32.mrb[7].mxu0  ;;  %v3088_v18 = vadd.f32 %v3087_v58, %v3086_v26  ;;  %v3155_v21 = vmul.f32 %v10593_v25, %v10593_v25  ;;  %v3091_v42 = vsel %vm204_vm1, %v10593_v25, 0.0 }
 0x303   : > { %v3089_v10 = vsel %vm204_vm1, %v10595_v24, 0.0  ;;  %v3154_v38 = vmul.f32 %v10595_v24, %v10595_v24 }
 0x304   : > { %v3090_v6 = vadd.f32 %v3089_v10, %v3088_v18  ;;  %v3190_v2 = vadd.f32 %v3189_v14, %v3188_v28  ;;  %v3193_v23 = vsel %vm204_vm1, %v3155_v21, 0.0 }
 0x305   : > { %v3191_v9 = vsel %vm204_vm1, %v3154_v38, 0.0  ;;  %v10607_v44 = vpop.f32.mrb[8].mxu0 }
 0x306   : > { %v3192_v5 = vadd.f32 %v3191_v9, %v3190_v2  ;;  %v10609_v31 = vpop.f32.mrb[9].mxu0  ;;  %v3092_v45 = vadd.f32 %v3091_v42, %v3090_v6  ;;  %v3157_v46 = vmul.f32 %v10607_v44, %v10607_v44  ;;  %v3095_v48 = vsel %vm204_vm1, %v10607_v44, 0.0 }
 0x307   : > { %v3093_v15 = vsel %vm204_vm1, %v10609_v31, 0.0  ;;  %v3156_v11 = vmul.f32 %v10609_v31, %v10609_v31 }
 0x308   : > { %v3094_v47 = vadd.f32 %v3093_v15, %v3092_v45  ;;  %v3194_v57 = vadd.f32 %v3193_v23, %v3192_v5  ;;  %v3197_v39 = vsel %vm204_vm1, %v3157_v46, 0.0 }
 0x309   : > { %v3195_v61 = vsel %vm204_vm1, %v3156_v11, 0.0  ;;  %v10621_v62 = vpop.f32.mrb[10].mxu0 }
 0x30a   : > { %v3196_v12 = vadd.f32 %v3195_v61, %v3194_v57  ;;  %v10623_v53 = vpop.f32.mrb[11].mxu0  ;;  %v3096_v56 = vadd.f32 %v3095_v48, %v3094_v47  ;;  %v3159_v3 = vmul.f32 %v10621_v62, %v10621_v62  ;;  %v3099_v19 = vsel %vm204_vm1, %v10621_v62, 0.0 }
 0x30b   : > { %v3097_v16 = vsel %vm204_vm1, %v10623_v53, 0.0  ;;  %v3158_v59 = vmul.f32 %v10623_v53, %v10623_v53 }
 0x30c   : > { %v3098_v4 = vadd.f32 %v3097_v16, %v3096_v56  ;;  %v3198_v37 = vadd.f32 %v3197_v39, %v3196_v12  ;;  %v3201_v43 = vsel %vm204_vm1, %v3159_v3, 0.0 }
 0x30d   : > { %v3199_v29 = vsel %vm204_vm1, %v3158_v59, 0.0  ;;  %v10635_v52 = vpop.f32.mrb[12].mxu0 }
 0x30e   : > { %v3200_v22 = vadd.f32 %v3199_v29, %v3198_v37  ;;  %v10637_v33 = vpop.f32.mrb[13].mxu0  ;;  %v3100_v34 = vadd.f32 %v3099_v19, %v3098_v4  ;;  %v3161_v51 = vmul.f32 %v10635_v52, %v10635_v52  ;;  %v3103_v32 = vsel %vm204_vm1, %v10635_v52, 0.0 }
 0x30f   : > { %v3101_v0 = vsel %vm204_vm1, %v10637_v33, 0.0  ;;  %v3160_v30 = vmul.f32 %v10637_v33, %v10637_v33 }
 0x310   : > { %v3102_v36 = vadd.f32 %v3101_v0, %v3100_v34  ;;  %v3202_v35 = vadd.f32 %v3201_v43, %v3200_v22  ;;  %v3205_v55 = vsel %vm204_vm1, %v3161_v51, 0.0 }
 0x311   : > { %v3203_v49 = vsel %vm204_vm1, %v3160_v30, 0.0  ;;  %v10649_v63 = vpop.f32.mrb[14].mxu0 }
 0x312   : > { %v3204_v60 = vadd.f32 %v3203_v49, %v3202_v35  ;;  %v10651_v17 = vpop.f32.mrb[15].mxu0  ;;  %v3104_v8 = vadd.f32 %v3103_v32, %v3102_v36  ;;  %v3163_v26 = vmul.f32 %v10649_v63, %v10649_v63  ;;  %v3107_v18 = vsel %vm204_vm1, %v10649_v63, 0.0 }
 0x313   : > { %v3105_v54 = vsel %vm204_vm1, %v10651_v17, 0.0  ;;  %v3162_v58 = vmul.f32 %v10651_v17, %v10651_v17 }
 0x314   : > { %v3106_v27 = vadd.f32 %v3105_v54, %v3104_v8  ;;  %v3206_v28 = vadd.f32 %v3205_v55, %v3204_v60  ;;  %v3209_v2 = vsel %vm204_vm1, %v3163_v26, 0.0 }
 0x315   : > { %v3207_v14 = vsel %vm204_vm1, %v3162_v58, 0.0  ;;  %v10663_v21 = vpop.f32.mrb[16].mxu0 }
 0x316   : > { %v3208_v10 = vadd.f32 %v3207_v14, %v3206_v28  ;;  %v10665_v38 = vpop.f32.mrb[17].mxu0  ;;  %v3108_v6 = vadd.f32 %v3107_v18, %v3106_v27  ;;  %v3165_v42 = vmul.f32 %v10663_v21, %v10663_v21  ;;  %v3111_v46 = vsel %vm204_vm1, %v10663_v21, 0.0 }
 0x317   : > { %v3109_v9 = vsel %vm204_vm1, %v10665_v38, 0.0  ;;  %v3164_v5 = vmul.f32 %v10665_v38, %v10665_v38 }
 0x318   : > { %v3110_v45 = vadd.f32 %v3109_v9, %v3108_v6  ;;  %v3210_v23 = vadd.f32 %v3209_v2, %v3208_v10  ;;  %v3213_v61 = vsel %vm204_vm1, %v3165_v42, 0.0 }
 0x319   : > { %v3211_v15 = vsel %vm204_vm1, %v3164_v5, 0.0  ;;  %v10677_v11 = vpop.f32.mrb[18].mxu0 }
 0x31a   : > { %v3212_v47 = vadd.f32 %v3211_v15, %v3210_v23  ;;  %v10679_v57 = vpop.f32.mrb[19].mxu0  ;;  %v3112_v48 = vadd.f32 %v3111_v46, %v3110_v45  ;;  %v3167_v12 = vmul.f32 %v10677_v11, %v10677_v11  ;;  %v3115_v59 = vsel %vm204_vm1, %v10677_v11, 0.0 }
 0x31b   : > { %v3113_v56 = vsel %vm204_vm1, %v10679_v57, 0.0  ;;  %v3166_v39 = vmul.f32 %v10679_v57, %v10679_v57 }
 0x31c   : > { %v3114_v3 = vadd.f32 %v3113_v56, %v3112_v48  ;;  %v3214_v16 = vadd.f32 %v3213_v61, %v3212_v47  ;;  %v3217_v34 = vsel %vm204_vm1, %v3167_v12, 0.0 }
 0x31d   : > { %v3215_v4 = vsel %vm204_vm1, %v3166_v39, 0.0  ;;  %v10691_v37 = vpop.f32.mrb[20].mxu0 }
 0x31e   : > { %v3216_v19 = vadd.f32 %v3215_v4, %v3214_v16  ;;  %v10693_v29 = vpop.f32.mrb[21].mxu0  ;;  %v3116_v22 = vadd.f32 %v3115_v59, %v3114_v3  ;;  %v3169_v43 = vmul.f32 %v10691_v37, %v10691_v37  ;;  %v3119_v35 = vsel %vm204_vm1, %v10691_v37, 0.0 }
 0x31f   : > { %v3117_v51 = vsel %vm204_vm1, %v10693_v29, 0.0  ;;  %v3168_v0 = vmul.f32 %v10693_v29, %v10693_v29 }
 0x320   : > { %v3118_v30 = vadd.f32 %v3117_v51, %v3116_v22  ;;  %v3218_v36 = vadd.f32 %v3217_v34, %v3216_v19  ;;  %v3221_v26 = vsel %vm204_vm1, %v3169_v43, 0.0 }
 0x321   : > { %v3219_v32 = vsel %vm204_vm1, %v3168_v0, 0.0  ;;  %v10705_v49 = vpop.f32.mrb[22].mxu0 }
 0x322   : > { %v3220_v60 = vadd.f32 %v3219_v32, %v3218_v36  ;;  %v10707_v8 = vpop.f32.mrb[23].mxu0  ;;  %v3120_v55 = vadd.f32 %v3119_v35, %v3118_v30  ;;  %v3171_v54 = vmul.f32 %v10705_v49, %v10705_v49  ;;  %v3123_v14 = vsel %vm204_vm1, %v10705_v49, 0.0 }
 0x323   : > { %v3121_v58 = vsel %vm204_vm1, %v10707_v8, 0.0  ;;  %v3170_v27 = vmul.f32 %v10707_v8, %v10707_v8 }
 0x324   : > { %v3122_v28 = vadd.f32 %v3121_v58, %v3120_v55  ;;  %v3222_v18 = vadd.f32 %v3221_v26, %v3220_v60  ;;  %v3225_v5 = vsel %vm204_vm1, %v3171_v54, 0.0 }
 0x325   : > { %v3223_v10 = vsel %vm204_vm1, %v3170_v27, 0.0  ;;  %v10719_v6 = vpop.f32.mrb[24].mxu0 }
 0x326   : > { %v3224_v2 = vadd.f32 %v3223_v10, %v3222_v18  ;;  %v10721_v42 = vpop.f32.mrb[25].mxu0  ;;  %v3124_v9 = vadd.f32 %v3123_v14, %v3122_v28  ;;  %v3173_v45 = vmul.f32 %v10719_v6, %v10719_v6  ;;  %v3127_v48 = vsel %vm204_vm1, %v10719_v6, 0.0 }
 0x327   : > { %v3125_v23 = vsel %vm204_vm1, %v10721_v42, 0.0  ;;  %v3172_v46 = vmul.f32 %v10721_v42, %v10721_v42 }
 0x328   : > { %v3126_v15 = vadd.f32 %v3125_v23, %v3124_v9  ;;  %v3226_v47 = vadd.f32 %v3225_v5, %v3224_v2  ;;  %v3229_v16 = vsel %vm204_vm1, %v3173_v45, 0.0 }
 0x329   : > { %v3227_v61 = vsel %vm204_vm1, %v3172_v46, 0.0  ;;  %v10733_v12 = vpop.f32.mrb[26].mxu0 }
 0x32a   : > { %v3228_v56 = vadd.f32 %v3227_v61, %v3226_v47  ;;  %v10735_v39 = vpop.f32.mrb[27].mxu0  ;;  %v3128_v3 = vadd.f32 %v3127_v48, %v3126_v15  ;;  %v3175_v59 = vmul.f32 %v10733_v12, %v10733_v12  ;;  %v3131_v43 = vsel %vm204_vm1, %v10733_v12, 0.0 }
 0x32b   : > { %v3129_v4 = vsel %vm204_vm1, %v10735_v39, 0.0  ;;  %v3174_v19 = vmul.f32 %v10735_v39, %v10735_v39 }
 0x32c   : > { %v3130_v22 = vadd.f32 %v3129_v4, %v3128_v3  ;;  %v3230_v34 = vadd.f32 %v3229_v16, %v3228_v56  ;;  %v3233_v32 = vsel %vm204_vm1, %v3175_v59, 0.0 }
 0x32d   : > { %v3231_v51 = vsel %vm204_vm1, %v3174_v19, 0.0  ;;  %v10747_v0 = vpop.f32.mrb[28].mxu0 }
 0x32e   : > { %v3232_v30 = vadd.f32 %v3231_v51, %v3230_v34  ;;  %v10749_v36 = vpop.f32.mrb[29].mxu0  ;;  %v3132_v35 = vadd.f32 %v3131_v43, %v3130_v22  ;;  %v3177_v60 = vmul.f32 %v10747_v0, %v10747_v0  ;;  %v3135_v27 = vsel %vm204_vm1, %v10747_v0, 0.0 }
 0x32f   : > { %v3133_v55 = vsel %vm204_vm1, %v10749_v36, 0.0  ;;  %v3176_v26 = vmul.f32 %v10749_v36, %v10749_v36 }
 0x330   : > { %v3134_v54 = vadd.f32 %v3133_v55, %v3132_v35  ;;  %v3234_v58 = vadd.f32 %v3233_v32, %v3232_v30  ;;  %v3237_v9 = vsel %vm204_vm1, %v3177_v60, 0.0 }
 0x331   : > { %v3235_v28 = vsel %vm204_vm1, %v3176_v26, 0.0  ;;  %v10761_v18 = vpop.f32.mrb[30].mxu0 }
 0x332   : > { %v3236_v14 = vadd.f32 %v3235_v28, %v3234_v58  ;;  %v3037_v10 = vpop.f32.mrb[31].mxu0  ;;  %v3136_v2 = vadd.f32 %v3135_v27, %v3134_v54  ;;  %v3179_v5 = vmul.f32 %v10761_v18, %v10761_v18  ;;  %v3139_v47 = vsel %vm204_vm1, %v10761_v18, 0.0 }
 0x333   : > { %v3137_v45 = vsel %vm204_vm1, %v3037_v10, 0.0  ;;  %v3178_v23 = vmul.f32 %v3037_v10, %v3037_v10 }
 0x334   : > { %v3138_v46 = vadd.f32 %v3137_v45, %v3136_v2  ;;  %v3238_v15 = vadd.f32 %v3237_v9, %v3236_v14  ;;  %v3241_v3 = vsel %vm204_vm1, %v3179_v5, 0.0 }
 0x335   : > { %v3239_v48 = vsel %vm204_vm1, %v3178_v23, 0.0 }
 0x336   : > { %v3140_v61 = vadd.f32 %v3139_v47, %v3138_v46  ;;  %v3240_v56 = vadd.f32 %v3239_v48, %v3238_v15 }
 0x338   : > { %v3141_v16 = vrot.slane %v3140_v61, 4  ;;  %v3242_v59 = vadd.f32 %v3241_v3, %v3240_v56 }
 0x33a   : > { %v3142_v4 = vadd.f32 %v3141_v16, %v3140_v61  ;;  %v3243_v19 = vrot.slane %v3242_v59, 4 }
 0x33c   : > { %v3143_v22 = vrot.slane %v3142_v4, 2  ;;  %v3244_v34 = vadd.f32 %v3243_v19, %v3242_v59 }
 0x33e   : > { %v3144_v43 = vadd.f32 %v3143_v22, %v3142_v4  ;;  %v3245_v51 = vrot.slane %v3244_v34, 2 }
 0x340   : > { %v3145_v30 = vrot.slane %v3144_v43, 1  ;;  %v3246_v35 = vadd.f32 %v3245_v51, %v3244_v34 }
 0x342   : > { %v3146_v32 = vadd.f32 %v3145_v30, %v3144_v43  ;;  %v3247_v60 = vrot.slane %v3246_v35, 1 }
 0x344   : > { %v3147_v55 = vmul.f32 0.00390625, %v3146_v32  ;;  %v3248_v26 = vadd.f32 %v3247_v60, %v3246_v35 }
 0x346   : > { %v3249_v54 = vmul.f32 0.00390625, %v3248_v26  ;;  %v3250_v58 = vmul.f32 %v3147_v55, %v3147_v55 }
 0x348   : > { %v3251_v27 = vsub.f32 %v3249_v54, %v3250_v58 }
 0x34a   : > { %v3252_v28 = vadd.f32 1e-05, %v3251_v27 }
 0x34c   : > { %9217 = vrsqrt.f32 %v3252_v28 }
 0x356   : > { %v9218_v14 = vpop.eup %9217 }
 0x357   : > { %v3284_v2 = vmul.f32 %v9218_v14, %v3037_v10  ;;  %v10771_v9 = vmul.f32 %v9218_v14, %v3147_v55  ;;  %v10774_v5 = vmul.f32 %v9218_v14, %v10558_v20  ;;  %v10777_v45 = vmul.f32 %v9218_v14, %v10550_v13 }
 0x358   : > { %v10780_v23 = vmul.f32 %v9218_v14, %v10568_v50  ;;  %v10783_v46 = vmul.f32 %v9218_v14, %v10566_v41  ;;  %v10786_v15 = vmul.f32 %v9218_v14, %v10581_v1  ;;  %v10789_v47 = vmul.f32 %v9218_v14, %v10579_v40 }
 0x359   : > { %v3317_v10 = vsub.f32 %v3284_v2, %v10771_v9  ;;  %v10793_v20 = vmul.f32 %v9218_v14, %v10595_v24  ;;  %v10796_v13 = vmul.f32 %v9218_v14, %v10593_v25  ;;  %v10799_v50 = vmul.f32 %v9218_v14, %v10609_v31 }
 0x35a   : > { %v10802_v41 = vmul.f32 %v9218_v14, %v10607_v44  ;;  %v10805_v1 = vmul.f32 %v9218_v14, %v10623_v53  ;;  %v10808_v40 = vmul.f32 %v9218_v14, %v10621_v62  ;;  %v10811_v48 = vmul.f32 %v9218_v14, %v10637_v33 }
 0x35b   : > { %v3349_v24 = vmax.f32 %v3317_v10, 0.0  ;;  %v10814_v61 = vmul.f32 %v9218_v14, %v10635_v52  ;;  %v10817_v25 = vmul.f32 %v9218_v14, %v10651_v17  ;;  %v10820_v31 = vmul.f32 %v9218_v14, %v10649_v63 }
 0x35c   : > { %v10823_v44 = vmul.f32 %v9218_v14, %v10665_v38  ;;  %v10826_v53 = vmul.f32 %v9218_v14, %v10663_v21  ;;  %v10829_v62 = vmul.f32 %v9218_v14, %v10679_v57  ;;  %v10832_v33 = vmul.f32 %v9218_v14, %v10677_v11 }
 0x35d   : > { %3381 = vst.msk [vmem:[#allocation2 + $0x100] sm:$0xff] %vm204_vm1, %v3349_v24  ;;  %v10836_v52 = vmul.f32 %v9218_v14, %v10693_v29  ;;  %v10839_v63 = vmul.f32 %v9218_v14, %v10691_v37  ;;  %v10842_v17 = vmul.f32 %v9218_v14, %v10707_v8  ;;  %v10845_v21 = vmul.f32 %v9218_v14, %v10705_v49 }
 0x35e   : > { %v10848_v38 = vmul.f32 %v9218_v14, %v10721_v42  ;;  %v10851_v11 = vmul.f32 %v9218_v14, %v10719_v6  ;;  %v10854_v57 = vmul.f32 %v9218_v14, %v10735_v39  ;;  %v10857_v29 = vmul.f32 %v9218_v14, %v10733_v12 }
 0x35f   : > { %v10860_v37 = vmul.f32 %v9218_v14, %v10749_v36  ;;  %v10863_v8 = vmul.f32 %v9218_v14, %v10747_v0  ;;  %v10866_v49 = vmul.f32 %v9218_v14, %v10761_v18  ;;  %v3287_v42 = vsub.f32 %v10774_v5, %v10771_v9 }
 0x360   : > { %v3288_v6 = vsub.f32 %v10777_v45, %v10771_v9  ;;  %v3289_v39 = vsub.f32 %v10780_v23, %v10771_v9  ;;  %v3290_v12 = vsub.f32 %v10783_v46, %v10771_v9  ;;  %v3291_v36 = vsub.f32 %v10786_v15, %v10771_v9 }
 0x361   : > { %v3292_v0 = vsub.f32 %v10789_v47, %v10771_v9  ;;  %v3293_v18 = vsub.f32 %v10793_v20, %v10771_v9  ;;  %v3294_v56 = vsub.f32 %v10796_v13, %v10771_v9  ;;  %v3295_v3 = vsub.f32 %v10799_v50, %v10771_v9 }
 0x362   : > { %v3296_v16 = vsub.f32 %v10802_v41, %v10771_v9  ;;  %v3297_v59 = vsub.f32 %v10805_v1, %v10771_v9  ;;  %v3298_v4 = vsub.f32 %v10808_v40, %v10771_v9  ;;  %v3299_v19 = vsub.f32 %v10811_v48, %v10771_v9 }
 0x363   : > { %v3300_v22 = vsub.f32 %v10814_v61, %v10771_v9  ;;  %v3301_v34 = vsub.f32 %v10817_v25, %v10771_v9  ;;  %v3302_v43 = vsub.f32 %v10820_v31, %v10771_v9  ;;  %v3303_v51 = vsub.f32 %v10823_v44, %v10771_v9 }
 0x364   : > { %v3304_v30 = vsub.f32 %v10826_v53, %v10771_v9  ;;  %v3305_v35 = vsub.f32 %v10829_v62, %v10771_v9  ;;  %v3306_v32 = vsub.f32 %v10832_v33, %v10771_v9  ;;  %v3307_v60 = vsub.f32 %v10836_v52, %v10771_v9 }
 0x365   : > { %v3308_v55 = vsub.f32 %v10839_v63, %v10771_v9  ;;  %v3309_v26 = vsub.f32 %v10842_v17, %v10771_v9  ;;  %v3310_v54 = vsub.f32 %v10845_v21, %v10771_v9  ;;  %v3311_v58 = vsub.f32 %v10848_v38, %v10771_v9 }
 0x366   : > { %v3312_v27 = vsub.f32 %v10851_v11, %v10771_v9  ;;  %v3313_v28 = vsub.f32 %v10854_v57, %v10771_v9  ;;  %v3314_v14 = vsub.f32 %v10857_v29, %v10771_v9  ;;  %v3315_v2 = vsub.f32 %v10860_v37, %v10771_v9 }
 0x367   : > { %v3316_v5 = vsub.f32 %v10863_v8, %v10771_v9  ;;  %v3318_v45 = vsub.f32 %v10866_v49, %v10771_v9  ;;  %v3319_v23 = vmax.f32 %v3287_v42, 0.0  ;;  %v3320_v46 = vmax.f32 %v3288_v6, 0.0 }
 0x368   : > { %v3321_v15 = vmax.f32 %v3289_v39, 0.0  ;;  %v3322_v47 = vmax.f32 %v3290_v12, 0.0  ;;  %v3323_v10 = vmax.f32 %v3291_v36, 0.0  ;;  %v3324_v20 = vmax.f32 %v3292_v0, 0.0 }
 0x369   : > { %v3325_v13 = vmax.f32 %v3293_v18, 0.0  ;;  %v3326_v50 = vmax.f32 %v3294_v56, 0.0  ;;  %v3327_v41 = vmax.f32 %v3295_v3, 0.0  ;;  %v3328_v1 = vmax.f32 %v3296_v16, 0.0  ;;  %3351 = vst.msk [vmem:[#allocation2 + $0x10] sm:$0xff] %vm204_vm1, %v3319_v23  ;;  %3352 = vst.msk [vmem:[#allocation2 + $0x18] sm:$0xff] %vm204_vm1, %v3320_v46 }
 0x36a   : > { %v3329_v40 = vmax.f32 %v3297_v59, 0.0  ;;  %v3330_v48 = vmax.f32 %v3298_v4, 0.0  ;;  %v3331_v24 = vmax.f32 %v3299_v19, 0.0  ;;  %v3332_v61 = vmax.f32 %v3300_v22, 0.0  ;;  %3353 = vst.msk [vmem:[#allocation2 + $0x20] sm:$0xff] %vm204_vm1, %v3321_v15  ;;  %3354 = vst.msk [vmem:[#allocation2 + $0x28] sm:$0xff] %vm204_vm1, %v3322_v47 }
 0x36b   : > { %3355 = vst.msk [vmem:[#allocation2 + $0x30] sm:$0xff] %vm204_vm1, %v3323_v10  ;;  %3356 = vst.msk [vmem:[#allocation2 + $0x38] sm:$0xff] %vm204_vm1, %v3324_v20  ;;  %v3333_v9 = vmax.f32 %v3301_v34, 0.0  ;;  %v3334_v25 = vmax.f32 %v3302_v43, 0.0  ;;  %v3335_v31 = vmax.f32 %v3303_v51, 0.0  ;;  %v3336_v44 = vmax.f32 %v3304_v30, 0.0 }
 0x36c   : > { %3383 = vst.msk [vmem:[#allocation2] sm:$0xff] %vm204_vm1, %v3321_v15  ;;  %3384 = vst.msk [vmem:[#allocation2 + $0x8] sm:$0xff] %vm204_vm1, %v3322_v47  ;;  %v3337_v53 = vmax.f32 %v3305_v35, 0.0  ;;  %v3338_v62 = vmax.f32 %v3306_v32, 0.0  ;;  %v3339_v33 = vmax.f32 %v3307_v60, 0.0  ;;  %v3340_v52 = vmax.f32 %v3308_v55, 0.0 }
 0x36d   : > { %3357 = vst.msk [vmem:[#allocation2 + $0x40] sm:$0xff] %vm204_vm1, %v3325_v13  ;;  %3358 = vst.msk [vmem:[#allocation2 + $0x48] sm:$0xff] %vm204_vm1, %v3326_v50  ;;  %v3341_v63 = vmax.f32 %v3309_v26, 0.0  ;;  %v3342_v17 = vmax.f32 %v3310_v54, 0.0  ;;  %v3343_v21 = vmax.f32 %v3311_v58, 0.0  ;;  %v3344_v38 = vmax.f32 %v3312_v27, 0.0 }
 0x36e   : > { %3359 = vst.msk [vmem:[#allocation2 + $0x50] sm:$0xff] %vm204_vm1, %v3327_v41  ;;  %3360 = vst.msk [vmem:[#allocation2 + $0x58] sm:$0xff] %vm204_vm1, %v3328_v1  ;;  %v3345_v11 = vmax.f32 %v3313_v28, 0.0  ;;  %v3346_v57 = vmax.f32 %v3314_v14, 0.0  ;;  %v3347_v29 = vmax.f32 %v3315_v2, 0.0  ;;  %v3348_v37 = vmax.f32 %v3316_v5, 0.0 }
 0x36f   : > { %3361 = vst.msk [vmem:[#allocation2 + $0x60] sm:$0xff] %vm204_vm1, %v3329_v40  ;;  %3362 = vst.msk [vmem:[#allocation2 + $0x68] sm:$0xff] %vm204_vm1, %v3330_v48  ;;  %v3350_v8 = vmax.f32 %v3318_v45, 0.0  ;;  %v10996_v19 = vld [vmem:[%s12552_s2 + $0x18] sm:$0xf] }
 0x370   : > { %3363 = vst.msk [vmem:[#allocation2 + $0x70] sm:$0xff] %vm204_vm1, %v3331_v24  ;;  %3364 = vst.msk [vmem:[#allocation2 + $0x78] sm:$0xff] %vm204_vm1, %v3332_v61  ;;  %v10964_v49 = vld [vmem:[#allocation2 + $0x10] sm:$0xff]  ;;  %v10966_v42 = vld [vmem:[#allocation2 + $0x18] sm:$0xff] }
 0x371   : > { %3365 = vst.msk [vmem:[#allocation2 + $0x80] sm:$0xff] %vm204_vm1, %v3333_v9  ;;  %3366 = vst.msk [vmem:[#allocation2 + $0x88] sm:$0xff] %vm204_vm1, %v3334_v25  ;;  %v12661_v6 = vrot.slane %v10964_v49, 1  ;;  %v3498_v39 = vrot.slane %v10964_v49, 7  ;;  %v12660_v12 = vrot.slane %v10966_v42, 7  ;;  %v10972_v36 = vld [vmem:[#allocation2 + $0x20] sm:$0xff] }
 0x372   : > { %3367 = vst.msk [vmem:[#allocation2 + $0x90] sm:$0xff] %vm204_vm1, %v3335_v31  ;;  %3368 = vst.msk [vmem:[#allocation2 + $0x98] sm:$0xff] %vm204_vm1, %v3336_v44  ;;  %v10974_v0 = vld [vmem:[#allocation2 + $0x28] sm:$0xff]  ;;  %v12658_v18 = vrot.slane %v10972_v36, 1  ;;  %v3501_v56 = vrot.slane %v10972_v36, 7  ;;  %v10978_v3 = vld [vmem:[#allocation2 + $0x30] sm:$0xff] }
 0x373   : > { %3369 = vst.msk [vmem:[#allocation2 + $0xa0] sm:$0xff] %vm204_vm1, %v3337_v53  ;;  %3370 = vst.msk [vmem:[#allocation2 + $0xa8] sm:$0xff] %vm204_vm1, %v3338_v62  ;;  %v10983_v16 = vsel %vm350_vm2, %v12661_v6, %v3498_v39  ;;  %v10988_v59 = vsel %vm350_vm2, %v3498_v39, %v12660_v12  ;;  %v12656_v4 = vrot.slane %v10974_v0, 7  ;;  %v12655_v34 = vrot.slane %v10978_v3, 1  ;;  %v11007_v51 = vld [vmem:[#allocation2 + $0x38] sm:$0xff] }
 0x374   : > { %3371 = vst.msk [vmem:[#allocation2 + $0xb0] sm:$0xff] %vm204_vm1, %v3339_v33  ;;  %3372 = vst.msk [vmem:[#allocation2 + $0xb8] sm:$0xff] %vm204_vm1, %v3340_v52  ;;  %8249 = vmatprep.mubr.msk.f32.mxu1 %vm204_vm1, %v10983_v16  ;;  %v11003_v22 = vsel %vm350_vm2, %v12658_v18, %v3501_v56  ;;  %v3504_v43 = vrot.slane %v10978_v3, 7  ;;  %v11013_v30 = vld [vmem:[#allocation2 + $0x40] sm:$0xff]  ;;  %v12654_v32 = vrot.slane %v11007_v51, 7  ;;  %v11032_v26 = vld [vmem:[#allocation2 + $0x48] sm:$0xff] }
 0x375   : > { %3373 = vst.msk [vmem:[#allocation2 + $0xc0] sm:$0xff] %vm204_vm1, %v3341_v63  ;;  %3374 = vst.msk [vmem:[#allocation2 + $0xc8] sm:$0xff] %vm204_vm1, %v3342_v17  ;;  %8250 = vmatmul.mubr.msk.f32.vlgmr.msra.gmra.mrb[0].mxu1 %vm204_vm1, %v10988_v59  ;;  %v11020_v35 = vsel %vm350_vm2, %v3501_v56, %v12656_v4  ;;  %v12652_v60 = vrot.slane %v11013_v30, 1  ;;  %v3507_v55 = vrot.slane %v11013_v30, 7  ;;  %v11036_v54 = vld [vmem:[#allocation2 + $0x50] sm:$0xff]  ;;  %v12650_v27 = vrot.slane %v11032_v26, 7 }
 0x376   : > { %3375 = vst.msk [vmem:[#allocation2 + $0xd0] sm:$0xff] %vm204_vm1, %v3343_v21  ;;  %3376 = vst.msk [vmem:[#allocation2 + $0xd8] sm:$0xff] %vm204_vm1, %v3344_v38  ;;  %8298 = vmatpush3.msk.msra.mxu1 %vm615_vm0, %v10548_v7  ;;  %8252 = vmatprep.mubr.msk.f32.mxu1 %vm204_vm1, %v11003_v22  ;;  %v11028_v7 = vsel %vm350_vm2, %v12655_v34, %v3504_v43  ;;  %v11041_v58 = vsel %vm350_vm2, %v3504_v43, %v12654_v32  ;;  %v12649_v14 = vrot.slane %v11036_v54, 1  ;;  %v11053_v5 = vld [vmem:[#allocation2 + $0x58] sm:$0xff]  ;;  %v11057_v45 = vld [vmem:[#allocation2 + $0x60] sm:$0xff] }
 0x377   : > { %3377 = vst.msk [vmem:[#allocation2 + $0xe0] sm:$0xff] %vm204_vm1, %v3345_v11  ;;  %3378 = vst.msk [vmem:[#allocation2 + $0xe8] sm:$0xff] %vm204_vm1, %v3346_v57  ;;  %8347 = vmatprep.subr.msk.mxu1 %vm615_vm0, %v10996_v19  ;;  %v11049_v28 = vsel %vm350_vm2, %v12652_v60, %v3507_v55  ;;  %v3510_v2 = vrot.slane %v11036_v54, 7  ;;  %v11062_v23 = vsel %vm350_vm2, %v3507_v55, %v12650_v27  ;;  %v12648_v46 = vrot.slane %v11053_v5, 7  ;;  %v11074_v20 = vld [vmem:[#allocation2 + $0x68] sm:$0xff]  ;;  %v11078_v13 = vld [vmem:[#allocation2 + $0x70] sm:$0xff] }
 0x378   : > { %3379 = vst.msk [vmem:[#allocation2 + $0xf0] sm:$0xff] %vm204_vm1, %v3347_v29  ;;  %3380 = vst.msk [vmem:[#allocation2 + $0xf8] sm:$0xff] %vm204_vm1, %v3348_v37  ;;  %v12646_v47 = vrot.slane %v11057_v45, 1  ;;  %v3513_v10 = vrot.slane %v11057_v45, 7  ;;  %v12644_v41 = vrot.slane %v11074_v20, 7  ;;  %v12643_v40 = vrot.slane %v11078_v13, 1 }
 0x379   : > { %3385 = vst.msk [vmem:[#allocation2 + $0x110] sm:$0xff] %vm204_vm1, %v3347_v29  ;;  %3386 = vst.msk [vmem:[#allocation2 + $0x118] sm:$0xff] %vm204_vm1, %v3348_v37  ;;  %8253 = vmatmul.mubr.msk.f32.gmra.mrb[2].mxu1 %vm204_vm1, %v11020_v35  ;;  %v11070_v15 = vsel %vm350_vm2, %v12649_v14, %v3510_v2  ;;  %v11083_v50 = vsel %vm350_vm2, %v3510_v2, %v12648_v46  ;;  %v3516_v48 = vrot.slane %v11078_v13, 7  ;;  %v11095_v24 = vld [vmem:[#allocation2 + $0x78] sm:$0xff]  ;;  %v11099_v61 = vld [vmem:[#allocation2 + $0x80] sm:$0xff] }
 0x37a   : > { %3382 = vst.msk [vmem:[#allocation2 + $0x108] sm:$0xff] %vm204_vm1, %v3350_v8  ;;  %8255 = vmatprep.mubr.msk.f32.mxu1 %vm204_vm1, %v11028_v7  ;;  %v11091_v1 = vsel %vm350_vm2, %v12646_v47, %v3513_v10  ;;  %v11104_v9 = vsel %vm350_vm2, %v3513_v10, %v12644_v41  ;;  %v12642_v25 = vrot.slane %v11095_v24, 7  ;;  %v12640_v44 = vrot.slane %v11099_v61, 1  ;;  %v11116_v62 = vld [vmem:[#allocation2 + $0x88] sm:$0xff]  ;;  %v11120_v33 = vld [vmem:[#allocation2 + $0x90] sm:$0xff]  ;;  %v11137_v11 = vld [vmem:[#allocation2 + $0x98] sm:$0xff] }
 0x37b   : > { %v11112_v31 = vsel %vm350_vm2, %v12643_v40, %v3516_v48  ;;  %v3519_v53 = vrot.slane %v11099_v61, 7  ;;  %v12638_v63 = vrot.slane %v11116_v62, 7  ;;  %v12637_v21 = vrot.slane %v11120_v33, 1  ;;  %v11141_v57 = vld [vmem:[#allocation2 + $0xa0] sm:$0xff]  ;;  %v11158_v43 = vld [vmem:[#allocation2 + $0xa8] sm:$0xff]  ;;  %v11162_v55 = vld [vmem:[#allocation2 + $0xb0] sm:$0xff] }
 0x37c   : > { %v11125_v52 = vsel %vm350_vm2, %v3516_v48, %v12642_v25  ;;  %v3522_v38 = vrot.slane %v11120_v33, 7  ;;  %v12639_v37 = vrot.slane %v11137_v11, 7  ;;  %v12641_v39 = vrot.slane %v11141_v57, 1  ;;  %12771 = vst [vmem:[#allocation35_spill] sm:$0xff] %v11162_v55  ;;  %v11200_v41 = vld [vmem:[#allocation2 + $0xc8] sm:$0xff] }
 0x37d   : > { %8256 = vmatmul.mubr.msk.f32.gmra.mrb[4].mxu1 %vm204_vm1, %v11041_v58  ;;  %v11133_v17 = vsel %vm350_vm2, %v12640_v44, %v3519_v53  ;;  %v11146_v29 = vsel %vm350_vm2, %v3519_v53, %v12638_v63  ;;  %v3525_v56 = vrot.slane %v11141_v57, 7  ;;  %v12645_v10 = vrot.slane %v11158_v43, 7  ;;  %v11179_v63 = vld [vmem:[#allocation2 + $0xb8] sm:$0xff]  ;;  %12774 = vst [vmem:[#allocation38_spill] sm:$0xff] %v11200_v41 }
 0x37e   : > { %8258 = vmatprep.mubr.msk.f32.mxu1 %vm204_vm1, %v11049_v28  ;;  %v11154_v8 = vsel %vm350_vm2, %v12637_v21, %v3522_v38  ;;  %v11167_v2 = vsel %vm350_vm2, %v3522_v38, %v12639_v37  ;;  %v12647_v53 = vrot.slane %v11162_v55, 1  ;;  %v3528_v21 = vrot.slane %v11162_v55, 7  ;;  %12772 = vst [vmem:[#allocation36_spill] sm:$0xff] %v11179_v63  ;;  %v11183_v38 = vld [vmem:[#allocation2 + $0xc0] sm:$0xff]  ;;  %v11221_v27 = vld [vmem:[#allocation2 + $0xd8] sm:$0xff]  ;;  %v11242_v4 = vld [vmem:[#allocation2 + $0xe8] sm:$0xff] }
 0x37f   : > { %v11175_v48 = vsel %vm350_vm2, %v12641_v39, %v3525_v56  ;;  %12773 = vst [vmem:[#allocation37_spill] sm:$0xff] %v11183_v38  ;;  %v11188_v37 = vsel %vm350_vm2, %v3525_v56, %v12645_v10  ;;  %v12651_v44 = vrot.slane %v11179_v63, 7  ;;  %v12653_v25 = vrot.slane %v11183_v38, 1  ;;  %v11204_v56 = vld [vmem:[#allocation2 + $0xd0] sm:$0xff]  ;;  %12776 = vst [vmem:[#allocation40_spill] sm:$0xff] %v11221_v27  ;;  %v11305_v55 = vld [vmem:[#allocation2 + $0x8] sm:$0xff] }
 0x380   : > { %v11196_v39 = vsel %vm350_vm2, %v12647_v53, %v3528_v21  ;;  %v3531_v40 = vrot.slane %v11183_v38, 7  ;;  %12775 = vst [vmem:[#allocation39_spill] sm:$0xff] %v11204_v56  ;;  %v12657_v47 = vrot.slane %v11200_v41, 7  ;;  %v12659_v46 = vrot.slane %v11204_v56, 1  ;;  %12778 = vst [vmem:[#allocation42_spill] sm:$0xff] %v11242_v4 }
 0x381   : > { %8259 = vmatmul.mubr.msk.f32.gmra.mrb[6].mxu1 %vm204_vm1, %v11062_v23  ;;  %v11209_v10 = vsel %vm350_vm2, %v3528_v21, %v12651_v44  ;;  %v3534_v14 = vrot.slane %v11204_v56, 7  ;;  %v11225_v21 = vld [vmem:[#allocation2 + $0xe0] sm:$0xff]  ;;  %v12664_v60 = vrot.slane %v11221_v27, 7  ;;  %v12674_v18 = vrot.slane %v11242_v4, 7  ;;  %v11263_v56 = vld [vmem:[#allocation2 + $0xf8] sm:$0xff]  ;;  %v11284_v38 = vld [vmem:[#allocation2 + $0x108] sm:$0xff] }
 0x382   : > { %8261 = vmatprep.mubr.msk.f32.mxu1 %vm204_vm1, %v11070_v15  ;;  %v11217_v53 = vsel %vm350_vm2, %v12653_v25, %v3531_v40  ;;  %12777 = vst [vmem:[#allocation41_spill] sm:$0xff] %v11225_v21  ;;  %v11230_v44 = vsel %vm350_vm2, %v3531_v40, %v12657_v47  ;;  %v12667_v32 = vrot.slane %v11225_v21, 1  ;;  %v3537_v34 = vrot.slane %v11225_v21, 7  ;;  %v11246_v40 = vld [vmem:[#allocation2 + $0xf0] sm:$0xff] }
 0x383   : > { %v11238_v25 = vsel %vm350_vm2, %v12659_v46, %v3534_v14  ;;  %12779 = vst [vmem:[#allocation43_spill] sm:$0xff] %v11246_v40  ;;  %v11251_v47 = vsel %vm350_vm2, %v3534_v14, %v12664_v60  ;;  %v12677_v12 = vrot.slane %v11246_v40, 1  ;;  %v3540_v6 = vrot.slane %v11246_v40, 7  ;;  %v11267_v14 = vld [vmem:[#allocation2 + $0x100] sm:$0xff] }
 0x384   : > { %v11259_v46 = vsel %vm350_vm2, %v12667_v32, %v3537_v34  ;;  %12780 = vst [vmem:[#allocation44_spill] sm:$0xff] %v11267_v14  ;;  %v11272_v60 = vsel %vm350_vm2, %v3537_v34, %v12674_v18  ;;  %v12684_v21 = vrot.slane %v11263_v56, 7  ;;  %v12685_v27 = vrot.slane %v11267_v14, 1  ;;  %v11288_v34 = vld [vmem:[#allocation2] sm:$0xff] }
 0x385   : > { %8262 = vmatmul.mubr.msk.f32.gmra.mrb[8].mxu1 %vm204_vm1, %v11083_v50  ;;  %v11280_v32 = vsel %vm350_vm2, %v12677_v12, %v3540_v6  ;;  %v3543_v41 = vrot.slane %v11267_v14, 7  ;;  %v3544_v40 = vrot.slane %v11284_v38, 7  ;;  %v3441_v4 = vrot.slane %v11288_v34, 1 }
 0x386   : > { %8264 = vmatprep.mubr.msk.f32.mxu1 %vm204_vm1, %v11091_v1  ;;  %v11293_v18 = vsel %vm350_vm2, %v3540_v6, %v12684_v21  ;;  %v3495_v63 = vrot.slane %v11288_v34, 7  ;;  %v3496_v21 = vrot.slane %v11305_v55, 7 }
 0x387   : > { %v11301_v12 = vsel %vm350_vm2, %v12685_v27, %v3543_v41  ;;  %v11312_v6 = vsel %vm350_vm2, %v3543_v41, %v3544_v40  ;;  %v6995_v41 = vld [vmem:[%s12552_s2 + $0x4] sm:$0xf] }
 0x388   : > { %v3567_v27 = vsel %vm350_vm2, %v3441_v4, %v3495_v63  ;;  %v3497_v14 = vsel %vm350_vm2, %v3495_v63, %v3496_v21 }
 0x389   : > { %8265 = vmatmul.mubr.msk.f32.gmra.mrb[10].mxu1 %vm204_vm1, %v11104_v9 }
 0x38a   : > { %8267 = vmatprep.mubr.msk.f32.mxu1 %vm204_vm1, %v11112_v31 }
 0x38d   : > { %8268 = vmatmul.mubr.msk.f32.gmra.mrb[12].mxu1 %vm204_vm1, %v11125_v52 }
 0x38e   : > { %8270 = vmatprep.mubr.msk.f32.mxu1 %vm204_vm1, %v11133_v17 }
 0x391   : > { %8271 = vmatmul.mubr.msk.f32.gmra.mrb[14].mxu1 %vm204_vm1, %v11146_v29 }
 0x392   : > { %8273 = vmatprep.mubr.msk.f32.mxu1 %vm204_vm1, %v11154_v8 }
 0x395   : > { %8274 = vmatmul.mubr.msk.f32.gmra.mrb[16].mxu1 %vm204_vm1, %v11167_v2 }
 0x396   : > { %8276 = vmatprep.mubr.msk.f32.mxu1 %vm204_vm1, %v11175_v48 }
 0x399   : > { %8277 = vmatmul.mubr.msk.f32.gmra.mrb[18].mxu1 %vm204_vm1, %v11188_v37 }
 0x39a   : > { %8279 = vmatprep.mubr.msk.f32.mxu1 %vm204_vm1, %v11196_v39 }
 0x39d   : > { %8280 = vmatmul.mubr.msk.f32.gmra.mrb[20].mxu1 %vm204_vm1, %v11209_v10 }
 0x39e   : > { %8282 = vmatprep.mubr.msk.f32.mxu1 %vm204_vm1, %v11217_v53 }
 0x3a1   : > { %8283 = vmatmul.mubr.msk.f32.gmra.mrb[22].mxu1 %vm204_vm1, %v11230_v44 }
 0x3a2   : > { %8285 = vmatprep.mubr.msk.f32.mxu1 %vm204_vm1, %v11238_v25 }
 0x3a5   : > { %8286 = vmatmul.mubr.msk.f32.gmra.mrb[24].mxu1 %vm204_vm1, %v11251_v47 }
 0x3a6   : > { %8288 = vmatprep.mubr.msk.f32.mxu1 %vm204_vm1, %v11259_v46 }
 0x3a9   : > { %8289 = vmatmul.mubr.msk.f32.gmra.mrb[26].mxu1 %vm204_vm1, %v11272_v60 }
 0x3aa   : > { %8291 = vmatprep.mubr.msk.f32.mxu1 %vm204_vm1, %v11280_v32 }
 0x3ad   : > { %8292 = vmatmul.mubr.msk.f32.gmra.mrb[28].mxu1 %vm204_vm1, %v11293_v18 }
 0x3ae   : > { %8294 = vmatprep.mubr.msk.f32.mxu1 %vm204_vm1, %v11301_v12 }
 0x3b1   : > { %8295 = vmatmul.mubr.msk.f32.gmra.mrb[30].mxu1 %vm204_vm1, %v11312_v6 }
 0x3b2   : > { %8299 = vmatprep.mubr.msk.f32.mxu1 %vm204_vm1, %v3567_v27  ;;  %v12783_v27 = vld [vmem:[#allocation37_spill] sm:$0xff] }
 0x3b5   : > { %8300 = vmatmul.mubr.msk.f32.vlgmr.msra.gmra.mrb[0].mxu1 %vm204_vm1, %v3497_v14  ;;  %v12797_v14 = vrot.slane %v11013_v30, 1 }
 0x3b6   : > { %8348 = vmatpush3.msk.msra.mxu1 %vm615_vm0, %v10996_v19  ;;  %8302 = vmatprep.mubr.msk.f32.mxu1 %vm204_vm1, %v10983_v16  ;;  %v7029_v16 = vld [vmem:[%s12552_s2 + $0x10] sm:$0xf] }
 0x3b7   : > { %8397 = vmatprep.subr.msk.mxu1 %vm615_vm0, %v6995_v41 }
 0x3b9   : > { %8303 = vmatmul.mubr.msk.f32.gmra.mrb[2].mxu1 %vm204_vm1, %v10988_v59  ;;  %v11450_v59 = vld [vmem:[#allocation2 + $0x110] sm:$0xff] }
 0x3ba   : > { %8305 = vmatprep.mubr.msk.f32.mxu1 %vm204_vm1, %v11003_v22  ;;  %v3458_v19 = vrot.slane %v11450_v59, 1 }
 0x3bd   : > { %8306 = vmatmul.mubr.msk.f32.gmra.mrb[4].mxu1 %vm204_vm1, %v11020_v35 }
 0x3be   : > { %8308 = vmatprep.mubr.msk.f32.mxu1 %vm204_vm1, %v11028_v7 }
 0x3c1   : > { %8309 = vmatmul.mubr.msk.f32.gmra.mrb[6].mxu1 %vm204_vm1, %v11041_v58 }
 0x3c2   : > { %8311 = vmatprep.mubr.msk.f32.mxu1 %vm204_vm1, %v11049_v28 }
 0x3c5   : > { %8312 = vmatmul.mubr.msk.f32.gmra.mrb[8].mxu1 %vm204_vm1, %v11062_v23 }
 0x3c6   : > { %8314 = vmatprep.mubr.msk.f32.mxu1 %vm204_vm1, %v11070_v15 }
 0x3c9   : > { %8315 = vmatmul.mubr.msk.f32.gmra.mrb[10].mxu1 %vm204_vm1, %v11083_v50 }
 0x3ca   : > { %8317 = vmatprep.mubr.msk.f32.mxu1 %vm204_vm1, %v11091_v1 }
 0x3cd   : > { %8318 = vmatmul.mubr.msk.f32.gmra.mrb[12].mxu1 %vm204_vm1, %v11104_v9 }
 0x3ce   : > { %8320 = vmatprep.mubr.msk.f32.mxu1 %vm204_vm1, %v11112_v31 }
 0x3d1   : > { %8321 = vmatmul.mubr.msk.f32.gmra.mrb[14].mxu1 %vm204_vm1, %v11125_v52 }
 0x3d2   : > { %8323 = vmatprep.mubr.msk.f32.mxu1 %vm204_vm1, %v11133_v17 }
 0x3d5   : > { %8324 = vmatmul.mubr.msk.f32.gmra.mrb[16].mxu1 %vm204_vm1, %v11146_v29 }
 0x3d6   : > { %8326 = vmatprep.mubr.msk.f32.mxu1 %vm204_vm1, %v11154_v8 }
 0x3d9   : > { %8327 = vmatmul.mubr.msk.f32.gmra.mrb[18].mxu1 %vm204_vm1, %v11167_v2 }
 0x3da   : > { %8329 = vmatprep.mubr.msk.f32.mxu1 %vm204_vm1, %v11175_v48 }
 0x3dd   : > { %8330 = vmatmul.mubr.msk.f32.gmra.mrb[20].mxu1 %vm204_vm1, %v11188_v37 }
 0x3de   : > { %8332 = vmatprep.mubr.msk.f32.mxu1 %vm204_vm1, %v11196_v39 }
 0x3e1   : > { %8333 = vmatmul.mubr.msk.f32.gmra.mrb[22].mxu1 %vm204_vm1, %v11209_v10 }
 0x3e2   : > { %8335 = vmatprep.mubr.msk.f32.mxu1 %vm204_vm1, %v11217_v53 }
 0x3e5   : > { %8336 = vmatmul.mubr.msk.f32.gmra.mrb[24].mxu1 %vm204_vm1, %v11230_v44 }
 0x3e6   : > { %8338 = vmatprep.mubr.msk.f32.mxu1 %vm204_vm1, %v11238_v25 }
 0x3e9   : > { %8339 = vmatmul.mubr.msk.f32.gmra.mrb[26].mxu1 %vm204_vm1, %v11251_v47 }
 0x3ea   : > { %8341 = vmatprep.mubr.msk.f32.mxu1 %vm204_vm1, %v11259_v46 }
 0x3ed   : > { %8342 = vmatmul.mubr.msk.f32.gmra.mrb[28].mxu1 %vm204_vm1, %v11272_v60 }
 0x3ee   : > { %8344 = vmatprep.mubr.msk.f32.mxu1 %vm204_vm1, %v11280_v32 }
 0x3f1   : > { %8345 = vmatmul.mubr.msk.f32.gmra.mrb[30].mxu1 %vm204_vm1, %v11293_v18 }
 0x3f2   : > { %8349 = vmatprep.mubr.msk.f32.mxu1 %vm204_vm1, %v11003_v22  ;;  %v3546_v22 = vrot.slane %v11450_v59, 7 }
 0x3f5   : > { %8350 = vmatmul.mubr.msk.f32.vlgmr.msra.gmra.mrb[0].mxu1 %vm204_vm1, %v11020_v35  ;;  %v11456_v35 = vld [vmem:[#allocation2 + $0x118] sm:$0xff] }
 0x3f6   : > { %8398 = vmatpush3.msk.msra.mxu1 %vm615_vm0, %v6995_v41  ;;  %8352 = vmatprep.mubr.msk.f32.mxu1 %vm204_vm1, %v11028_v7  ;;  %v3547_v7 = vrot.slane %v11456_v35, 7  ;;  %v12799_v41 = vrot.slane %v11036_v54, 1 }
 0x3f7   : > { %8447 = vmatprep.subr.msk.mxu1 %vm615_vm0, %v7029_v16 }
 0x3f9   : > { %8353 = vmatmul.mubr.msk.f32.gmra.mrb[2].mxu1 %vm204_vm1, %v11041_v58  ;;  %v12782_v58 = vld [vmem:[#allocation36_spill] sm:$0xff] }
 0x3fa   : > { %8355 = vmatprep.mubr.msk.f32.mxu1 %vm204_vm1, %v11049_v28  ;;  %v12784_v28 = vld [vmem:[#allocation38_spill] sm:$0xff] }
 0x3fd   : > { %8356 = vmatmul.mubr.msk.f32.gmra.mrb[4].mxu1 %vm204_vm1, %v11062_v23  ;;  %v12785_v23 = vld [vmem:[#allocation39_spill] sm:$0xff] }
 0x3fe   : > { %8358 = vmatprep.mubr.msk.f32.mxu1 %vm204_vm1, %v11070_v15  ;;  %v12787_v15 = vld [vmem:[#allocation41_spill] sm:$0xff] }
 0x401   : > { %8359 = vmatmul.mubr.msk.f32.gmra.mrb[6].mxu1 %vm204_vm1, %v11083_v50  ;;  %v12789_v50 = vld [vmem:[#allocation43_spill] sm:$0xff] }
 0x402   : > { %8361 = vmatprep.mubr.msk.f32.mxu1 %vm204_vm1, %v11091_v1  ;;  %v7097_v1 = vld [vmem:[%s12552_s2 + $0x8] sm:$0xf] }
 0x405   : > { %8362 = vmatmul.mubr.msk.f32.gmra.mrb[8].mxu1 %vm204_vm1, %v11104_v9  ;;  %v12790_v9 = vld [vmem:[#allocation44_spill] sm:$0xff] }
 0x406   : > { %8364 = vmatprep.mubr.msk.f32.mxu1 %vm204_vm1, %v11112_v31  ;;  %v3585_v31 = vrot.slane %v11305_v55, 1 }
 0x408   : > { %v3657_v63 = vsel %vm441_vm3, %v3585_v31, %v3496_v21  ;;  %v12796_v21 = vrot.slane %v11007_v51, 7 }
 0x409   : > { %8365 = vmatmul.mubr.msk.f32.gmra.mrb[10].mxu1 %vm204_vm1, %v11125_v52  ;;  %v3587_v52 = vrot.slane %v10966_v42, 1 }
 0x40a   : > { %8367 = vmatprep.mubr.msk.f32.mxu1 %vm204_vm1, %v11133_v17  ;;  %v11690_v17 = vld [vmem:[%s12552_s2 + $0x20] sm:$0xf] }
 0x40d   : > { %8368 = vmatmul.mubr.msk.f32.gmra.mrb[12].mxu1 %vm204_vm1, %v11146_v29  ;;  %v12791_v29 = vrot.slane %v10964_v49, 1 }
 0x40e   : > { %8370 = vmatprep.mubr.msk.f32.mxu1 %vm204_vm1, %v11154_v8  ;;  %v12792_v8 = vrot.slane %v10966_v42, 7 }
 0x411   : > { %8371 = vmatmul.mubr.msk.f32.gmra.mrb[14].mxu1 %vm204_vm1, %v11167_v2  ;;  %v3591_v2 = vrot.slane %v11007_v51, 1 }
 0x412   : > { %8373 = vmatprep.mubr.msk.f32.mxu1 %vm204_vm1, %v11175_v48  ;;  %v12795_v48 = vrot.slane %v10978_v3, 1 }
 0x415   : > { %8374 = vmatmul.mubr.msk.f32.gmra.mrb[16].mxu1 %vm204_vm1, %v11188_v37  ;;  %v11696_v37 = vsel %vm441_vm3, %v12791_v29, %v3587_v52  ;;  %v12807_v29 = vrot.slane %v11120_v33, 1 }
 0x416   : > { %8376 = vmatprep.mubr.msk.f32.mxu1 %vm204_vm1, %v11196_v39  ;;  %v11707_v39 = vsel %vm441_vm3, %v3587_v52, %v12792_v8  ;;  %v3603_v52 = vrot.slane %v11137_v11, 1  ;;  %v12808_v8 = vrot.slane %v11137_v11, 7 }
 0x419   : > { %8377 = vmatmul.mubr.msk.f32.gmra.mrb[18].mxu1 %vm204_vm1, %v11209_v10  ;;  %v12794_v10 = vrot.slane %v10974_v0, 7 }
 0x41a   : > { %8379 = vmatprep.mubr.msk.f32.mxu1 %vm204_vm1, %v11217_v53  ;;  %v3593_v53 = vrot.slane %v11032_v26, 1 }
 0x41d   : > { %8380 = vmatmul.mubr.msk.f32.gmra.mrb[20].mxu1 %vm204_vm1, %v11230_v44  ;;  %v3586_v44 = vsel %vm441_vm3, %v3441_v4, %v3585_v31  ;;  %v3589_v4 = vrot.slane %v10974_v0, 1  ;;  %v12804_v31 = vrot.slane %v11095_v24, 7 }
 0x41e   : > { %8382 = vmatprep.mubr.msk.f32.mxu1 %vm204_vm1, %v11238_v25  ;;  %v7131_v25 = vld [vmem:[%s12552_s2 + $0x14] sm:$0xf] }
 0x421   : > { %8383 = vmatmul.mubr.msk.f32.gmra.mrb[22].mxu1 %vm204_vm1, %v11251_v47  ;;  %v12788_v47 = vld [vmem:[#allocation42_spill] sm:$0xff] }
 0x422   : > { %8385 = vmatprep.mubr.msk.f32.mxu1 %vm204_vm1, %v11259_v46  ;;  %v12786_v46 = vld [vmem:[#allocation40_spill] sm:$0xff] }
 0x425   : > { %8386 = vmatmul.mubr.msk.f32.gmra.mrb[24].mxu1 %vm204_vm1, %v11272_v60  ;;  %v12781_v60 = vld [vmem:[#allocation35_spill] sm:$0xff] }
 0x426   : > { %8388 = vmatprep.mubr.msk.f32.mxu1 %vm204_vm1, %v11280_v32  ;;  %v3584_v32 = vsel %vm350_vm2, %v3458_v19, %v3546_v22 }
 0x429   : > { %8389 = vmatmul.mubr.msk.f32.gmra.mrb[26].mxu1 %vm204_vm1, %v11293_v18  ;;  %v3548_v18 = vsel %vm350_vm2, %v3546_v22, %v3547_v7  ;;  %v12800_v22 = vrot.slane %v11053_v5, 7 }
 0x42a   : > { %8391 = vmatprep.mubr.msk.f32.mxu1 %vm204_vm1, %v11301_v12  ;;  %v7063_v12 = vld [vmem:[%s12552_s2 + $0x1c] sm:$0xf] }
 0x42d   : > { %8392 = vmatmul.mubr.msk.f32.gmra.mrb[28].mxu1 %vm204_vm1, %v11312_v6  ;;  %v12798_v6 = vrot.slane %v11032_v26, 7 }
 0x42e   : > { %8394 = vmatprep.mubr.msk.f32.mxu1 %vm204_vm1, %v3584_v32  ;;  %v12801_v32 = vrot.slane %v11057_v45, 1 }
 0x431   : > { %8395 = vmatmul.mubr.msk.f32.gmra.mrb[30].mxu1 %vm204_vm1, %v3548_v18  ;;  %v3599_v18 = vrot.slane %v11095_v24, 1 }
 0x432   : > { %8399 = vmatprep.mubr.msk.f32.mxu1 %vm204_vm1, %v11288_v34  ;;  %v3595_v34 = vrot.slane %v11053_v5, 1 }
 0x435   : > { %8400 = vmatmul.mubr.msk.f32.vlgmr.msra.gmra.mrb[0].mxu1 %vm204_vm1, %v11305_v55 }
 0x436   : > { %8448 = vmatpush3.msk.msra.mxu1 %vm615_vm0, %v7029_v16  ;;  %8402 = vmatprep.mubr.msk.f32.mxu1 %vm204_vm1, %v10964_v49  ;;  %v3597_v16 = vrot.slane %v11074_v20, 1 }
 0x437   : > { %8497 = vmatprep.subr.msk.mxu1 %vm615_vm0, %v7063_v12 }
 0x439   : > { %8403 = vmatmul.mubr.msk.f32.gmra.mrb[2].mxu1 %vm204_vm1, %v10966_v42 }
 0x43a   : > { %8405 = vmatprep.mubr.msk.f32.mxu1 %vm204_vm1, %v10972_v36 }
 0x43d   : > { %8406 = vmatmul.mubr.msk.f32.gmra.mrb[4].mxu1 %vm204_vm1, %v10974_v0 }
 0x43e   : > { %8408 = vmatprep.mubr.msk.f32.mxu1 %vm204_vm1, %v10978_v3 }
 0x441   : > { %8409 = vmatmul.mubr.msk.f32.gmra.mrb[6].mxu1 %vm204_vm1, %v11007_v51 }
 0x442   : > { %8411 = vmatprep.mubr.msk.f32.mxu1 %vm204_vm1, %v11013_v30 }
 0x445   : > { %8412 = vmatmul.mubr.msk.f32.gmra.mrb[8].mxu1 %vm204_vm1, %v11032_v26 }
 0x446   : > { %8414 = vmatprep.mubr.msk.f32.mxu1 %vm204_vm1, %v11036_v54 }
 0x449   : > { %8415 = vmatmul.mubr.msk.f32.gmra.mrb[10].mxu1 %vm204_vm1, %v11053_v5 }
 0x44a   : > { %8417 = vmatprep.mubr.msk.f32.mxu1 %vm204_vm1, %v11057_v45 }
 0x44d   : > { %8418 = vmatmul.mubr.msk.f32.gmra.mrb[12].mxu1 %vm204_vm1, %v11074_v20 }
 0x44e   : > { %8420 = vmatprep.mubr.msk.f32.mxu1 %vm204_vm1, %v11078_v13 }
 0x451   : > { %8421 = vmatmul.mubr.msk.f32.gmra.mrb[14].mxu1 %vm204_vm1, %v11095_v24 }
 0x452   : > { %8423 = vmatprep.mubr.msk.f32.mxu1 %vm204_vm1, %v11099_v61 }
 0x455   : > { %8424 = vmatmul.mubr.msk.f32.gmra.mrb[16].mxu1 %vm204_vm1, %v11116_v62 }
 0x456   : > { %8426 = vmatprep.mubr.msk.f32.mxu1 %vm204_vm1, %v11120_v33 }
 0x459   : > { %8427 = vmatmul.mubr.msk.f32.gmra.mrb[18].mxu1 %vm204_vm1, %v11137_v11 }
 0x45a   : > { %8429 = vmatprep.mubr.msk.f32.mxu1 %vm204_vm1, %v11141_v57 }
 0x45d   : > { %8430 = vmatmul.mubr.msk.f32.gmra.mrb[20].mxu1 %vm204_vm1, %v11158_v43 }
 0x45e   : > { %8432 = vmatprep.mubr.msk.f32.mxu1 %vm204_vm1, %v12781_v60 }
 0x461   : > { %8433 = vmatmul.mubr.msk.f32.gmra.mrb[22].mxu1 %vm204_vm1, %v12782_v58 }
 0x462   : > { %8435 = vmatprep.mubr.msk.f32.mxu1 %vm204_vm1, %v12783_v27 }
 0x465   : > { %8436 = vmatmul.mubr.msk.f32.gmra.mrb[24].mxu1 %vm204_vm1, %v12784_v28 }
 0x466   : > { %8438 = vmatprep.mubr.msk.f32.mxu1 %vm204_vm1, %v12785_v23 }
 0x469   : > { %8439 = vmatmul.mubr.msk.f32.gmra.mrb[26].mxu1 %vm204_vm1, %v12786_v46 }
 0x46a   : > { %8441 = vmatprep.mubr.msk.f32.mxu1 %vm204_vm1, %v12787_v15 }
 0x46d   : > { %8442 = vmatmul.mubr.msk.f32.gmra.mrb[28].mxu1 %vm204_vm1, %v12788_v47 }
 0x46e   : > { %8444 = vmatprep.mubr.msk.f32.mxu1 %vm204_vm1, %v12789_v50 }
 0x471   : > { %8445 = vmatmul.mubr.msk.f32.gmra.mrb[30].mxu1 %vm204_vm1, %v11263_v56 }
 0x472   : > { %8449 = vmatprep.mubr.msk.f32.mxu1 %vm204_vm1, %v10964_v49  ;;  %v12793_v49 = vrot.slane %v10972_v36, 1 }
 0x474   : > { %v11714_v55 = vsel %vm441_vm3, %v12793_v49, %v3589_v4  ;;  %v12809_v49 = vrot.slane %v11141_v57, 1 }
 0x475   : > { %8450 = vmatmul.mubr.msk.f32.vlgmr.msra.gmra.mrb[0].mxu1 %vm204_vm1, %v10966_v42  ;;  %v11722_v42 = vsel %vm441_vm3, %v3589_v4, %v12794_v10  ;;  %v3605_v4 = vrot.slane %v11158_v43, 1  ;;  %v12810_v10 = vrot.slane %v11158_v43, 7 }
 0x476   : > { %8498 = vmatpush3.msk.msra.mxu1 %vm615_vm0, %v7063_v12  ;;  %8452 = vmatprep.mubr.msk.f32.mxu1 %vm204_vm1, %v10972_v36  ;;  %v12802_v12 = vrot.slane %v11074_v20, 7 }
 0x477   : > { %8547 = vmatprep.subr.msk.mxu1 %vm615_vm0, %v7097_v1 }
 0x479   : > { %8453 = vmatmul.mubr.msk.f32.gmra.mrb[2].mxu1 %vm204_vm1, %v10974_v0 }
 0x47a   : > { %8455 = vmatprep.mubr.msk.f32.mxu1 %vm204_vm1, %v10978_v3 }
 0x47d   : > { %8456 = vmatmul.mubr.msk.f32.gmra.mrb[4].mxu1 %vm204_vm1, %v11007_v51 }
 0x47e   : > { %8458 = vmatprep.mubr.msk.f32.mxu1 %vm204_vm1, %v11013_v30 }
 0x481   : > { %8459 = vmatmul.mubr.msk.f32.gmra.mrb[6].mxu1 %vm204_vm1, %v11032_v26 }
 0x482   : > { %8461 = vmatprep.mubr.msk.f32.mxu1 %vm204_vm1, %v11036_v54 }
 0x485   : > { %8462 = vmatmul.mubr.msk.f32.gmra.mrb[8].mxu1 %vm204_vm1, %v11053_v5 }
 0x486   : > { %8464 = vmatprep.mubr.msk.f32.mxu1 %vm204_vm1, %v11057_v45 }
 0x489   : > { %8465 = vmatmul.mubr.msk.f32.gmra.mrb[10].mxu1 %vm204_vm1, %v11074_v20 }
 0x48a   : > { %8467 = vmatprep.mubr.msk.f32.mxu1 %vm204_vm1, %v11078_v13 }
 0x48d   : > { %8468 = vmatmul.mubr.msk.f32.gmra.mrb[12].mxu1 %vm204_vm1, %v11095_v24 }
 0x48e   : > { %8470 = vmatprep.mubr.msk.f32.mxu1 %vm204_vm1, %v11099_v61 }
 0x491   : > { %8471 = vmatmul.mubr.msk.f32.gmra.mrb[14].mxu1 %vm204_vm1, %v11116_v62 }
 0x492   : > { %8473 = vmatprep.mubr.msk.f32.mxu1 %vm204_vm1, %v11120_v33 }
 0x495   : > { %8474 = vmatmul.mubr.msk.f32.gmra.mrb[16].mxu1 %vm204_vm1, %v11137_v11 }
 0x496   : > { %8476 = vmatprep.mubr.msk.f32.mxu1 %vm204_vm1, %v11141_v57 }
 0x499   : > { %8477 = vmatmul.mubr.msk.f32.gmra.mrb[18].mxu1 %vm204_vm1, %v11158_v43 }
 0x49a   : > { %8479 = vmatprep.mubr.msk.f32.mxu1 %vm204_vm1, %v12781_v60 }
 0x49d   : > { %8480 = vmatmul.mubr.msk.f32.gmra.mrb[20].mxu1 %vm204_vm1, %v12782_v58 }
 0x49e   : > { %8482 = vmatprep.mubr.msk.f32.mxu1 %vm204_vm1, %v12783_v27 }
 0x4a1   : > { %8483 = vmatmul.mubr.msk.f32.gmra.mrb[22].mxu1 %vm204_vm1, %v12784_v28 }
 0x4a2   : > { %8485 = vmatprep.mubr.msk.f32.mxu1 %vm204_vm1, %v12785_v23 }
 0x4a5   : > { %8486 = vmatmul.mubr.msk.f32.gmra.mrb[24].mxu1 %vm204_vm1, %v12786_v46 }
 0x4a6   : > { %8488 = vmatprep.mubr.msk.f32.mxu1 %vm204_vm1, %v12787_v15 }
 0x4a9   : > { %8489 = vmatmul.mubr.msk.f32.gmra.mrb[26].mxu1 %vm204_vm1, %v12788_v47 }
 0x4aa   : > { %8491 = vmatprep.mubr.msk.f32.mxu1 %vm204_vm1, %v12789_v50 }
 0x4ad   : > { %8492 = vmatmul.mubr.msk.f32.gmra.mrb[28].mxu1 %vm204_vm1, %v11263_v56 }
 0x4ae   : > { %8494 = vmatprep.mubr.msk.f32.mxu1 %vm204_vm1, %v12790_v9 }
 0x4b1   : > { %8495 = vmatmul.mubr.msk.f32.gmra.mrb[30].mxu1 %vm204_vm1, %v11284_v38 }
 0x4b2   : > { %8499 = vmatprep.mubr.msk.f32.mxu1 %vm204_vm1, %v10972_v36  ;;  %v11729_v36 = vsel %vm441_vm3, %v12795_v48, %v3591_v2  ;;  %v12811_v48 = vrot.slane %v12781_v60, 1 }
 0x4b5   : > { %8500 = vmatmul.mubr.msk.f32.vlgmr.msra.gmra.mrb[0].mxu1 %vm204_vm1, %v10974_v0  ;;  %v11737_v0 = vsel %vm441_vm3, %v3591_v2, %v12796_v21  ;;  %v3607_v2 = vrot.slane %v12782_v58, 1  ;;  %v12812_v21 = vrot.slane %v12782_v58, 7 }
 0x4b6   : > { %8548 = vmatpush3.msk.msra.mxu1 %vm615_vm0, %v7097_v1  ;;  %8502 = vmatprep.mubr.msk.f32.mxu1 %vm204_vm1, %v10978_v3  ;;  %v11744_v3 = vsel %vm441_vm3, %v12797_v14, %v3593_v53  ;;  %v12803_v1 = vrot.slane %v11078_v13, 1  ;;  %v12813_v14 = vrot.slane %v12783_v27, 1 }
 0x4b7   : > { %8597 = vmatprep.subr.msk.mxu1 %vm615_vm0, %v7131_v25 }
 0x4b9   : > { %8503 = vmatmul.mubr.msk.f32.gmra.mrb[2].mxu1 %vm204_vm1, %v11007_v51  ;;  %v11752_v51 = vsel %vm441_vm3, %v3593_v53, %v12798_v6  ;;  %v3609_v53 = vrot.slane %v12784_v28, 1  ;;  %v12814_v6 = vrot.slane %v12784_v28, 7 }
 0x4ba   : > { %8505 = vmatprep.mubr.msk.f32.mxu1 %vm204_vm1, %v11013_v30  ;;  %v11759_v30 = vsel %vm441_vm3, %v12799_v41, %v3595_v34  ;;  %v12815_v41 = vrot.slane %v12785_v23, 1 }
 0x4bd   : > { %8506 = vmatmul.mubr.msk.f32.gmra.mrb[4].mxu1 %vm204_vm1, %v11032_v26  ;;  %v11767_v26 = vsel %vm441_vm3, %v3595_v34, %v12800_v22  ;;  %v3611_v34 = vrot.slane %v12786_v46, 1  ;;  %v12816_v22 = vrot.slane %v12786_v46, 7 }
 0x4be   : > { %8508 = vmatprep.mubr.msk.f32.mxu1 %vm204_vm1, %v11036_v54  ;;  %v11774_v54 = vsel %vm441_vm3, %v12801_v32, %v3597_v16  ;;  %v12817_v32 = vrot.slane %v12787_v15, 1 }
 0x4c1   : > { %8509 = vmatmul.mubr.msk.f32.gmra.mrb[6].mxu1 %vm204_vm1, %v11053_v5  ;;  %v11782_v5 = vsel %vm441_vm3, %v3597_v16, %v12802_v12  ;;  %v3613_v16 = vrot.slane %v12788_v47, 1  ;;  %v12818_v12 = vrot.slane %v12788_v47, 7 }
 0x4c2   : > { %8511 = vmatprep.mubr.msk.f32.mxu1 %vm204_vm1, %v11057_v45  ;;  %v11789_v45 = vsel %vm441_vm3, %v12803_v1, %v3599_v18  ;;  %v12819_v1 = vrot.slane %v12789_v50, 1 }
 0x4c5   : > { %8512 = vmatmul.mubr.msk.f32.gmra.mrb[8].mxu1 %vm204_vm1, %v11074_v20  ;;  %v11797_v20 = vsel %vm441_vm3, %v3599_v18, %v12804_v31  ;;  %v3615_v18 = vrot.slane %v11263_v56, 1 }
 0x4c6   : > { %8514 = vmatprep.mubr.msk.f32.mxu1 %vm204_vm1, %v11078_v13 }
 0x4c9   : > { %8515 = vmatmul.mubr.msk.f32.gmra.mrb[10].mxu1 %vm204_vm1, %v11095_v24 }
 0x4ca   : > { %8517 = vmatprep.mubr.msk.f32.mxu1 %vm204_vm1, %v11099_v61 }
 0x4cd   : > { %8518 = vmatmul.mubr.msk.f32.gmra.mrb[12].mxu1 %vm204_vm1, %v11116_v62 }
 0x4ce   : > { %8520 = vmatprep.mubr.msk.f32.mxu1 %vm204_vm1, %v11120_v33  ;;  %v11834_v33 = vsel %vm441_vm3, %v12809_v49, %v3605_v4 }
 0x4d1   : > { %8521 = vmatmul.mubr.msk.f32.gmra.mrb[14].mxu1 %vm204_vm1, %v11137_v11  ;;  %v11842_v11 = vsel %vm441_vm3, %v3605_v4, %v12810_v10 }
 0x4d2   : > { %8523 = vmatprep.mubr.msk.f32.mxu1 %vm204_vm1, %v11141_v57  ;;  %v11849_v57 = vsel %vm441_vm3, %v12811_v48, %v3607_v2 }
 0x4d5   : > { %8524 = vmatmul.mubr.msk.f32.gmra.mrb[16].mxu1 %vm204_vm1, %v11158_v43  ;;  %v11857_v43 = vsel %vm441_vm3, %v3607_v2, %v12812_v21 }
 0x4d6   : > { %8526 = vmatprep.mubr.msk.f32.mxu1 %vm204_vm1, %v12781_v60  ;;  %v11864_v60 = vsel %vm441_vm3, %v12813_v14, %v3609_v53 }
 0x4d9   : > { %8527 = vmatmul.mubr.msk.f32.gmra.mrb[18].mxu1 %vm204_vm1, %v12782_v58  ;;  %v11872_v58 = vsel %vm441_vm3, %v3609_v53, %v12814_v6 }
 0x4da   : > { %8529 = vmatprep.mubr.msk.f32.mxu1 %vm204_vm1, %v12783_v27  ;;  %v11879_v27 = vsel %vm441_vm3, %v12815_v41, %v3611_v34 }
 0x4dd   : > { %8530 = vmatmul.mubr.msk.f32.gmra.mrb[20].mxu1 %vm204_vm1, %v12784_v28  ;;  %v11887_v28 = vsel %vm441_vm3, %v3611_v34, %v12816_v22 }
 0x4de   : > { %8532 = vmatprep.mubr.msk.f32.mxu1 %vm204_vm1, %v12785_v23  ;;  %v11894_v23 = vsel %vm441_vm3, %v12817_v32, %v3613_v16 }
 0x4e1   : > { %8533 = vmatmul.mubr.msk.f32.gmra.mrb[22].mxu1 %vm204_vm1, %v12786_v46  ;;  %v11902_v46 = vsel %vm441_vm3, %v3613_v16, %v12818_v12 }
 0x4e2   : > { %8535 = vmatprep.mubr.msk.f32.mxu1 %vm204_vm1, %v12787_v15  ;;  %v11909_v15 = vsel %vm441_vm3, %v12819_v1, %v3615_v18 }
 0x4e5   : > { %8536 = vmatmul.mubr.msk.f32.gmra.mrb[24].mxu1 %vm204_vm1, %v12788_v47  ;;  %v12821_v47 = vrot.slane %v12790_v9, 1 }
 0x4e6   : > { %8538 = vmatprep.mubr.msk.f32.mxu1 %vm204_vm1, %v12789_v50 }
 0x4e9   : > { %8539 = vmatmul.mubr.msk.f32.gmra.mrb[26].mxu1 %vm204_vm1, %v11263_v56 }
 0x4ea   : > { %8541 = vmatprep.mubr.msk.f32.mxu1 %vm204_vm1, %v12790_v9 }
 0x4ed   : > { %8542 = vmatmul.mubr.msk.f32.gmra.mrb[28].mxu1 %vm204_vm1, %v11284_v38 }
 0x4ee   : > { %8544 = vmatprep.mubr.msk.f32.mxu1 %vm204_vm1, %v11450_v59 }
 0x4f1   : > { %8545 = vmatmul.mubr.msk.f32.gmra.mrb[30].mxu1 %vm204_vm1, %v11456_v35 }
 0x4f2   : > { %8549 = vmatprep.mubr.msk.f32.mxu1 %vm204_vm1, %v3586_v44  ;;  %v12805_v44 = vrot.slane %v11099_v61, 1  ;;  %v11819_v61 = vsel %vm441_vm3, %v12807_v29, %v3603_v52 }
 0x4f5   : > { %8550 = vmatmul.mubr.msk.f32.vlgmr.msra.gmra.mrb[0].mxu1 %vm204_vm1, %v3657_v63  ;;  %v12806_v63 = vrot.slane %v11116_v62, 7 }
 0x4f6   : > { %8598 = vmatpush3.msk.msra.mxu1 %vm615_vm0, %v7131_v25  ;;  %8552 = vmatprep.mubr.msk.f32.mxu1 %vm204_vm1, %v11696_v37  ;;  %v3601_v25 = vrot.slane %v11116_v62, 1  ;;  %v11827_v62 = vsel %vm441_vm3, %v3603_v52, %v12808_v8 }
 0x4f7   : > { %8647 = vmatprep.subr.msk.mxu1 %vm615_vm0, %v11690_v17 }
 0x4f8   : > { %v11804_v13 = vsel %vm441_vm3, %v12805_v44, %v3601_v25  ;;  %v11812_v24 = vsel %vm441_vm3, %v3601_v25, %v12806_v63  ;;  %v12820_v25 = vrot.slane %v11263_v56, 7  ;;  %v3617_v56 = vrot.slane %v11284_v38, 1 }
 0x4f9   : > { %8553 = vmatmul.mubr.msk.f32.gmra.mrb[2].mxu1 %vm204_vm1, %v11707_v39  ;;  %v3619_v38 = vrot.slane %v11456_v35, 1 }
 0x4fa   : > { %8555 = vmatprep.mubr.msk.f32.mxu1 %vm204_vm1, %v11714_v55  ;;  %v11916_v31 = vsel %vm441_vm3, %v3615_v18, %v12820_v25  ;;  %v3618_v50 = vsel %vm441_vm3, %v12821_v47, %v3617_v56 }
 0x4fb   : > { %v3674_v9 = vsel %vm441_vm3, %v3619_v38, %v3547_v7 }
 0x4fd   : > { %8556 = vmatmul.mubr.msk.f32.gmra.mrb[4].mxu1 %vm204_vm1, %v11722_v42 }
 0x4fe   : > { %8558 = vmatprep.mubr.msk.f32.mxu1 %vm204_vm1, %v11729_v36 }
 0x501   : > { %8559 = vmatmul.mubr.msk.f32.gmra.mrb[6].mxu1 %vm204_vm1, %v11737_v0 }
 0x502   : > { %8561 = vmatprep.mubr.msk.f32.mxu1 %vm204_vm1, %v11744_v3 }
 0x505   : > { %8562 = vmatmul.mubr.msk.f32.gmra.mrb[8].mxu1 %vm204_vm1, %v11752_v51 }
 0x506   : > { %8564 = vmatprep.mubr.msk.f32.mxu1 %vm204_vm1, %v11759_v30 }
 0x509   : > { %8565 = vmatmul.mubr.msk.f32.gmra.mrb[10].mxu1 %vm204_vm1, %v11767_v26 }
 0x50a   : > { %8567 = vmatprep.mubr.msk.f32.mxu1 %vm204_vm1, %v11774_v54 }
 0x50d   : > { %8568 = vmatmul.mubr.msk.f32.gmra.mrb[12].mxu1 %vm204_vm1, %v11782_v5 }
 0x50e   : > { %8570 = vmatprep.mubr.msk.f32.mxu1 %vm204_vm1, %v11789_v45 }
 0x511   : > { %8571 = vmatmul.mubr.msk.f32.gmra.mrb[14].mxu1 %vm204_vm1, %v11797_v20 }
 0x512   : > { %8573 = vmatprep.mubr.msk.f32.mxu1 %vm204_vm1, %v11804_v13 }
 0x515   : > { %8574 = vmatmul.mubr.msk.f32.gmra.mrb[16].mxu1 %vm204_vm1, %v11812_v24 }
 0x516   : > { %8576 = vmatprep.mubr.msk.f32.mxu1 %vm204_vm1, %v11819_v61 }
 0x519   : > { %8577 = vmatmul.mubr.msk.f32.gmra.mrb[18].mxu1 %vm204_vm1, %v11827_v62 }
 0x51a   : > { %8579 = vmatprep.mubr.msk.f32.mxu1 %vm204_vm1, %v11834_v33 }
 0x51d   : > { %8580 = vmatmul.mubr.msk.f32.gmra.mrb[20].mxu1 %vm204_vm1, %v11842_v11 }
 0x51e   : > { %8582 = vmatprep.mubr.msk.f32.mxu1 %vm204_vm1, %v11849_v57 }
 0x521   : > { %8583 = vmatmul.mubr.msk.f32.gmra.mrb[22].mxu1 %vm204_vm1, %v11857_v43 }
 0x522   : > { %8585 = vmatprep.mubr.msk.f32.mxu1 %vm204_vm1, %v11864_v60 }
 0x525   : > { %8586 = vmatmul.mubr.msk.f32.gmra.mrb[24].mxu1 %vm204_vm1, %v11872_v58 }
 0x526   : > { %8588 = vmatprep.mubr.msk.f32.mxu1 %vm204_vm1, %v11879_v27 }
 0x529   : > { %8589 = vmatmul.mubr.msk.f32.gmra.mrb[26].mxu1 %vm204_vm1, %v11887_v28 }
 0x52a   : > { %8591 = vmatprep.mubr.msk.f32.mxu1 %vm204_vm1, %v11894_v23 }
 0x52d   : > { %8592 = vmatmul.mubr.msk.f32.gmra.mrb[28].mxu1 %vm204_vm1, %v11902_v46 }
 0x52e   : > { %8594 = vmatprep.mubr.msk.f32.mxu1 %vm204_vm1, %v11909_v15 }
 0x531   : > { %8595 = vmatmul.mubr.msk.f32.gmra.mrb[30].mxu1 %vm204_vm1, %v11916_v31 }
 0x532   : > { %8599 = vmatprep.mubr.msk.f32.mxu1 %vm204_vm1, %v11696_v37 }
 0x535   : > { %8600 = vmatmul.mubr.msk.f32.vlgmr.msra.gmra.mrb[0].mxu1 %vm204_vm1, %v11707_v39 }
 0x536   : > { %8648 = vmatpush3.msk.msra.mxu1 %vm615_vm0, %v11690_v17  ;;  %8602 = vmatprep.mubr.msk.f32.mxu1 %vm204_vm1, %v11714_v55  ;;  %v3673_v17 = vsel %vm441_vm3, %v3617_v56, %v3544_v40  ;;  %v3620_v40 = vsel %vm441_vm3, %v3458_v19, %v3619_v38 }
 0x539   : > { %8603 = vmatmul.mubr.msk.f32.gmra.mrb[2].mxu1 %vm204_vm1, %v11722_v42 }
 0x53a   : > { %8605 = vmatprep.mubr.msk.f32.mxu1 %vm204_vm1, %v11729_v36 }
 0x53d   : > { %8606 = vmatmul.mubr.msk.f32.gmra.mrb[4].mxu1 %vm204_vm1, %v11737_v0 }
 0x53e   : > { %8608 = vmatprep.mubr.msk.f32.mxu1 %vm204_vm1, %v11744_v3 }
 0x541   : > { %8609 = vmatmul.mubr.msk.f32.gmra.mrb[6].mxu1 %vm204_vm1, %v11752_v51 }
 0x542   : > { %8611 = vmatprep.mubr.msk.f32.mxu1 %vm204_vm1, %v11759_v30 }
 0x545   : > { %8612 = vmatmul.mubr.msk.f32.gmra.mrb[8].mxu1 %vm204_vm1, %v11767_v26 }
 0x546   : > { %8614 = vmatprep.mubr.msk.f32.mxu1 %vm204_vm1, %v11774_v54 }
 0x549   : > { %8615 = vmatmul.mubr.msk.f32.gmra.mrb[10].mxu1 %vm204_vm1, %v11782_v5 }
 0x54a   : > { %8617 = vmatprep.mubr.msk.f32.mxu1 %vm204_vm1, %v11789_v45 }
 0x54d   : > { %8618 = vmatmul.mubr.msk.f32.gmra.mrb[12].mxu1 %vm204_vm1, %v11797_v20 }
 0x54e   : > { %8620 = vmatprep.mubr.msk.f32.mxu1 %vm204_vm1, %v11804_v13 }
 0x551   : > { %8621 = vmatmul.mubr.msk.f32.gmra.mrb[14].mxu1 %vm204_vm1, %v11812_v24 }
 0x552   : > { %8623 = vmatprep.mubr.msk.f32.mxu1 %vm204_vm1, %v11819_v61 }
 0x555   : > { %8624 = vmatmul.mubr.msk.f32.gmra.mrb[16].mxu1 %vm204_vm1, %v11827_v62 }
 0x556   : > { %8626 = vmatprep.mubr.msk.f32.mxu1 %vm204_vm1, %v11834_v33 }
 0x559   : > { %8627 = vmatmul.mubr.msk.f32.gmra.mrb[18].mxu1 %vm204_vm1, %v11842_v11 }
 0x55a   : > { %8629 = vmatprep.mubr.msk.f32.mxu1 %vm204_vm1, %v11849_v57 }
 0x55d   : > { %8630 = vmatmul.mubr.msk.f32.gmra.mrb[20].mxu1 %vm204_vm1, %v11857_v43 }
 0x55e   : > { %8632 = vmatprep.mubr.msk.f32.mxu1 %vm204_vm1, %v11864_v60 }
 0x561   : > { %8633 = vmatmul.mubr.msk.f32.gmra.mrb[22].mxu1 %vm204_vm1, %v11872_v58 }
 0x562   : > { %8635 = vmatprep.mubr.msk.f32.mxu1 %vm204_vm1, %v11879_v27 }
 0x565   : > { %8636 = vmatmul.mubr.msk.f32.gmra.mrb[24].mxu1 %vm204_vm1, %v11887_v28 }
 0x566   : > { %8638 = vmatprep.mubr.msk.f32.mxu1 %vm204_vm1, %v11894_v23 }
 0x569   : > { %8639 = vmatmul.mubr.msk.f32.gmra.mrb[26].mxu1 %vm204_vm1, %v11902_v46 }
 0x56a   : > { %8641 = vmatprep.mubr.msk.f32.mxu1 %vm204_vm1, %v11909_v15 }
 0x56d   : > { %8642 = vmatmul.mubr.msk.f32.gmra.mrb[28].mxu1 %vm204_vm1, %v11916_v31 }
 0x56e   : > { %8644 = vmatprep.mubr.msk.f32.mxu1 %vm204_vm1, %v3618_v50 }
 0x571   : > { %8645 = vmatmul.mubr.msk.f32.gmra.mrb[30].mxu1 %vm204_vm1, %v3673_v17 }
 0x572   : > { %8649 = vmatprep.mubr.msk.f32.mxu1 %vm204_vm1, %v11714_v55 }
 0x575   : > { %8650 = vmatmul.mubr.msk.f32.vlgmr.msra.gmra.mrb[0].mxu1 %vm204_vm1, %v11722_v42 }
 0x576   : > { %8652 = vmatprep.mubr.msk.f32.mxu1 %vm204_vm1, %v11729_v36 }
 0x579   : > { %8653 = vmatmul.mubr.msk.f32.gmra.mrb[2].mxu1 %vm204_vm1, %v11737_v0 }
 0x57a   : > { %8655 = vmatprep.mubr.msk.f32.mxu1 %vm204_vm1, %v11744_v3 }
 0x57d   : > { %8656 = vmatmul.mubr.msk.f32.gmra.mrb[4].mxu1 %vm204_vm1, %v11752_v51 }
 0x57e   : > { %8658 = vmatprep.mubr.msk.f32.mxu1 %vm204_vm1, %v11759_v30 }
 0x581   : > { %8659 = vmatmul.mubr.msk.f32.gmra.mrb[6].mxu1 %vm204_vm1, %v11767_v26 }
 0x582   : > { %8661 = vmatprep.mubr.msk.f32.mxu1 %vm204_vm1, %v11774_v54 }
 0x585   : > { %8662 = vmatmul.mubr.msk.f32.gmra.mrb[8].mxu1 %vm204_vm1, %v11782_v5 }
 0x586   : > { %8664 = vmatprep.mubr.msk.f32.mxu1 %vm204_vm1, %v11789_v45 }
 0x589   : > { %8665 = vmatmul.mubr.msk.f32.gmra.mrb[10].mxu1 %vm204_vm1, %v11797_v20 }
 0x58a   : > { %8667 = vmatprep.mubr.msk.f32.mxu1 %vm204_vm1, %v11804_v13 }
 0x58d   : > { %8668 = vmatmul.mubr.msk.f32.gmra.mrb[12].mxu1 %vm204_vm1, %v11812_v24 }
 0x58e   : > { %8670 = vmatprep.mubr.msk.f32.mxu1 %vm204_vm1, %v11819_v61 }
 0x591   : > { %8671 = vmatmul.mubr.msk.f32.gmra.mrb[14].mxu1 %vm204_vm1, %v11827_v62 }
 0x592   : > { %8673 = vmatprep.mubr.msk.f32.mxu1 %vm204_vm1, %v11834_v33 }
 0x595   : > { %8674 = vmatmul.mubr.msk.f32.gmra.mrb[16].mxu1 %vm204_vm1, %v11842_v11 }
 0x596   : > { %8676 = vmatprep.mubr.msk.f32.mxu1 %vm204_vm1, %v11849_v57 }
 0x599   : > { %8677 = vmatmul.mubr.msk.f32.gmra.mrb[18].mxu1 %vm204_vm1, %v11857_v43 }
 0x59a   : > { %8679 = vmatprep.mubr.msk.f32.mxu1 %vm204_vm1, %v11864_v60 }
 0x59d   : > { %8680 = vmatmul.mubr.msk.f32.gmra.mrb[20].mxu1 %vm204_vm1, %v11872_v58 }
 0x59e   : > { %8682 = vmatprep.mubr.msk.f32.mxu1 %vm204_vm1, %v11879_v27 }
 0x5a1   : > { %8683 = vmatmul.mubr.msk.f32.gmra.mrb[22].mxu1 %vm204_vm1, %v11887_v28 }
 0x5a2   : > { %8685 = vmatprep.mubr.msk.f32.mxu1 %vm204_vm1, %v11894_v23 }
 0x5a5   : > { %8686 = vmatmul.mubr.msk.f32.gmra.mrb[24].mxu1 %vm204_vm1, %v11902_v46 }
 0x5a6   : > { %8688 = vmatprep.mubr.msk.f32.mxu1 %vm204_vm1, %v11909_v15 }
 0x5a9   : > { %8689 = vmatmul.mubr.msk.f32.gmra.mrb[26].mxu1 %vm204_vm1, %v11916_v31 }
 0x5aa   : > { %8691 = vmatprep.mubr.msk.f32.mxu1 %vm204_vm1, %v3618_v50 }
 0x5ad   : > { %8692 = vmatmul.mubr.msk.f32.gmra.mrb[28].mxu1 %vm204_vm1, %v3673_v17 }
 0x5ae   : > { %8694 = vmatprep.mubr.msk.f32.mxu1 %vm204_vm1, %v3620_v40 }
 0x5b1   : > { %8695 = vmatmul.mubr.msk.f32.gmra.mrb[30].mxu1 %vm204_vm1, %v3674_v9 }
 0x648   : > { %v12058_v37 = vpop.f32.mrb[0].mxu1 }
 0x649   : > { %v6221_v39 = vsel %vm204_vm1, %v12058_v37, 0.0  ;;  %v6291_v55 = vmul.f32 %v12058_v37, %v12058_v37  ;;  %v12064_v42 = vpop.f32.mrb[1].mxu1 }
 0x64a   : > { %v6220_v59 = vsel %vm204_vm1, %v12064_v42, 0.0  ;;  %v6290_v19 = vmul.f32 %v12064_v42, %v12064_v42 }
 0x64b   : > { %v6323_v35 = vsel %vm204_vm1, %v6291_v55, 0.0  ;;  %v6222_v7 = vadd.f32 %v6221_v39, %v6220_v59 }
 0x64c   : > { %v6322_v36 = vsel %vm204_vm1, %v6290_v19, 0.0  ;;  %v12072_v0 = vpop.f32.mrb[2].mxu1 }
 0x64d   : > { %v6324_v3 = vadd.f32 %v6323_v35, %v6322_v36  ;;  %v12074_v51 = vpop.f32.mrb[3].mxu1  ;;  %v6293_v30 = vmul.f32 %v12072_v0, %v12072_v0  ;;  %v6225_v45 = vsel %vm204_vm1, %v12072_v0, 0.0 }
 0x64e   : > { %v6223_v26 = vsel %vm204_vm1, %v12074_v51, 0.0  ;;  %v6292_v54 = vmul.f32 %v12074_v51, %v12074_v51 }
 0x64f   : > { %v6224_v5 = vadd.f32 %v6223_v26, %v6222_v7  ;;  %v6327_v24 = vsel %vm204_vm1, %v6293_v30, 0.0 }
 0x650   : > { %v6325_v20 = vsel %vm204_vm1, %v6292_v54, 0.0  ;;  %v12085_v44 = vpop.f32.mrb[4].mxu1 }
 0x651   : > { %v6326_v13 = vadd.f32 %v6325_v20, %v6324_v3  ;;  %v12087_v52 = vpop.f32.mrb[5].mxu1  ;;  %v6226_v63 = vadd.f32 %v6225_v45, %v6224_v5  ;;  %v6295_v29 = vmul.f32 %v12085_v44, %v12085_v44  ;;  %v6229_v49 = vsel %vm204_vm1, %v12085_v44, 0.0 }
 0x652   : > { %v6227_v61 = vsel %vm204_vm1, %v12087_v52, 0.0  ;;  %v6294_v4 = vmul.f32 %v12087_v52, %v12087_v52 }
 0x653   : > { %v6228_v8 = vadd.f32 %v6227_v61, %v6226_v63  ;;  %v6328_v62 = vadd.f32 %v6327_v24, %v6326_v13  ;;  %v6331_v57 = vsel %vm204_vm1, %v6295_v29, 0.0 }
 0x654   : > { %v6329_v33 = vsel %vm204_vm1, %v6294_v4, 0.0  ;;  %v12099_v2 = vpop.f32.mrb[6].mxu1 }
 0x655   : > { %v6330_v10 = vadd.f32 %v6329_v33, %v6328_v62  ;;  %v12101_v11 = vpop.f32.mrb[7].mxu1  ;;  %v6230_v48 = vadd.f32 %v6229_v49, %v6228_v8  ;;  %v6297_v53 = vmul.f32 %v12099_v2, %v12099_v2  ;;  %v6233_v34 = vsel %vm204_vm1, %v12099_v2, 0.0 }
 0x656   : > { %v6231_v21 = vsel %vm204_vm1, %v12101_v11, 0.0  ;;  %v6296_v43 = vmul.f32 %v12101_v11, %v12101_v11 }
 0x657   : > { %v6232_v14 = vadd.f32 %v6231_v21, %v6230_v48  ;;  %v6332_v60 = vadd.f32 %v6331_v57, %v6330_v10  ;;  %v6335_v22 = vsel %vm204_vm1, %v6297_v53, 0.0 }
 0x658   : > { %v6333_v6 = vsel %vm204_vm1, %v6296_v43, 0.0  ;;  %v12113_v58 = vpop.f32.mrb[8].mxu1 }
 0x659   : > { %v6334_v41 = vadd.f32 %v6333_v6, %v6332_v60  ;;  %v12115_v27 = vpop.f32.mrb[9].mxu1  ;;  %v6234_v16 = vadd.f32 %v6233_v34, %v6232_v14  ;;  %v6299_v28 = vmul.f32 %v12113_v58, %v12113_v58  ;;  %v6237_v46 = vsel %vm204_vm1, %v12113_v58, 0.0 }
 0x65a   : > { %v6235_v32 = vsel %vm204_vm1, %v12115_v27, 0.0  ;;  %v6298_v23 = vmul.f32 %v12115_v27, %v12115_v27 }
 0x65b   : > { %v6236_v18 = vadd.f32 %v6235_v32, %v6234_v16  ;;  %v6336_v12 = vadd.f32 %v6335_v22, %v6334_v41  ;;  %v6339_v47 = vsel %vm204_vm1, %v6299_v28, 0.0 }
 0x65c   : > { %v6337_v1 = vsel %vm204_vm1, %v6298_v23, 0.0  ;;  %v12127_v15 = vpop.f32.mrb[10].mxu1 }
 0x65d   : > { %v6338_v25 = vadd.f32 %v6337_v1, %v6336_v12  ;;  %v12129_v31 = vpop.f32.mrb[11].mxu1  ;;  %v6238_v56 = vadd.f32 %v6237_v46, %v6236_v18  ;;  %v6301_v50 = vmul.f32 %v12127_v15, %v12127_v15  ;;  %v6241_v39 = vsel %vm204_vm1, %v12127_v15, 0.0 }
 0x65e   : > { %v6239_v17 = vsel %vm204_vm1, %v12129_v31, 0.0  ;;  %v6300_v38 = vmul.f32 %v12129_v31, %v12129_v31 }
 0x65f   : > { %v6240_v40 = vadd.f32 %v6239_v17, %v6238_v56  ;;  %v6340_v9 = vadd.f32 %v6339_v47, %v6338_v25  ;;  %v6343_v36 = vsel %vm204_vm1, %v6301_v50, 0.0 }
 0x660   : > { %v6341_v55 = vsel %vm204_vm1, %v6300_v38, 0.0  ;;  %v12141_v59 = vpop.f32.mrb[12].mxu1 }
 0x661   : > { %v6342_v19 = vadd.f32 %v6341_v55, %v6340_v9  ;;  %v12143_v35 = vpop.f32.mrb[13].mxu1  ;;  %v6242_v7 = vadd.f32 %v6241_v39, %v6240_v40  ;;  %v6303_v3 = vmul.f32 %v12141_v59, %v12141_v59  ;;  %v6245_v45 = vsel %vm204_vm1, %v12141_v59, 0.0 }
 0x662   : > { %v6243_v30 = vsel %vm204_vm1, %v12143_v35, 0.0  ;;  %v6302_v26 = vmul.f32 %v12143_v35, %v12143_v35 }
 0x663   : > { %v6244_v54 = vadd.f32 %v6243_v30, %v6242_v7  ;;  %v6344_v5 = vadd.f32 %v6343_v36, %v6342_v19  ;;  %v6347_v61 = vsel %vm204_vm1, %v6303_v3, 0.0 }
 0x664   : > { %v6345_v20 = vsel %vm204_vm1, %v6302_v26, 0.0  ;;  %v12155_v13 = vpop.f32.mrb[14].mxu1 }
 0x665   : > { %v6346_v63 = vadd.f32 %v6345_v20, %v6344_v5  ;;  %v12157_v24 = vpop.f32.mrb[15].mxu1  ;;  %v6246_v29 = vadd.f32 %v6245_v45, %v6244_v54  ;;  %v6305_v4 = vmul.f32 %v12155_v13, %v12155_v13  ;;  %v6249_v10 = vsel %vm204_vm1, %v12155_v13, 0.0 }
 0x666   : > { %v6247_v8 = vsel %vm204_vm1, %v12157_v24, 0.0  ;;  %v6304_v62 = vmul.f32 %v12157_v24, %v12157_v24 }
 0x667   : > { %v6248_v49 = vadd.f32 %v6247_v8, %v6246_v29  ;;  %v6348_v33 = vadd.f32 %v6347_v61, %v6346_v63  ;;  %v6351_v14 = vsel %vm204_vm1, %v6305_v4, 0.0 }
 0x668   : > { %v6349_v48 = vsel %vm204_vm1, %v6304_v62, 0.0  ;;  %v12169_v57 = vpop.f32.mrb[16].mxu1 }
 0x669   : > { %v6350_v53 = vadd.f32 %v6349_v48, %v6348_v33  ;;  %v12171_v21 = vpop.f32.mrb[17].mxu1  ;;  %v6250_v43 = vadd.f32 %v6249_v10, %v6248_v49  ;;  %v6307_v60 = vmul.f32 %v12169_v57, %v12169_v57  ;;  %v6253_v22 = vsel %vm204_vm1, %v12169_v57, 0.0 }
 0x66a   : > { %v6251_v34 = vsel %vm204_vm1, %v12171_v21, 0.0  ;;  %v6306_v6 = vmul.f32 %v12171_v21, %v12171_v21 }
 0x66b   : > { %v6252_v41 = vadd.f32 %v6251_v34, %v6250_v43  ;;  %v6352_v16 = vadd.f32 %v6351_v14, %v6350_v53  ;;  %v6355_v46 = vsel %vm204_vm1, %v6307_v60, 0.0 }
 0x66c   : > { %v6353_v28 = vsel %vm204_vm1, %v6306_v6, 0.0  ;;  %v12183_v32 = vpop.f32.mrb[18].mxu1 }
 0x66d   : > { %v6354_v23 = vadd.f32 %v6353_v28, %v6352_v16  ;;  %v12185_v18 = vpop.f32.mrb[19].mxu1  ;;  %v6254_v12 = vadd.f32 %v6253_v22, %v6252_v41  ;;  %v6309_v1 = vmul.f32 %v12183_v32, %v12183_v32  ;;  %v6257_v17 = vsel %vm204_vm1, %v12183_v32, 0.0 }
 0x66e   : > { %v6255_v25 = vsel %vm204_vm1, %v12185_v18, 0.0  ;;  %v6308_v56 = vmul.f32 %v12185_v18, %v12185_v18 }
 0x66f   : > { %v6256_v47 = vadd.f32 %v6255_v25, %v6254_v12  ;;  %v6356_v50 = vadd.f32 %v6355_v46, %v6354_v23  ;;  %v6359_v19 = vsel %vm204_vm1, %v6309_v1, 0.0 }
 0x670   : > { %v6357_v38 = vsel %vm204_vm1, %v6308_v56, 0.0  ;;  %v12197_v40 = vpop.f32.mrb[20].mxu1 }
 0x671   : > { %v6358_v9 = vadd.f32 %v6357_v38, %v6356_v50  ;;  %v12199_v39 = vpop.f32.mrb[21].mxu1  ;;  %v6258_v55 = vadd.f32 %v6257_v17, %v6256_v47  ;;  %v6311_v7 = vmul.f32 %v12197_v40, %v12197_v40  ;;  %v6261_v54 = vsel %vm204_vm1, %v12197_v40, 0.0 }
 0x672   : > { %v6259_v36 = vsel %vm204_vm1, %v12199_v39, 0.0  ;;  %v6310_v3 = vmul.f32 %v12199_v39, %v12199_v39 }
 0x673   : > { %v6260_v30 = vadd.f32 %v6259_v36, %v6258_v55  ;;  %v6360_v26 = vadd.f32 %v6359_v19, %v6358_v9  ;;  %v6363_v61 = vsel %vm204_vm1, %v6311_v7, 0.0 }
 0x674   : > { %v6361_v5 = vsel %vm204_vm1, %v6310_v3, 0.0  ;;  %v12211_v45 = vpop.f32.mrb[22].mxu1 }
 0x675   : > { %v6362_v20 = vadd.f32 %v6361_v5, %v6360_v26  ;;  %v12213_v63 = vpop.f32.mrb[23].mxu1  ;;  %v6262_v29 = vadd.f32 %v6261_v54, %v6260_v30  ;;  %v6313_v4 = vmul.f32 %v12211_v45, %v12211_v45  ;;  %v6265_v10 = vsel %vm204_vm1, %v12211_v45, 0.0 }
 0x676   : > { %v6263_v8 = vsel %vm204_vm1, %v12213_v63, 0.0  ;;  %v6312_v62 = vmul.f32 %v12213_v63, %v12213_v63 }
 0x677   : > { %v6264_v49 = vadd.f32 %v6263_v8, %v6262_v29  ;;  %v6364_v33 = vadd.f32 %v6363_v61, %v6362_v20  ;;  %v6367_v34 = vsel %vm204_vm1, %v6313_v4, 0.0 }
 0x678   : > { %v6365_v48 = vsel %vm204_vm1, %v6312_v62, 0.0  ;;  %v12225_v53 = vpop.f32.mrb[24].mxu1 }
 0x679   : > { %v6366_v43 = vadd.f32 %v6365_v48, %v6364_v33  ;;  %v12227_v14 = vpop.f32.mrb[25].mxu1  ;;  %v6266_v60 = vadd.f32 %v6265_v10, %v6264_v49  ;;  %v6315_v6 = vmul.f32 %v12225_v53, %v12225_v53  ;;  %v6269_v23 = vsel %vm204_vm1, %v12225_v53, 0.0 }
 0x67a   : > { %v6267_v41 = vsel %vm204_vm1, %v12227_v14, 0.0  ;;  %v6314_v16 = vmul.f32 %v12227_v14, %v12227_v14 }
 0x67b   : > { %v6268_v22 = vadd.f32 %v6267_v41, %v6266_v60  ;;  %v6368_v28 = vadd.f32 %v6367_v34, %v6366_v43  ;;  %v6371_v47 = vsel %vm204_vm1, %v6315_v6, 0.0 }
 0x67c   : > { %v6369_v12 = vsel %vm204_vm1, %v6314_v16, 0.0  ;;  %v12239_v46 = vpop.f32.mrb[26].mxu1 }
 0x67d   : > { %v6370_v1 = vadd.f32 %v6369_v12, %v6368_v28  ;;  %v12241_v25 = vpop.f32.mrb[27].mxu1  ;;  %v6270_v56 = vadd.f32 %v6269_v23, %v6268_v22  ;;  %v6317_v50 = vmul.f32 %v12239_v46, %v12239_v46  ;;  %v6273_v19 = vsel %vm204_vm1, %v12239_v46, 0.0 }
 0x67e   : > { %v6271_v17 = vsel %vm204_vm1, %v12241_v25, 0.0  ;;  %v6316_v38 = vmul.f32 %v12241_v25, %v12241_v25 }
 0x67f   : > { %v6272_v9 = vadd.f32 %v6271_v17, %v6270_v56  ;;  %v6372_v55 = vadd.f32 %v6371_v47, %v6370_v1  ;;  %v6375_v54 = vsel %vm204_vm1, %v6317_v50, 0.0 }
 0x680   : > { %v6373_v7 = vsel %vm204_vm1, %v6316_v38, 0.0  ;;  %v12253_v36 = vpop.f32.mrb[28].mxu1 }
 0x681   : > { %v6374_v3 = vadd.f32 %v6373_v7, %v6372_v55  ;;  %v12255_v30 = vpop.f32.mrb[29].mxu1  ;;  %v6274_v26 = vadd.f32 %v6273_v19, %v6272_v9  ;;  %v6319_v5 = vmul.f32 %v12253_v36, %v12253_v36  ;;  %v6277_v8 = vsel %vm204_vm1, %v12253_v36, 0.0 }
 0x682   : > { %v6275_v20 = vsel %vm204_vm1, %v12255_v30, 0.0  ;;  %v6318_v29 = vmul.f32 %v12255_v30, %v12255_v30 }
 0x683   : > { %v6276_v61 = vadd.f32 %v6275_v20, %v6274_v26  ;;  %v6376_v4 = vadd.f32 %v6375_v54, %v6374_v3  ;;  %v6379_v43 = vsel %vm204_vm1, %v6319_v5, 0.0 }
 0x684   : > { %v6377_v62 = vsel %vm204_vm1, %v6318_v29, 0.0  ;;  %v12267_v49 = vpop.f32.mrb[30].mxu1 }
 0x685   : > { %v6378_v33 = vadd.f32 %v6377_v62, %v6376_v4  ;;  %v12269_v10 = vpop.f32.mrb[31].mxu1  ;;  %v6278_v48 = vadd.f32 %v6277_v8, %v6276_v61  ;;  %v6321_v60 = vmul.f32 %v12267_v49, %v12267_v49  ;;  %v6281_v22 = vsel %vm204_vm1, %v12267_v49, 0.0 }
 0x686   : > { %v6279_v34 = vsel %vm204_vm1, %v12269_v10, 0.0  ;;  %v6320_v6 = vmul.f32 %v12269_v10, %v12269_v10 }
 0x687   : > { %v6280_v41 = vadd.f32 %v6279_v34, %v6278_v48  ;;  %v6380_v16 = vadd.f32 %v6379_v43, %v6378_v33  ;;  %v6383_v1 = vsel %vm204_vm1, %v6321_v60, 0.0 }
 0x688   : > { %v6381_v28 = vsel %vm204_vm1, %v6320_v6, 0.0 }
 0x689   : > { %v6282_v23 = vadd.f32 %v6281_v22, %v6280_v41  ;;  %v6382_v12 = vadd.f32 %v6381_v28, %v6380_v16 }
 0x68b   : > { %v6283_v56 = vrot.slane %v6282_v23, 4  ;;  %v6384_v47 = vadd.f32 %v6383_v1, %v6382_v12 }
 0x68d   : > { %v6284_v50 = vadd.f32 %v6283_v56, %v6282_v23  ;;  %v6385_v17 = vrot.slane %v6384_v47, 4 }
 0x68f   : > { %v6285_v38 = vrot.slane %v6284_v50, 2  ;;  %v6386_v9 = vadd.f32 %v6385_v17, %v6384_v47 }
 0x691   : > { %v6286_v55 = vadd.f32 %v6285_v38, %v6284_v50  ;;  %v6387_v19 = vrot.slane %v6386_v9, 2 }
 0x693   : > { %v6287_v7 = vrot.slane %v6286_v55, 1  ;;  %v6388_v3 = vadd.f32 %v6387_v19, %v6386_v9 }
 0x695   : > { %v6288_v26 = vadd.f32 %v6287_v7, %v6286_v55  ;;  %v6389_v54 = vrot.slane %v6388_v3, 1 }
 0x697   : > { %v6289_v5 = vmul.f32 0.00390625, %v6288_v26  ;;  %v6390_v20 = vadd.f32 %v6389_v54, %v6388_v3 }
 0x699   : > { %v6391_v29 = vmul.f32 0.00390625, %v6390_v20  ;;  %v6392_v61 = vmul.f32 %v6289_v5, %v6289_v5 }
 0x69b   : > { %v6393_v4 = vsub.f32 %v6391_v29, %v6392_v61 }
 0x69d   : > { %v6394_v8 = vadd.f32 1e-05, %v6393_v4 }
 0x69f   : > { %9219 = vrsqrt.f32 %v6394_v8 }
 0x6a9   : > { %v9220_v62 = vpop.eup %9219 }
 0x6aa   : > { %v12283_v33 = vmul.f32 %v9220_v62, %v12064_v42  ;;  %v12286_v48 = vmul.f32 %v9220_v62, %v12058_v37  ;;  %v12289_v43 = vmul.f32 %v9220_v62, %v12074_v51  ;;  %v12292_v60 = vmul.f32 %v9220_v62, %v12072_v0 }
 0x6ab   : > { %v12295_v34 = vmul.f32 %v9220_v62, %v12087_v52  ;;  %v12298_v6 = vmul.f32 %v9220_v62, %v12085_v44  ;;  %v12301_v41 = vmul.f32 %v9220_v62, %v12101_v11  ;;  %v12304_v42 = vmul.f32 %v9220_v62, %v12099_v2 }
 0x6ac   : > { %v12307_v37 = vmul.f32 %v9220_v62, %v12115_v27  ;;  %v12310_v51 = vmul.f32 %v9220_v62, %v12113_v58  ;;  %v12313_v0 = vmul.f32 %v9220_v62, %v12129_v31  ;;  %v12316_v52 = vmul.f32 %v9220_v62, %v12127_v15 }
 0x6ad   : > { %v12319_v44 = vmul.f32 %v9220_v62, %v12143_v35  ;;  %v12322_v11 = vmul.f32 %v9220_v62, %v12141_v59  ;;  %v12325_v2 = vmul.f32 %v9220_v62, %v12157_v24  ;;  %v12328_v27 = vmul.f32 %v9220_v62, %v12155_v13 }
 0x6ae   : > { %v12331_v58 = vmul.f32 %v9220_v62, %v12171_v21  ;;  %v12334_v31 = vmul.f32 %v9220_v62, %v12169_v57  ;;  %v12337_v15 = vmul.f32 %v9220_v62, %v12185_v18  ;;  %v12340_v35 = vmul.f32 %v9220_v62, %v12183_v32 }
 0x6af   : > { %v12343_v59 = vmul.f32 %v9220_v62, %v12199_v39  ;;  %v12346_v24 = vmul.f32 %v9220_v62, %v12197_v40  ;;  %v12349_v13 = vmul.f32 %v9220_v62, %v12213_v63  ;;  %v12352_v21 = vmul.f32 %v9220_v62, %v12211_v45 }
 0x6b0   : > { %v12355_v57 = vmul.f32 %v9220_v62, %v12227_v14  ;;  %v12358_v18 = vmul.f32 %v9220_v62, %v12225_v53  ;;  %v12361_v32 = vmul.f32 %v9220_v62, %v12241_v25  ;;  %v12364_v39 = vmul.f32 %v9220_v62, %v12239_v46 }
 0x6b1   : > { %v12367_v40 = vmul.f32 %v9220_v62, %v12255_v30  ;;  %v12370_v63 = vmul.f32 %v9220_v62, %v12253_v36  ;;  %v12373_v45 = vmul.f32 %v9220_v62, %v12269_v10  ;;  %v12376_v14 = vmul.f32 %v9220_v62, %v12267_v49 }
 0x6b2   : > { %v12378_v53 = vmul.f32 %v9220_v62, %v6289_v5 }
 0x6b4   : > { %v6429_v25 = vsub.f32 %v12283_v33, %v12378_v53  ;;  %v6430_v46 = vsub.f32 %v12286_v48, %v12378_v53  ;;  %v6431_v30 = vsub.f32 %v12289_v43, %v12378_v53  ;;  %v6432_v36 = vsub.f32 %v12292_v60, %v12378_v53  ;;  %v12822_v48 = vld [vmem:[#allocation3_spill] sm:$0xff]  ;;  %v12823_v60 = vld [vmem:[#allocation4_spill] sm:$0xff] }
 0x6b5   : > { %v6433_v10 = vsub.f32 %v12295_v34, %v12378_v53  ;;  %v6434_v49 = vsub.f32 %v12298_v6, %v12378_v53  ;;  %v6435_v16 = vsub.f32 %v12301_v41, %v12378_v53  ;;  %v6436_v22 = vsub.f32 %v12304_v42, %v12378_v53  ;;  %v12824_v6 = vld [vmem:[#allocation5_spill] sm:$0xff]  ;;  %v12825_v42 = vld [vmem:[#allocation6_spill] sm:$0xff] }
 0x6b6   : > { %v6437_v28 = vsub.f32 %v12307_v37, %v12378_v53  ;;  %v6438_v23 = vsub.f32 %v12310_v51, %v12378_v53  ;;  %v6439_v12 = vsub.f32 %v12313_v0, %v12378_v53  ;;  %v6440_v1 = vsub.f32 %v12316_v52, %v12378_v53  ;;  %v12826_v51 = vld [vmem:[#allocation7_spill] sm:$0xff]  ;;  %v12827_v52 = vld [vmem:[#allocation8_spill] sm:$0xff] }
 0x6b7   : > { %v6441_v56 = vsub.f32 %v12319_v44, %v12378_v53  ;;  %v6442_v47 = vsub.f32 %v12322_v11, %v12378_v53  ;;  %v6443_v50 = vsub.f32 %v12325_v2, %v12378_v53  ;;  %v6444_v17 = vsub.f32 %v12328_v27, %v12378_v53  ;;  %v12828_v11 = vld [vmem:[#allocation9_spill] sm:$0xff]  ;;  %v12829_v27 = vld [vmem:[#allocation10_spill] sm:$0xff] }
 0x6b8   : > { %v6445_v38 = vsub.f32 %v12331_v58, %v12378_v53  ;;  %v6446_v9 = vsub.f32 %v12334_v31, %v12378_v53  ;;  %v6447_v55 = vsub.f32 %v12337_v15, %v12378_v53  ;;  %v6448_v19 = vsub.f32 %v12340_v35, %v12378_v53  ;;  %v12830_v31 = vld [vmem:[#allocation11_spill] sm:$0xff]  ;;  %v12831_v35 = vld [vmem:[#allocation12_spill] sm:$0xff] }
 0x6b9   : > { %v6449_v7 = vsub.f32 %v12343_v59, %v12378_v53  ;;  %v6450_v3 = vsub.f32 %v12346_v24, %v12378_v53  ;;  %v6451_v26 = vsub.f32 %v12349_v13, %v12378_v53  ;;  %v6452_v54 = vsub.f32 %v12352_v21, %v12378_v53  ;;  %v12832_v24 = vld [vmem:[#allocation13_spill] sm:$0xff]  ;;  %v12833_v21 = vld [vmem:[#allocation14_spill] sm:$0xff] }
 0x6ba   : > { %v6453_v5 = vsub.f32 %v12355_v57, %v12378_v53  ;;  %v6454_v20 = vsub.f32 %v12358_v18, %v12378_v53  ;;  %v6455_v29 = vsub.f32 %v12361_v32, %v12378_v53  ;;  %v6456_v61 = vsub.f32 %v12364_v39, %v12378_v53  ;;  %v12834_v18 = vld [vmem:[#allocation15_spill] sm:$0xff]  ;;  %v12835_v39 = vld [vmem:[#allocation16_spill] sm:$0xff] }
 0x6bb   : > { %v6457_v4 = vsub.f32 %v12367_v40, %v12378_v53  ;;  %v6458_v8 = vsub.f32 %v12370_v63, %v12378_v53  ;;  %v6459_v62 = vsub.f32 %v12373_v45, %v12378_v53  ;;  %v6460_v33 = vsub.f32 %v12376_v14, %v12378_v53  ;;  %v12836_v63 = vld [vmem:[#allocation17_spill] sm:$0xff]  ;;  %v12837_v14 = vld [vmem:[#allocation18_spill] sm:$0xff] }
 0x6bc   : > { %v6461_v43 = vadd.f32 %v6429_v25, %v12822_v48  ;;  %v6462_v34 = vadd.f32 %v6430_v46, %v12823_v60  ;;  %v6463_v41 = vadd.f32 %v6431_v30, %v12824_v6  ;;  %v6464_v37 = vadd.f32 %v6432_v36, %v12825_v42  ;;  %v12838_v25 = vld [vmem:[#allocation19_spill] sm:$0xff]  ;;  %v12839_v30 = vld [vmem:[#allocation20_spill] sm:$0xff] }
 0x6bd   : > { %v6465_v0 = vadd.f32 %v6433_v10, %v12826_v51  ;;  %v6466_v44 = vadd.f32 %v6434_v49, %v12827_v52  ;;  %v6467_v2 = vadd.f32 %v6435_v16, %v12828_v11  ;;  %v6468_v58 = vadd.f32 %v6436_v22, %v12829_v27  ;;  %v12840_v10 = vld [vmem:[#allocation21_spill] sm:$0xff]  ;;  %v12841_v16 = vld [vmem:[#allocation22_spill] sm:$0xff]  ;;  %v12851_v48 = vld [vmem:[#allocation32_spill] sm:$0xff] }
 0x6be   : > { %v6469_v15 = vadd.f32 %v6437_v28, %v12830_v31  ;;  %v6470_v59 = vadd.f32 %v6438_v23, %v12831_v35  ;;  %v6471_v13 = vadd.f32 %v6439_v12, %v12832_v24  ;;  %v6472_v57 = vadd.f32 %v6440_v1, %v12833_v21  ;;  %6493 = vst.msk [vmem:[%s12441_s5] sm:$0xff] %vm204_vm1, %v6461_v43  ;;  %v12842_v28 = vld [vmem:[#allocation23_spill] sm:$0xff]  ;;  %v12843_v12 = vld [vmem:[#allocation24_spill] sm:$0xff]  ;;  %v12852_v43 = vld [vmem:[#allocation33_spill] sm:$0xff] }
 0x6bf   : > { %6494 = vst.msk [vmem:[%s12441_s5 + $0x8] sm:$0xff] %vm204_vm1, %v6462_v34  ;;  %6495 = vst.msk [vmem:[%s12441_s5 + $0x10] sm:$0xff] %vm204_vm1, %v6463_v41  ;;  %v6473_v32 = vadd.f32 %v6441_v56, %v12834_v18  ;;  %v6474_v40 = vadd.f32 %v6442_v47, %v12835_v39  ;;  %v6475_v45 = vadd.f32 %v6443_v50, %v12836_v63  ;;  %v12844_v56 = vld [vmem:[#allocation25_spill] sm:$0xff]  ;;  %v12845_v50 = vld [vmem:[#allocation26_spill] sm:$0xff] }
 0x6c0   : > { %6496 = vst.msk [vmem:[%s12441_s5 + $0x18] sm:$0xff] %vm204_vm1, %v6464_v37  ;;  %v6476_v53 = vadd.f32 %v6444_v17, %v12837_v14  ;;  %6497 = vst.msk [vmem:[%s12441_s5 + $0x20] sm:$0xff] %vm204_vm1, %v6465_v0  ;;  %v6477_v46 = vadd.f32 %v6445_v38, %v12838_v25  ;;  %v6478_v36 = vadd.f32 %v6446_v9, %v12839_v30  ;;  %v12846_v38 = vld [vmem:[#allocation27_spill] sm:$0xff] }
 0x6c1   : > { %6498 = vst.msk [vmem:[%s12441_s5 + $0x28] sm:$0xff] %vm204_vm1, %v6466_v44  ;;  %6499 = vst.msk [vmem:[%s12441_s5 + $0x30] sm:$0xff] %vm204_vm1, %v6467_v2  ;;  %v6479_v49 = vadd.f32 %v6447_v55, %v12840_v10  ;;  %v6480_v22 = vadd.f32 %v6448_v19, %v12841_v16  ;;  %v6481_v23 = vadd.f32 %v6449_v7, %v12842_v28  ;;  %v12847_v55 = vld [vmem:[#allocation28_spill] sm:$0xff]  ;;  %v12848_v7 = vld [vmem:[#allocation29_spill] sm:$0xff] }
 0x6c2   : > { %6500 = vst.msk [vmem:[%s12441_s5 + $0x38] sm:$0xff] %vm204_vm1, %v6468_v58  ;;  %6501 = vst.msk [vmem:[%s12441_s5 + $0x40] sm:$0xff] %vm204_vm1, %v6469_v15  ;;  %v6482_v1 = vadd.f32 %v6450_v3, %v12843_v12  ;;  %v6483_v47 = vadd.f32 %v6451_v26, %v12844_v56  ;;  %v6484_v17 = vadd.f32 %v6452_v54, %v12845_v50  ;;  %v12849_v26 = vld [vmem:[#allocation30_spill] sm:$0xff] }
 0x6c3   : > { %6502 = vst.msk [vmem:[%s12441_s5 + $0x48] sm:$0xff] %vm204_vm1, %v6470_v59  ;;  %6503 = vst.msk [vmem:[%s12441_s5 + $0x50] sm:$0xff] %vm204_vm1, %v6471_v13  ;;  %v6485_v9 = vadd.f32 %v6453_v5, %v12846_v38  ;;  %v6486_v19 = vadd.f32 %v6454_v20, %v12847_v55  ;;  %v6487_v3 = vadd.f32 %v6455_v29, %v12848_v7  ;;  %v12850_v5 = vld [vmem:[#allocation31_spill] sm:$0xff] }
 0x6c4   : > { %6504 = vst.msk [vmem:[%s12441_s5 + $0x58] sm:$0xff] %vm204_vm1, %v6472_v57  ;;  %6505 = vst.msk [vmem:[%s12441_s5 + $0x60] sm:$0xff] %vm204_vm1, %v6473_v32  ;;  %v6488_v54 = vadd.f32 %v6456_v61, %v12849_v26  ;;  %v6489_v20 = vadd.f32 %v6457_v4, %v12850_v5  ;;  %v6490_v29 = vadd.f32 %v6458_v8, %v12851_v48  ;;  %v12853_v61 = vld [vmem:[#allocation34_spill] sm:$0xff] }
 0x6c5   : > { %6506 = vst.msk [vmem:[%s12441_s5 + $0x68] sm:$0xff] %vm204_vm1, %v6474_v40  ;;  %6507 = vst.msk [vmem:[%s12441_s5 + $0x70] sm:$0xff] %vm204_vm1, %v6475_v45  ;;  %v6491_v60 = vadd.f32 %v6459_v62, %v12852_v43  ;;  %v6492_v34 = vadd.f32 %v6460_v33, %v12853_v61 }
 0x6c6   : > { %6508 = vst.msk [vmem:[%s12441_s5 + $0x78] sm:$0xff] %vm204_vm1, %v6476_v53  ;;  %6509 = vst.msk [vmem:[%s12441_s5 + $0x80] sm:$0xff] %vm204_vm1, %v6477_v46 }
 0x6c7   : > { %6510 = vst.msk [vmem:[%s12441_s5 + $0x88] sm:$0xff] %vm204_vm1, %v6478_v36  ;;  %6511 = vst.msk [vmem:[%s12441_s5 + $0x90] sm:$0xff] %vm204_vm1, %v6479_v49 }
 0x6c8   : > { %6512 = vst.msk [vmem:[%s12441_s5 + $0x98] sm:$0xff] %vm204_vm1, %v6480_v22  ;;  %6513 = vst.msk [vmem:[%s12441_s5 + $0xa0] sm:$0xff] %vm204_vm1, %v6481_v23 }
 0x6c9   : > { %6514 = vst.msk [vmem:[%s12441_s5 + $0xa8] sm:$0xff] %vm204_vm1, %v6482_v1  ;;  %6515 = vst.msk [vmem:[%s12441_s5 + $0xb0] sm:$0xff] %vm204_vm1, %v6483_v47 }
 0x6ca   : > { %6516 = vst.msk [vmem:[%s12441_s5 + $0xb8] sm:$0xff] %vm204_vm1, %v6484_v17  ;;  %6517 = vst.msk [vmem:[%s12441_s5 + $0xc0] sm:$0xff] %vm204_vm1, %v6485_v9 }
 0x6cb   : > { %6518 = vst.msk [vmem:[%s12441_s5 + $0xc8] sm:$0xff] %vm204_vm1, %v6486_v19  ;;  %6519 = vst.msk [vmem:[%s12441_s5 + $0xd0] sm:$0xff] %vm204_vm1, %v6487_v3 }
 0x6cc   : > { %6520 = vst.msk [vmem:[%s12441_s5 + $0xd8] sm:$0xff] %vm204_vm1, %v6488_v54  ;;  %6521 = vst.msk [vmem:[%s12441_s5 + $0xe0] sm:$0xff] %vm204_vm1, %v6489_v20 }
 0x6cd   : > { %6522 = vst.msk [vmem:[%s12441_s5 + $0xe8] sm:$0xff] %vm204_vm1, %v6490_v29  ;;  %6523 = vst.msk [vmem:[%s12441_s5 + $0xf0] sm:$0xff] %vm204_vm1, %v6491_v60 }
 0x6ce   : > { %6524 = vst.msk [vmem:[%s12441_s5 + $0xf8] sm:$0xff] %vm204_vm1, %v6492_v34 }
 0x6cf PF: > { %s13_s12 = sadd.s32 1, %s9227_s12  }
 0x6d0   : > { %p10_p4 = scmp.ge.s32.totalorder %s13_s12, 4  }
 0x6d2   :  { %12 = sbr.rel (!%p10_p4) target bundleno = 1 (0x1), region = 80 }

</bundles_post_ra>
